<compile_context>
chip_gen: v7x
topology: tpu7x:2x2x1
jax: 0.10.0
libtpu: 0.0.40
codegen_flags: <defaults>
</compile_context>

<pallas_src>
from functools import lru_cache

import numpy as np
import jax
import jax.numpy as jnp
from jax.experimental import pallas as pl
from jax.experimental.pallas import tpu as pltpu

R = 0.995
K = 2000                               # truncated impulse-response length
ZPAD = K - 1                           # left zero padding (as in the torch module)

FRAME = 512                            # output samples per frame (matmul N dim)
NB = -(-(FRAME + K - 1) // FRAME)      # number of band blocks (= 5 for FRAME=512)
HALO = 16                              # halo chunks fetched past the tile (>= NB-1,
                                       # multiple of 16 for bf16 sublane tiling)
TILE_M = 256                           # frames per grid step (matmul M dim)


def _round_up(x, m):
    return -(-x // m) * m


def _impulse_response_np():
    # h[0] = 1, h[n] = (R - 1) * R**(n-1) for n >= 1
    n = np.arange(K, dtype=np.float64)
    h = np.where(n == 0, 1.0, (R - 1.0) * np.power(R, np.maximum(n - 1.0, 0.0)))
    return h.astype(np.float32)


@lru_cache(maxsize=None)
def _band_weight_np():
    # pars = flip(h); torch conv1d is correlation: y[t] = sum_k x_pad[t+k]*pars[k].
    # Band-Toeplitz form shared by every frame j:
    #   y[j*F + u] = sum_m x_pad[j*F + m] * W[m, u],  W[m, u] = pars[m-u] for
    #   0 <= m - u < K, else 0.  Split m into NB blocks of F rows, and duplicate
    #   each block vertically so the hi/lo halves of x use the same taps.
    pars = _impulse_response_np()[::-1]
    m = np.arange(NB * FRAME)[:, None]
    u = np.arange(FRAME)[None, :]
    d = m - u
    w = np.where((d >= 0) & (d < K), pars[np.clip(d, 0, K - 1)], 0.0)
    w = w.astype(np.float32).reshape(NB, FRAME, FRAME)
    return np.concatenate([w, w], axis=1)                 # (NB, 2*FRAME, FRAME)


@lru_cache(maxsize=None)
def _band_weight_device():
    # Built once, cast to bf16 (round-to-nearest) on device.
    return jnp.asarray(_band_weight_np(), dtype=jnp.bfloat16)


@lru_cache(maxsize=None)
def _single_buffered_w_supported():
    """Probe once whether pipeline_mode=pl.Buffered(1) is accepted; else fall back."""
    if not hasattr(pl, "Buffered"):
        return False
    try:
        def _probe(a_ref, o_ref):
            o_ref[...] = a_ref[...]

        out = pl.pallas_call(
            _probe,
            out_shape=jax.ShapeDtypeStruct((8, 128), jnp.float32),
            grid=(2,),
            in_specs=[pl.BlockSpec((8, 128), lambda i: (0, 0),
                                   pipeline_mode=pl.Buffered(1))],
            out_specs=pl.BlockSpec((8, 128), lambda i: (0, 0)),
        )(jnp.ones((8, 128), jnp.float32))
        jax.block_until_ready(out)
        return True
    except Exception:
        return False


def _preemph_band_kernel(w_ref, xm_ref, xh_ref, out_ref):
    """Band-Toeplitz matmul for one (frame-tile, signal) grid cell.

    w_ref  : (NB, 2*FRAME, FRAME) bf16 — resident across the whole grid.
    xm_ref : (1, TILE, 2*FRAME)   bf16 — the TILE non-overlapping input chunks
             owned by this tile ([:, :FRAME] = hi half, [:, FRAME:] = lo half).
    xh_ref : (1, HALO, 2*FRAME)   bf16 — first HALO chunks of the next tile.
    out_ref: (1, TILE, FRAME)     f32.
    """
    tile = out_ref.shape[1]
    x_all = jnp.concatenate([xm_ref[0], xh_ref[0]], axis=0)      # (TILE+HALO, 2F)
    acc = jnp.dot(x_all[0:tile], w_ref[0], preferred_element_type=jnp.float32)
    for b in range(1, NB):                                       # static unroll (NB=5)
        acc = acc + jnp.dot(x_all[b:b + tile], w_ref[b],
                            preferred_element_type=jnp.float32)
    out_ref[0] = acc


def _dc_preemph_impl(output, target, w, use_buffered_w):
    B, T, _ = output.shape
    n_frames = -(-T // FRAME)
    tile = min(TILE_M, _round_up(n_frames, HALO))
    n_tiles = -(-n_frames // tile)
    n_frames_pad = n_tiles * tile
    n_chunks = n_frames_pad + HALO
    n_sig = 2 * B

    # Both signals are filtered identically -> one fused operand.  XLA fuses
    # this concat into the pad / cast below (no standalone HBM round trip).
    x = jnp.concatenate([output[..., 0], target[..., 0]], axis=0).astype(jnp.float32)

    # Left pad by zPad (as the torch module does); right pad so every tile and
    # its halo are in bounds.  The extra zeros never reach y[0:T].
    pad_right = n_chunks * FRAME - ZPAD - T
    x_pad = jnp.pad(x, ((0, 0), (ZPAD, pad_right)))

    # bf16 hi/lo split (x == hi + lo to ~2^-17 relative) so the MXU runs at
    # bf16 rate while the unit tap keeps near-f32 accuracy; f32 accumulation.
    x_hi = x_pad.astype(jnp.bfloat16)
    x_lo = (x_pad - x_hi.astype(jnp.float32)).astype(jnp.bfloat16)
    x_hi = x_hi.reshape(n_sig, n_chunks, FRAME)
    x_lo = x_lo.reshape(n_sig, n_chunks, FRAME)
    x_cat = jnp.concatenate([x_hi, x_lo], axis=-1)               # (n_sig, n_chunks, 2F)

    w_kwargs = {"pipeline_mode": pl.Buffered(1)} if use_buffered_w else {}
    w_spec = pl.BlockSpec((NB, 2 * FRAME, FRAME), lambda i, s: (0, 0, 0), **w_kwargs)
    main_spec = pl.BlockSpec((1, tile, 2 * FRAME), lambda i, s: (s, i, 0))
    halo_spec = pl.BlockSpec((1, HALO, 2 * FRAME),
                             lambda i, s: (s, (i + 1) * (tile // HALO), 0))
    out_spec = pl.BlockSpec((1, tile, FRAME), lambda i, s: (s, i, 0))

    y = pl.pallas_call(
        _preemph_band_kernel,
        out_shape=jax.ShapeDtypeStruct((n_sig, n_frames_pad, FRAME), jnp.float32),
        grid=(n_tiles, n_sig),
        in_specs=[w_spec, main_spec, halo_spec],
        out_specs=out_spec,
        compiler_params=pltpu.CompilerParams(
            dimension_semantics=("parallel", "parallel"),
            vmem_limit_bytes=48 * 1024 * 1024),     # ~10-16 MiB used; safe on v7x
    )(w, x_cat, x_cat)                              # same chunk array, two views

    y = y.reshape(n_sig, n_frames_pad * FRAME)[:, :T]
    return y[:B, :, None], y[B:, :, None]


_dc_preemph_jit = jax.jit(_dc_preemph_impl, static_argnames=("use_buffered_w",))


def dc_preemph(output, target):
    """Equivalent of DC_PreEmph.forward(output, target); inputs are (B, T, 1)."""
    assert output.shape == target.shape and output.shape[-1] == 1
    w = _band_weight_device()
    return _dc_preemph_jit(output, target, w,
                           use_buffered_w=_single_buffered_w_supported())


if __name__ == "__main__":
    B, T = 2, 16
    key = jax.random.PRNGKey(0)
    k0, k1 = jax.random.split(key)
    output = jax.random.normal(k0, (B, T, 1), dtype=jnp.float32)
    target = jax.random.normal(k1, (B, T, 1), dtype=jnp.float32)

    out_o, out_t = dc_preemph(output, target)
    jax.block_until_ready((out_o, out_t))

    # Independent reference: causal FIR y[t] = sum_j ir[j] * x[t - j] in f32.
    ir = jnp.asarray(_impulse_response_np())
    ref_fn = jax.vmap(lambda s: jnp.convolve(s, ir)[:T])
    ref_o = ref_fn(output[..., 0])[..., None]
    ref_t = ref_fn(target[..., 0])[..., None]

    assert out_o.shape == (B, T, 1) and out_t.shape == (B, T, 1)
    # bf16 weights / hi-lo bf16 inputs with f32 accumulation: ~1e-5 typical error.
    assert jnp.allclose(out_o, ref_o, atol=2e-4, rtol=0.0), \
        float(jnp.max(jnp.abs(out_o - ref_o)))
    assert jnp.allclose(out_t, ref_t, atol=2e-4, rtol=0.0), \
        float(jnp.max(jnp.abs(out_t - ref_t)))
    print("KERNEL_OK")
</pallas_src>

<mosaic_0001>
module attributes {stable_mosaic.version = 11 : i64} {
  func.func @_probe(%arg0: i32, %arg1: memref<8x128xf32, #tpu.memory_space<vmem>>, %arg2: memref<8x128xf32, #tpu.memory_space<vmem>>) attributes {dimension_semantics = [#tpu.dimension_semantics<arbitrary>], iteration_bounds = array<i64: 2>, scalar_prefetch = 0 : i64, scratch_operands = 0 : i64, tpu.core_type = #tpu.core_type<tc>, window_params = [{pipeline_mode = #tpu.pipeline_mode<synchronous>, transform_indices = @transform_0, window_bounds = array<i64: 8, 128>}, {pipeline_mode = #tpu.pipeline_mode<synchronous>, transform_indices = @transform_1, window_bounds = array<i64: 8, 128>}]} {
    %c0 = arith.constant 0 : index
    %c0_0 = arith.constant 0 : index
    %0 = vector.load %arg1[%c0, %c0_0] : memref<8x128xf32, #tpu.memory_space<vmem>>, vector<8x128xf32>
    %c0_1 = arith.constant 0 : index
    %c0_2 = arith.constant 0 : index
    %1 = vector.load %arg2[%c0_1, %c0_2] : memref<8x128xf32, #tpu.memory_space<vmem>>, vector<8x128xf32>
    tpu.vector_store %arg2[%c0_1, %c0_2], %0 {strides = array<i32>} : memref<8x128xf32, #tpu.memory_space<vmem>>, vector<8x128xf32>,
    return
  }
  func.func @transform_0(%arg0: i32) -> (i32, i32) {
    %c0_i32 = arith.constant 0 : i32
    %c0_i32_0 = arith.constant 0 : i32
    %c0_i32_1 = arith.constant 0 : i32
    return %c0_i32, %c0_i32_0 : i32, i32
  }
  func.func @transform_1(%arg0: i32) -> (i32, i32) {
    %c0_i32 = arith.constant 0 : i32
    %c0_i32_0 = arith.constant 0 : i32
    %c0_i32_1 = arith.constant 0 : i32
    return %c0_i32, %c0_i32_0 : i32, i32
  }
}

module attributes {stable_mosaic.version = 11 : i64} {
  func.func @_preemph_band_kernel(%arg0: i32, %arg1: i32, %arg2: memref<5x1024x512xbf16, #tpu.memory_space<vmem>>, %arg3: memref<1x16x1024xbf16, #tpu.memory_space<vmem>>, %arg4: memref<1x16x1024xbf16, #tpu.memory_space<vmem>>, %arg5: memref<1x16x512xf32, #tpu.memory_space<vmem>>) attributes {dimension_semantics = [#tpu.dimension_semantics<parallel>, #tpu.dimension_semantics<parallel>], iteration_bounds = array<i64: 1, 4>, scalar_prefetch = 0 : i64, scratch_operands = 0 : i64, tpu.core_type = #tpu.core_type<tc>, window_params = [{pipeline_mode = #tpu.pipeline_mode<synchronous>, transform_indices = @transform_0, window_bounds = array<i64: 5, 1024, 512>}, {transform_indices = @transform_1, window_bounds = array<i64: 1, 16, 1024>}, {transform_indices = @transform_2, window_bounds = array<i64: 1, 16, 1024>}, {transform_indices = @transform_3, window_bounds = array<i64: 1, 16, 512>}]} {
    %c0 = arith.constant 0 : index
    %c0_0 = arith.constant 0 : index
    %c0_1 = arith.constant 0 : index
    %0 = vector.load %arg3[%c0, %c0_0, %c0_1] : memref<1x16x1024xbf16, #tpu.memory_space<vmem>>, vector<1x16x1024xbf16>
    %1 = vector.shape_cast %0 : vector<1x16x1024xbf16> to vector<16x1024xbf16>
    %c0_2 = arith.constant 0 : index
    %c0_3 = arith.constant 0 : index
    %c0_4 = arith.constant 0 : index
    %2 = vector.load %arg4[%c0_2, %c0_3, %c0_4] : memref<1x16x1024xbf16, #tpu.memory_space<vmem>>, vector<1x16x1024xbf16>
    %3 = vector.shape_cast %2 : vector<1x16x1024xbf16> to vector<16x1024xbf16>
    %4 = tpu.concatenate %1, %3 in 0 : vector<16x1024xbf16>, vector<16x1024xbf16> -> vector<32x1024xbf16>
    %5 = vector.extract_strided_slice %4 {offsets = [0, 0], sizes = [16, 1024], strides = [1, 1]} : vector<32x1024xbf16> to vector<16x1024xbf16>
    %c0_5 = arith.constant 0 : index
    %c0_6 = arith.constant 0 : index
    %c0_7 = arith.constant 0 : index
    %6 = vector.load %arg2[%c0_5, %c0_6, %c0_7] : memref<5x1024x512xbf16, #tpu.memory_space<vmem>>, vector<1x1024x512xbf16>
    %7 = vector.shape_cast %6 : vector<1x1024x512xbf16> to vector<1024x512xbf16>
    %cst = arith.constant dense<0.000000e+00> : vector<16x512xf32>
    %8 = tpu.matmul %5, %7, %cst {dimension_numbers = #tpu.dot_dimension_numbers<[1], [0], [0], [1], [0, 0, 1, 1], [], []>} : vector<16x1024xbf16>, vector<1024x512xbf16>, vector<16x512xf32> -> vector<16x512xf32>
    %9 = vector.extract_strided_slice %4 {offsets = [1, 0], sizes = [16, 1024], strides = [1, 1]} : vector<32x1024xbf16> to vector<16x1024xbf16>
    %c1 = arith.constant 1 : index
    %c0_8 = arith.constant 0 : index
    %c0_9 = arith.constant 0 : index
    %10 = vector.load %arg2[%c1, %c0_8, %c0_9] : memref<5x1024x512xbf16, #tpu.memory_space<vmem>>, vector<1x1024x512xbf16>
    %11 = vector.shape_cast %10 : vector<1x1024x512xbf16> to vector<1024x512xbf16>
    %cst_10 = arith.constant dense<0.000000e+00> : vector<16x512xf32>
    %12 = tpu.matmul %9, %11, %cst_10 {dimension_numbers = #tpu.dot_dimension_numbers<[1], [0], [0], [1], [0, 0, 1, 1], [], []>} : vector<16x1024xbf16>, vector<1024x512xbf16>, vector<16x512xf32> -> vector<16x512xf32>
    %13 = arith.addf %8, %12 : vector<16x512xf32>
    %14 = vector.extract_strided_slice %4 {offsets = [2, 0], sizes = [16, 1024], strides = [1, 1]} : vector<32x1024xbf16> to vector<16x1024xbf16>
    %c2 = arith.constant 2 : index
    %c0_11 = arith.constant 0 : index
    %c0_12 = arith.constant 0 : index
    %15 = vector.load %arg2[%c2, %c0_11, %c0_12] : memref<5x1024x512xbf16, #tpu.memory_space<vmem>>, vector<1x1024x512xbf16>
    %16 = vector.shape_cast %15 : vector<1x1024x512xbf16> to vector<1024x512xbf16>
    %cst_13 = arith.constant dense<0.000000e+00> : vector<16x512xf32>
    %17 = tpu.matmul %14, %16, %cst_13 {dimension_numbers = #tpu.dot_dimension_numbers<[1], [0], [0], [1], [0, 0, 1, 1], [], []>} : vector<16x1024xbf16>, vector<1024x512xbf16>, vector<16x512xf32> -> vector<16x512xf32>
    %18 = arith.addf %13, %17 : vector<16x512xf32>
    %19 = vector.extract_strided_slice %4 {offsets = [3, 0], sizes = [16, 1024], strides = [1, 1]} : vector<32x1024xbf16> to vector<16x1024xbf16>
    %c3 = arith.constant 3 : index
    %c0_14 = arith.constant 0 : index
    %c0_15 = arith.constant 0 : index
    %20 = vector.load %arg2[%c3, %c0_14, %c0_15] : memref<5x1024x512xbf16, #tpu.memory_space<vmem>>, vector<1x1024x512xbf16>
    %21 = vector.shape_cast %20 : vector<1x1024x512xbf16> to vector<1024x512xbf16>
    %cst_16 = arith.constant dense<0.000000e+00> : vector<16x512xf32>
    %22 = tpu.matmul %19, %21, %cst_16 {dimension_numbers = #tpu.dot_dimension_numbers<[1], [0], [0], [1], [0, 0, 1, 1], [], []>} : vector<16x1024xbf16>, vector<1024x512xbf16>, vector<16x512xf32> -> vector<16x512xf32>
    %23 = arith.addf %18, %22 : vector<16x512xf32>
    %24 = vector.extract_strided_slice %4 {offsets = [4, 0], sizes = [16, 1024], strides = [1, 1]} : vector<32x1024xbf16> to vector<16x1024xbf16>
    %c4 = arith.constant 4 : index
    %c0_17 = arith.constant 0 : index
    %c0_18 = arith.constant 0 : index
    %25 = vector.load %arg2[%c4, %c0_17, %c0_18] : memref<5x1024x512xbf16, #tpu.memory_space<vmem>>, vector<1x1024x512xbf16>
    %26 = vector.shape_cast %25 : vector<1x1024x512xbf16> to vector<1024x512xbf16>
    %cst_19 = arith.constant dense<0.000000e+00> : vector<16x512xf32>
    %27 = tpu.matmul %24, %26, %cst_19 {dimension_numbers = #tpu.dot_dimension_numbers<[1], [0], [0], [1], [0, 0, 1, 1], [], []>} : vector<16x1024xbf16>, vector<1024x512xbf16>, vector<16x512xf32> -> vector<16x512xf32>
    %28 = arith.addf %23, %27 : vector<16x512xf32>
    %c0_20 = arith.constant 0 : index
    %c0_21 = arith.constant 0 : index
    %c0_22 = arith.constant 0 : index
    %29 = vector.load %arg5[%c0_20, %c0_21, %c0_22] : memref<1x16x512xf32, #tpu.memory_space<vmem>>, vector<1x16x512xf32>
    %30 = vector.shape_cast %29 : vector<1x16x512xf32> to vector<16x512xf32>
    %31 = vector.shape_cast %28 : vector<16x512xf32> to vector<1x16x512xf32>
    tpu.vector_store %arg5[%c0_20, %c0_21, %c0_22], %31 {strides = array<i32>} : memref<1x16x512xf32, #tpu.memory_space<vmem>>, vector<1x16x512xf32>,
    return
  }
  func.func @transform_0(%arg0: i32, %arg1: i32) -> (i32, i32, i32) {
    %c0_i32 = arith.constant 0 : i32
    %c0_i32_0 = arith.constant 0 : i32
    %c0_i32_1 = arith.constant 0 : i32
    %c0_i32_2 = arith.constant 0 : i32
    return %c0_i32, %c0_i32_0, %c0_i32_1 : i32, i32, i32
  }
  func.func @transform_1(%arg0: i32, %arg1: i32) -> (i32, i32, i32) {
    %c0_i32 = arith.constant 0 : i32
    %c0_i32_0 = arith.constant 0 : i32
    return %arg1, %arg0, %c0_i32 : i32, i32, i32
  }
  func.func @transform_2(%arg0: i32, %arg1: i32) -> (i32, i32, i32) {
    %c1_i32 = arith.constant 1 : i32
    %0 = arith.addi %arg0, %c1_i32 : i32
    %c1_i32_0 = arith.constant 1 : i32
    %1 = arith.muli %0, %c1_i32_0 : i32
    %c0_i32 = arith.constant 0 : i32
    %c0_i32_1 = arith.constant 0 : i32
    return %arg1, %1, %c0_i32 : i32, i32, i32
  }
  func.func @transform_3(%arg0: i32, %arg1: i32) -> (i32, i32, i32) {
    %c0_i32 = arith.constant 0 : i32
    %c0_i32_0 = arith.constant 0 : i32
    return %arg1, %arg0, %c0_i32 : i32, i32, i32
  }
}

</mosaic_0001>

<bundles_post_ra>
// kernel: tpu_custom_call.1
= control target key start
LH: loop header
LB: loop body
LE: loop exit
PB: predicated region body
PF: predicated region fallthrough
CT: control target
= control target key end

     0   :  { %6 = vsyncpa [#allocation3], 0  ;;  %s340_s0 = inlined_call_operand.hbm [shape: f32[8,128], index: 0, kind: input, shape index: {}]   ;;  %s341_s1 = inlined_call_operand.hbm [shape: f32[8,128], index: 1, kind: output, shape index: {}]  }
   0x1   :  { %7 = vsyncpa [#allocation4], 0  ;;  %s261_s6 = smov 0  }
   0x2 LB: > { %s144_s7 = sadd.s32 4294967295, %s247_s6   ;;  %p145_p0 = scmp.ge.s32.totalorder %s247_s6, 1  ;;  %s247_s6 = sphi %s261_s6, %s13_s6  }
   0x3   : > { %p60_p1 = scmp.lt.s32.totalorder %s247_s6, 3  ;;  %p275_p3 = scmp.eq.s32.totalorder %s144_s7, 0 }
   0x4   : > { %s249_s10 = smov [#allocation2]   ;;  %s179_s15 = scalar_lea.hbm %s340_s0, 128 }
   0x5   : > { %p269_p2 = pnand %p145_p0, %p60_p1  ;;  %s73_s11 = sshll.u32 %s249_s10, 4  ;;  %s74_s11 = int_to_ptr.vmem [resolvable:$true] %s73_s11 }
   0x6   : > { %s346_s9 = scalar_select %p275_p3, 1, 0 }
   0x7   : > { %s345_s8 = scalar_select %p269_p2, 1, 0 }
   0x8   : > { %p161_p4 = pneg %p269_p2  ;;  %p180_p6 = scmp.ne.s32.totalorder %s340_s0, %s179_s15 }
   0x9   : > { %p186_p10 = scmp.lt.u32.totalorder %s179_s15, %s340_s0 }
   0xa   : > { %p283_p5 = pnand %p275_p3, %p161_p4 }
   0xc   : > { %p181_p7 = pneg %p283_p5 }
   0xe   : > { %p182_p8 = pnand %p181_p7, %p180_p6 }
  0x10   : > { %p183_p9 = pneg %p182_p8 }
  0x12   : > { %p188_p11 = pnand %p186_p10, %p183_p9 }
  0x14   : > { %191 = shalt.err (!%p188_p11)
}
  0x15   : > { %s192_s20 = scalar_lea.vmem %s74_s11, 128  ;;  %p200_p1 = scmp.lt.s32.totalorder %s74_s11, %s74_s11 }
  0x16   : > { %p193_p12 = scmp.ne.s32.totalorder %s74_s11, %s192_s20  ;;  %p201_p4 = scmp.lt.s32.totalorder %s192_s20, %s192_s20 }
  0x18   : > { %p195_p13 = pnand %p193_p12, %p181_p7  ;;  %p202_p3 = por %p201_p4, %p200_p1 }
  0x1a   : > { %p196_p0 = pneg %p195_p13 }
  0x1c   : > { %p203_p2 = pnand %p202_p3, %p196_p0 }
  0x1e   : > { %206 = shalt.err (!%p203_p2)
}
  0x1f   : > { %164 = dma.hbm_to_vmem [thread:$0]  (!%p283_p5), %s340_s0, 128, %s74_s11, [#allocation3]  }
  0x20   : > { %p348_p6 = scmp.ne.s32.totalorder %s345_s8, 0 }
  0x21   : > { %p349_p8 = scmp.ne.s32.totalorder (!%p348_p6), %s346_s9, 0 }
  0x22   : > { %86 = sbr.rel (%p348_p6) target bundleno = 67 (0x43), region = 24 }
  0x29   : > { %238 = dma.done.wait (%p349_p8), [#allocation3], 128  }
  0x2a   : > { %240 = vsyncadd (%p349_p8), [#allocation3], 4294967168  ;;  %s250_s23 = smov [#allocation5]   ;;  %p311_p2 = scmp.eq.s32.totalorder %s144_s7, 1  ;;  %v96_v0 = vld [vmem:[#allocation2] sm:$0xff] }
  0x2b   : > { %s105_s24 = sshll.u32 %s250_s23, 4  ;;  %97 = vst [vmem:[#allocation5] sm:$0xff] %v96_v0  ;;  %s106_s24 = int_to_ptr.vmem [resolvable:$true] %s105_s24 }
  0x2c   : > { %s207_s26 = scalar_lea.vmem %s106_s24, 128  ;;  %p214_p9 = scmp.lt.s32.totalorder %s106_s24, %s106_s24 }
  0x2d   : > { %p208_p3 = scmp.ne.s32.totalorder %s106_s24, %s207_s26  ;;  %p215_p10 = scmp.lt.s32.totalorder %s207_s26, %s207_s26 }
  0x2f   : > { %p209_p5 = pnand %p208_p3, %p311_p2  ;;  %p216_p11 = por %p215_p10, %p214_p9 }
  0x31   : > { %p210_p7 = pneg %p209_p5 }
  0x33   : > { %p217_p12 = pnand %p216_p11, %p210_p7 }
  0x35   : > { %220 = shalt.err (!%p217_p12)
}
  0x36   : > { %s221_s29 = scalar_lea.hbm %s341_s1, 128 }
  0x37   : > { %p222_p13 = scmp.ne.s32.totalorder %s341_s1, %s221_s29  ;;  %p227_p4 = scmp.lt.u32.totalorder %s221_s29, %s341_s1 }
  0x39   : > { %p223_p0 = pnand %p222_p13, %p311_p2 }
  0x3b   : > { %p224_p1 = pneg %p223_p0 }
  0x3d   : > { %p229_p6 = pnand %p227_p4, %p224_p1 }
  0x3f   : > { %232 = shalt.err (!%p229_p6)
}
  0x40   : > { %158 = dma.vmem_to_hbm [thread:$0]  (%p311_p2), %s106_s24, 128, %s341_s1, [#allocation4]  }
  0x41   : > { %242 = dma.done.wait (%p311_p2), [#allocation4], 128  }
  0x42   : > { %244 = vsyncadd (%p311_p2), [#allocation4], 4294967168 }
  0x43 PF: > { %s13_s6 = sadd.s32 1, %s247_s6  }
  0x44   : > { %p10_p8 = scmp.ge.s32.totalorder %s13_s6, 4  }
  0x46   :  { %12 = sbr.rel (!%p10_p8) target bundleno = 2 (0x2), region = 53 }
  0x4d   :  { %118 = vsyncpa [#allocation3], 1 }
  0x4e   :  { %120 = vsyncpa [#allocation3 + $0x1], 1 }
  0x4f   :  { %121 = vsyncpa [#allocation4], 1 }
  0x50   :  { %123 = vsyncpa [#allocation4 + $0x1], 1 }

// kernel: _dc_preemph_impl.1
= control target key start
LH: loop header
LB: loop body
LE: loop exit
PB: predicated region body
PF: predicated region fallthrough
CT: control target
= control target key end

     0   :  { %8 = vsyncpa [#allocation3], 0  ;;  %s13685_s12 = smov 0   ;;  %s13687_s13 = smov 0   ;;  %s14072_s0 = inlined_call_operand.hbm [shape: bf16[5,1024,512], index: 0, kind: input, shape index: {}]   ;;  %s14073_s1 = inlined_call_operand.vmem [shape: bf16[4,32,1024], index: 1, kind: input, shape index: {}, may-alias: {1,2}]   ;;  %s14074_s2 = inlined_call_operand.vmem [shape: bf16[4,32,1024], index: 2, kind: input, shape index: {}, may-alias: {1,2}]   ;;  %s14075_s3 = inlined_call_operand.vmem [shape: f32[4,16,512], index: 3, kind: output, shape index: {}]  }
   0x1   :  { %s13689_s14 = smov 0  }
   0x2 LB: > { %s10181_s15 = sadd.s32 4294967295, %s13660_s14   ;;  %s23_s16 = sadd.s32 1, %s13656_s13  ;;  %s13660_s14 = sphi %s13689_s14, %s14_s14   ;;  %s13656_s13 = sphi %s13687_s13, %s14085_s13   ;;  %s13652_s12 = sphi %s13685_s12, %s14084_s12  }
   0x3   : > { %p24_p0 = scmp.ge.s32.totalorder %s23_s16, 4  ;;  %p10183_p1 = scmp.ge.s32.totalorder %s13660_s14, 1 }
   0x4   : > { %p138_p2 = scmp.lt.s32.totalorder %s13660_s14, 5  ;;  %p13710_p4 = scmp.eq.s32.totalorder %s10181_s15, 0 }
   0x5   : > { %s14087_s16 = smov (%p24_p0, %s23_s16), 0  ;;  %s13662_s19 = smov [#allocation2]  }
   0x6   : > { %p13706_p3 = pnand %p10183_p1, %p138_p2  ;;  %s150_s20 = sshll.u32 %s13662_s19, 4  ;;  %s151_s20 = int_to_ptr.vmem [resolvable:$true] %s150_s20 }
   0x7   : > { %s14080_s18 = scalar_select %p13710_p4, 1, 0 }
   0x8   : > { %s14079_s17 = scalar_select %p13706_p3, 1, 0 }
   0x9   : > { %p11653_p5 = pneg %p13706_p3  ;;  %s13606_s24 = scalar_lea.hbm %s14072_s0, 163840 }
   0xa   : > { %p13607_p7 = scmp.ne.s32.totalorder %s14072_s0, %s13606_s24  ;;  %p13613_p11 = scmp.lt.u32.totalorder %s13606_s24, %s14072_s0 }
   0xb   : > { %p13718_p6 = pnand %p13710_p4, %p11653_p5 }
   0xd   : > { %p13608_p8 = pneg %p13718_p6 }
   0xf   : > { %p13609_p9 = pnand %p13608_p8, %p13607_p7 }
  0x11   : > { %p13610_p10 = pneg %p13609_p9 }
  0x13   : > { %p13615_p12 = pnand %p13613_p11, %p13610_p10 }
  0x15   : > { %13618 = shalt.err (!%p13615_p12)
}
  0x16   : > { %s13619_s29 = scalar_lea.vmem %s151_s20, 163840  ;;  %p13627_p2 = scmp.lt.s32.totalorder %s151_s20, %s151_s20 }
  0x17   : > { %p13620_p13 = scmp.ne.s32.totalorder %s151_s20, %s13619_s29  ;;  %p13628_p5 = scmp.lt.s32.totalorder %s13619_s29, %s13619_s29 }
  0x19   : > { %p13622_p0 = pnand %p13620_p13, %p13608_p8  ;;  %p13629_p4 = por %p13628_p5, %p13627_p2 }
  0x1b   : > { %p13623_p1 = pneg %p13622_p0 }
  0x1d   : > { %p13630_p3 = pnand %p13629_p4, %p13623_p1 }
  0x1f   : > { %13633 = shalt.err (!%p13630_p3)
}
  0x20   : > { %s13663_s30 = smov 256   ;;  %s13664_s4 = smov 16  }
  0x21   : > { %11656 = dma.hbm_to_vmem [thread:$0]  (!%p13718_p6), %s14072_s0, 163840, %s151_s20, [#allocation3], %s13663_s30, %s13663_s30, %s13664_s4  }
  0x22   : > { %p14082_p7 = scmp.ne.s32.totalorder %s14079_s17, 0 }
  0x23   : > { %p14083_p9 = scmp.ne.s32.totalorder (!%p14082_p7), %s14080_s18, 0 }
  0x24   : > { %196 = sbr.rel (%p14082_p7) target bundleno = 1541 (0x605), region = 32 }
  0x2b   : > { %13647 = dma.done.wait (%p14083_p9), [#allocation3], 163840  }
  0x2c   : > { %13649 = vsyncadd (%p14083_p9), [#allocation3], 4294803456  ;;  %v11686_v0 = vld [vmem:[#allocation2 + $0x804] ss:$16 sps:$4 sm:$0xff]   ;;  %v11688_v1 = vld [vmem:[#allocation2 + $0x80c] ss:$16 sps:$4 sm:$0xff]  }
  0x2d   : > { %2262 = vmatprep.subr.bf16.mxu0 %v11686_v0  ;;  %v11690_v2 = vld [vmem:[#allocation2 + $0x800] ss:$16 sps:$4 sm:$0xff]   ;;  %v11691_v3 = vld [vmem:[#allocation2 + $0x808] ss:$16 sps:$4 sm:$0xff]   ;;  %2434 = vmatprep.subr.bf16.mxu1 %v11688_v1  ;;  %v11692_v4 = vld [vmem:[#allocation2 + $0x824] ss:$16 sps:$4 sm:$0xff]  }
  0x2e   : > { %2263 = vmatpush1.bf16.msra.mxu0 %v11690_v2  ;;  %2435 = vmatpush1.bf16.msra.mxu1 %v11691_v3  ;;  %v11694_v5 = vld [vmem:[#allocation2 + $0x82c] ss:$16 sps:$4 sm:$0xff]   ;;  %v11696_v6 = vld [vmem:[#allocation2 + $0x820] ss:$16 sps:$4 sm:$0xff]   ;;  %v11697_v7 = vld [vmem:[#allocation2 + $0x828] ss:$16 sps:$4 sm:$0xff]  }
  0x2f   : > { %2264 = vmatprep.subr.bf16.mxu0 %v11692_v4  ;;  %2436 = vmatprep.subr.bf16.mxu1 %v11694_v5  ;;  %v11698_v8 = vld [vmem:[#allocation2 + $0x844] ss:$16 sps:$4 sm:$0xff]   ;;  %v11700_v9 = vld [vmem:[#allocation2 + $0x84c] ss:$16 sps:$4 sm:$0xff]   ;;  %v11702_v10 = vld [vmem:[#allocation2 + $0x840] ss:$16 sps:$4 sm:$0xff]  }
  0x30   : > { %v11703_v11 = vld [vmem:[#allocation2 + $0x848] ss:$16 sps:$4 sm:$0xff]   ;;  %v11704_v12 = vld [vmem:[#allocation2 + $0x864] ss:$16 sps:$4 sm:$0xff]   ;;  %v11706_v13 = vld [vmem:[#allocation2 + $0x86c] ss:$16 sps:$4 sm:$0xff]  }
  0x31   : > { %v11708_v14 = vld [vmem:[#allocation2 + $0x860] ss:$16 sps:$4 sm:$0xff]   ;;  %v11709_v15 = vld [vmem:[#allocation2 + $0x868] ss:$16 sps:$4 sm:$0xff]   ;;  %v11710_v16 = vld [vmem:[#allocation2 + $0x884] ss:$16 sps:$4 sm:$0xff]  }
  0x32   : > { %2265 = vmatpush1.bf16.msra.mxu0 %v11696_v6  ;;  %2437 = vmatpush1.bf16.msra.mxu1 %v11697_v7  ;;  %v11712_v17 = vld [vmem:[#allocation2 + $0x88c] ss:$16 sps:$4 sm:$0xff]   ;;  %v11714_v18 = vld [vmem:[#allocation2 + $0x880] ss:$16 sps:$4 sm:$0xff]   ;;  %v11715_v19 = vld [vmem:[#allocation2 + $0x888] ss:$16 sps:$4 sm:$0xff]  }
  0x33   : > { %2266 = vmatprep.subr.bf16.mxu0 %v11698_v8  ;;  %2438 = vmatprep.subr.bf16.mxu1 %v11700_v9  ;;  %v11716_v20 = vld [vmem:[#allocation2 + $0x8a4] ss:$16 sps:$4 sm:$0xff]   ;;  %v11718_v21 = vld [vmem:[#allocation2 + $0x8ac] ss:$16 sps:$4 sm:$0xff]   ;;  %v11720_v22 = vld [vmem:[#allocation2 + $0x8a0] ss:$16 sps:$4 sm:$0xff]  }
  0x34   : > { %v11721_v23 = vld [vmem:[#allocation2 + $0x8a8] ss:$16 sps:$4 sm:$0xff]   ;;  %v11722_v24 = vld [vmem:[#allocation2 + $0x8c4] ss:$16 sps:$4 sm:$0xff]   ;;  %v11724_v25 = vld [vmem:[#allocation2 + $0x8cc] ss:$16 sps:$4 sm:$0xff]  }
  0x35   : > { %v11726_v26 = vld [vmem:[#allocation2 + $0x8c0] ss:$16 sps:$4 sm:$0xff]   ;;  %v11727_v27 = vld [vmem:[#allocation2 + $0x8c8] ss:$16 sps:$4 sm:$0xff]   ;;  %v11728_v28 = vld [vmem:[#allocation2 + $0x8e4] ss:$16 sps:$4 sm:$0xff]  }
  0x36   : > { %2267 = vmatpush1.bf16.msra.mxu0 %v11702_v10  ;;  %2439 = vmatpush1.bf16.msra.mxu1 %v11703_v11  ;;  %v11730_v29 = vld [vmem:[#allocation2 + $0x8ec] ss:$16 sps:$4 sm:$0xff]   ;;  %p242_p3 = scmp.lt.s32.totalorder %s13652_s12, 3  ;;  %v11732_v30 = vld [vmem:[#allocation2 + $0x8e0] ss:$16 sps:$4 sm:$0xff]   ;;  %vm4487_vm1 = vcmask 1046528  }
  0x37   : > { %2268 = vmatprep.subr.bf16.mxu0 %v11704_v12  ;;  %2440 = vmatprep.subr.bf16.mxu1 %v11706_v13  ;;  %v11733_v31 = vld [vmem:[#allocation2 + $0x8e8] ss:$16 sps:$4 sm:$0xff]   ;;  %v11734_v32 = vld [vmem:[#allocation2 + $0x904] ss:$16 sps:$4 sm:$0xff]   ;;  %v11736_v33 = vld [vmem:[#allocation2 + $0x90c] ss:$16 sps:$4 sm:$0xff]  }
  0x38   : > { %s14089_s12 = smov (!%p242_p3, %s13652_s12), 3  ;;  %v11738_v34 = vld [vmem:[#allocation2 + $0x900] ss:$16 sps:$4 sm:$0xff]   ;;  %v11739_v35 = vld [vmem:[#allocation2 + $0x908] ss:$16 sps:$4 sm:$0xff]   ;;  %vm8379_vm3 = vcmask 1045504  }
  0x39   : > { %v11740_v36 = vld [vmem:[#allocation2 + $0x924] ss:$16 sps:$4 sm:$0xff]   ;;  %v11742_v37 = vld [vmem:[#allocation2 + $0x92c] ss:$16 sps:$4 sm:$0xff]   ;;  %s11492_s7 = sshll.u32 %s14089_s12, 7  ;;  %s11495_s19 = sshll.u32 %s14089_s12, 6 }
  0x3a   : > { %2269 = vmatpush1.bf16.msra.mxu0 %v11708_v14  ;;  %2441 = vmatpush1.bf16.msra.mxu1 %v11709_v15  ;;  %v11744_v38 = vld [vmem:[#allocation2 + $0x920] ss:$16 sps:$4 sm:$0xff]   ;;  %v11745_v39 = vld [vmem:[#allocation2 + $0x928] ss:$16 sps:$4 sm:$0xff]   ;;  %v11746_v40 = vld [vmem:[#allocation2 + $0x944] ss:$16 sps:$4 sm:$0xff]   ;;  %s13752_s11 = scalar_lea.vmem %s14073_s1, %s11492_s7  ;;  %s274_s22 = scalar_lea.vmem %s14075_s3, %s11495_s19 }
  0x3b   : > { %2270 = vmatprep.subr.bf16.mxu0 %v11710_v16  ;;  %2442 = vmatprep.subr.bf16.mxu1 %v11712_v17  ;;  %v11748_v41 = vld [vmem:[#allocation2 + $0x94c] ss:$16 sps:$4 sm:$0xff]   ;;  %s11494_s8 = sadd.s32 64, %s11492_s7  ;;  %v11750_v42 = vld [vmem:[#allocation2 + $0x940] ss:$16 sps:$4 sm:$0xff]  }
  0x3c   : > { %v11751_v43 = vld [vmem:[#allocation2 + $0x948] ss:$16 sps:$4 sm:$0xff]   ;;  %v11752_v44 = vld [vmem:[#allocation2 + $0x964] ss:$16 sps:$4 sm:$0xff]   ;;  %s13757_s18 = scalar_lea.vmem %s14074_s2, %s11494_s8  ;;  %v11754_v45 = vld [vmem:[#allocation2 + $0x96c] ss:$16 sps:$4 sm:$0xff]  }
  0x3d   : > { %v11756_v46 = vld [vmem:[#allocation2 + $0x960] ss:$16 sps:$4 sm:$0xff]   ;;  %v11757_v47 = vld [vmem:[#allocation2 + $0x968] ss:$16 sps:$4 sm:$0xff]   ;;  %v11758_v52 = vld [vmem:[#allocation2 + $0x984] ss:$16 sps:$4 sm:$0xff]  }
  0x3e   : > { %2271 = vmatpush1.bf16.msra.mxu0 %v11714_v18  ;;  %2443 = vmatpush1.bf16.msra.mxu1 %v11715_v19  ;;  %v276_v48 = vld [vmem:[%s13752_s11] sm:$0xff]  ;;  %v11760_v55 = vld [vmem:[#allocation2 + $0x98c] ss:$16 sps:$4 sm:$0xff]   ;;  %v11763_v60 = vld [vmem:[#allocation2 + $0x988] ss:$16 sps:$4 sm:$0xff]  }
  0x3f   : > { %2272 = vmatprep.subr.bf16.mxu0 %v11716_v20  ;;  %2444 = vmatprep.subr.bf16.mxu1 %v11718_v21  ;;  %v280_v49 = vld [vmem:[%s13752_s11 + $0x20] sm:$0xff]  ;;  %v11766_v1 = vld [vmem:[#allocation2 + $0x9ac] ss:$16 sps:$4 sm:$0xff]   ;;  %vm877_vm0 = vsmask.f32 7424 }
  0x40   : > { %v284_v50 = vld [vmem:[%s13757_s18] sm:$0xff]  ;;  %v13763_v53 = vcombine.high %v276_v48, %v280_v49  ;;  %v13774_v0 = vcombine.low %v276_v48, %v280_v49  ;;  %v11769_v4 = vld [vmem:[#allocation2 + $0x9a8] ss:$16 sps:$4 sm:$0xff]   ;;  %v11772_v9 = vld [vmem:[#allocation2 + $0x9cc] ss:$16 sps:$4 sm:$0xff]  }
  0x41   : > { %v288_v51 = vld [vmem:[%s13757_s18 + $0x20] sm:$0xff]  ;;  %v11775_v11 = vld [vmem:[#allocation2 + $0x9c8] ss:$16 sps:$4 sm:$0xff]   ;;  %v11778_v16 = vld [vmem:[#allocation2 + $0x9ec] ss:$16 sps:$4 sm:$0xff]  }
  0x42   : > { %2273 = vmatpush1.bf16.msra.mxu0 %v11720_v22  ;;  %2445 = vmatpush1.bf16.msra.mxu1 %v11721_v23  ;;  %v13765_v54 = vcombine.high %v284_v50, %v288_v51  ;;  %v891_v56 = vshrl.u32 %v13763_v53, 16  ;;  %v893_v57 = vshll.u32 %v13763_v53, 16  ;;  %v11762_v59 = vld [vmem:[#allocation2 + $0x980] ss:$16 sps:$4 sm:$0xff]   ;;  %v11764_v61 = vld [vmem:[#allocation2 + $0x9a4] ss:$16 sps:$4 sm:$0xff]   ;;  %v13779_v7 = vcombine.low %v284_v50, %v288_v51 }
  0x43   : > { %2274 = vmatprep.subr.bf16.mxu0 %v11722_v24  ;;  %2446 = vmatprep.subr.bf16.mxu1 %v11724_v25  ;;  %v11768_v3 = vld [vmem:[#allocation2 + $0x9a0] ss:$16 sps:$4 sm:$0xff]   ;;  %v11770_v5 = vld [vmem:[#allocation2 + $0x9c4] ss:$16 sps:$4 sm:$0xff]   ;;  %v881_v8 = vshll.u32 %v13774_v0, 16  ;;  %v879_v13 = vshrl.u32 %v13774_v0, 16 }
  0x44   : > { %v898_v58 = vshll.u32 %v13765_v54, 16  ;;  %v895_v62 = vrot.slane %v893_v57, 1  ;;  %v11774_v10 = vld [vmem:[#allocation2 + $0x9c0] ss:$16 sps:$4 sm:$0xff]   ;;  %v11776_v12 = vld [vmem:[#allocation2 + $0x9e4] ss:$16 sps:$4 sm:$0xff]  }
  0x45   : > { %v883_v14 = vrot.slane %v881_v8, 1  ;;  %v886_v15 = vshll.u32 %v13779_v7, 16  ;;  %v11780_v17 = vld [vmem:[#allocation2 + $0x9e0] ss:$16 sps:$4 sm:$0xff]   ;;  %v11781_v18 = vld [vmem:[#allocation2 + $0x9e8] ss:$16 sps:$4 sm:$0xff]  }
  0x46   : > { %2275 = vmatpush1.bf16.msra.mxu0 %v11726_v26  ;;  %2447 = vmatpush1.bf16.msra.mxu1 %v11727_v27  ;;  %v900_v63 = vrot.slane %v898_v58, 1  ;;  %v896_v2 = vor.u32 %v895_v62, %v891_v56  ;;  %v11784_v19 = vld [vmem:[#allocation2 + $0xa04] ss:$16 sps:$4 sm:$0xff]   ;;  %v11787_v22 = vld [vmem:[#allocation2 + $0xa0c] ss:$16 sps:$4 sm:$0xff]  }
  0x47   : > { %2276 = vmatprep.subr.bf16.mxu0 %v11728_v28  ;;  %2448 = vmatprep.subr.bf16.mxu1 %v11730_v29  ;;  %v884_v20 = vor.u32 %v883_v14, %v879_v13  ;;  %v888_v21 = vrot.slane %v886_v15, 1  ;;  %v11782_v23 = vld [vmem:[#allocation2 + $0xa00] ss:$16 sps:$4 sm:$0xff]   ;;  %v11785_v24 = vld [vmem:[#allocation2 + $0xa08] ss:$16 sps:$4 sm:$0xff]  }
  0x48   : > { %v901_v6 = vsel %vm877_vm0, %v896_v2, %v900_v63  ;;  %v11790_v26 = vld [vmem:[#allocation2 + $0xa24] ss:$16 sps:$4 sm:$0xff]   ;;  %v11793_v27 = vld [vmem:[#allocation2 + $0xa2c] ss:$16 sps:$4 sm:$0xff]   ;;  %v11788_v28 = vld [vmem:[#allocation2 + $0xa20] ss:$16 sps:$4 sm:$0xff]  }
  0x49   : > { %2294 = vmatprep.mubr.bf16.mxu0 %v901_v6  ;;  %2466 = vmatprep.mubr.bf16.mxu1 %v901_v6  ;;  %v889_v25 = vsel %vm877_vm0, %v884_v20, %v888_v21  ;;  %v11791_v29 = vld [vmem:[#allocation2 + $0xa28] ss:$16 sps:$4 sm:$0xff]   ;;  %v11818_v48 = vld [vmem:[#allocation2 + $0xac0] ss:$16 sps:$4 sm:$0xff]   ;;  %v11826_v50 = vld [vmem:[#allocation2 + $0xae4] ss:$16 sps:$4 sm:$0xff]  }
  0x4a   : > { %2277 = vmatpush1.bf16.msra.mxu0 %v11732_v30  ;;  %2449 = vmatpush1.bf16.msra.mxu1 %v11733_v31  ;;  %v11796_v30 = vld [vmem:[#allocation2 + $0xa44] ss:$16 sps:$4 sm:$0xff]   ;;  %v11799_v31 = vld [vmem:[#allocation2 + $0xa4c] ss:$16 sps:$4 sm:$0xff]   ;;  %v11821_v49 = vld [vmem:[#allocation2 + $0xac8] ss:$16 sps:$4 sm:$0xff]  }
  0x4b   : > { %2278 = vmatprep.subr.bf16.mxu0 %v11734_v32  ;;  %2450 = vmatprep.subr.bf16.mxu1 %v11736_v33  ;;  %v11794_v32 = vld [vmem:[#allocation2 + $0xa40] ss:$16 sps:$4 sm:$0xff]   ;;  %v11797_v33 = vld [vmem:[#allocation2 + $0xa48] ss:$16 sps:$4 sm:$0xff]   ;;  %v11835_v6 = vld [vmem:[#allocation2 + $0xb0c] ss:$16 sps:$4 sm:$0xff]  }
  0x4c   : > { %v13792_v51 = vld [vmem:[%s13752_s11 + $0x8] sm:$0xff]  ;;  %v11824_v63 = vld [vmem:[#allocation2 + $0xae0] ss:$16 sps:$4 sm:$0xff]   ;;  %v11844_v21 = vld [vmem:[#allocation2 + $0xb44] ss:$16 sps:$4 sm:$0xff]  }
  0x4d   : > { %v11833_v14 = vld [vmem:[#allocation2 + $0xb08] ss:$16 sps:$4 sm:$0xff]   ;;  %vm6409_vm2 = vsmask.f32 6400 }
  0x4e   : > { %2279 = vmatpush1.bf16.msra.mxu0 %v11738_v34  ;;  %2451 = vmatpush1.bf16.msra.mxu1 %v11739_v35  ;;  %v11802_v34 = vld [vmem:[#allocation2 + $0xa64] ss:$16 sps:$4 sm:$0xff]   ;;  %v11805_v35 = vld [vmem:[#allocation2 + $0xa6c] ss:$16 sps:$4 sm:$0xff]   ;;  %v11839_v20 = vld [vmem:[#allocation2 + $0xb28] ss:$16 sps:$4 sm:$0xff]  }
  0x4f   : > { %2280 = vmatprep.subr.bf16.mxu0 %v11740_v36  ;;  %2452 = vmatprep.subr.bf16.mxu1 %v11742_v37  ;;  %v11800_v36 = vld [vmem:[#allocation2 + $0xa60] ss:$16 sps:$4 sm:$0xff]   ;;  %v11803_v37 = vld [vmem:[#allocation2 + $0xa68] ss:$16 sps:$4 sm:$0xff]  }
  0x52   : > { %2281 = vmatpush1.bf16.msra.mxu0 %v11744_v38  ;;  %2453 = vmatpush1.bf16.msra.mxu1 %v11745_v39  ;;  %v11808_v38 = vld [vmem:[#allocation2 + $0xa84] ss:$16 sps:$4 sm:$0xff]   ;;  %v11811_v39 = vld [vmem:[#allocation2 + $0xa8c] ss:$16 sps:$4 sm:$0xff]  }
  0x53   : > { %2282 = vmatprep.subr.bf16.mxu0 %v11746_v40  ;;  %2454 = vmatprep.subr.bf16.mxu1 %v11748_v41  ;;  %v11806_v40 = vld [vmem:[#allocation2 + $0xa80] ss:$16 sps:$4 sm:$0xff]   ;;  %v11809_v41 = vld [vmem:[#allocation2 + $0xa88] ss:$16 sps:$4 sm:$0xff]  }
  0x56   : > { %2283 = vmatpush1.bf16.msra.mxu0 %v11750_v42  ;;  %2455 = vmatpush1.bf16.msra.mxu1 %v11751_v43  ;;  %v11814_v42 = vld [vmem:[#allocation2 + $0xaa4] ss:$16 sps:$4 sm:$0xff]   ;;  %v11817_v43 = vld [vmem:[#allocation2 + $0xaac] ss:$16 sps:$4 sm:$0xff]  }
  0x57   : > { %2284 = vmatprep.subr.bf16.mxu0 %v11752_v44  ;;  %2456 = vmatprep.subr.bf16.mxu1 %v11754_v45  ;;  %v11812_v44 = vld [vmem:[#allocation2 + $0xaa0] ss:$16 sps:$4 sm:$0xff]   ;;  %v11815_v45 = vld [vmem:[#allocation2 + $0xaa8] ss:$16 sps:$4 sm:$0xff]  }
  0x5a   : > { %2285 = vmatpush1.bf16.msra.mxu0 %v11756_v46  ;;  %2457 = vmatpush1.bf16.msra.mxu1 %v11757_v47  ;;  %v11820_v46 = vld [vmem:[#allocation2 + $0xac4] ss:$16 sps:$4 sm:$0xff]   ;;  %v11823_v47 = vld [vmem:[#allocation2 + $0xacc] ss:$16 sps:$4 sm:$0xff]  }
  0x5b   : > { %2286 = vmatprep.subr.bf16.mxu0 %v11758_v52  ;;  %2458 = vmatprep.subr.bf16.mxu1 %v11760_v55  ;;  %v281_v52 = vld [vmem:[%s13752_s11 + $0x28] sm:$0xff] }
  0x5c   : > { %v13796_v55 = vld [vmem:[%s13757_s18 + $0x8] sm:$0xff] }
  0x5e   : > { %2287 = vmatpush1.bf16.msra.mxu0 %v11762_v59  ;;  %2459 = vmatpush1.bf16.msra.mxu1 %v11763_v60  ;;  %v13799_v59 = vld [vmem:[%s13757_s18 + $0x28] sm:$0xff] }
  0x5f   : > { %2288 = vmatprep.subr.bf16.mxu0 %v11764_v61  ;;  %2460 = vmatprep.subr.bf16.mxu1 %v11766_v1  ;;  %v11829_v60 = vld [vmem:[#allocation2 + $0xaec] ss:$16 sps:$4 sm:$0xff]   ;;  %v13802_v61 = vcombine.high %v13792_v51, %v281_v52  ;;  %v13806_v62 = vcombine.high %v13796_v55, %v13799_v59 }
  0x61   : > { %v915_v1 = vshrl.u32 %v13802_v61, 16  ;;  %v917_v2 = vshll.u32 %v13802_v61, 16 }
  0x62   : > { %2289 = vmatpush1.bf16.msra.mxu0 %v11768_v3  ;;  %2461 = vmatpush1.bf16.msra.mxu1 %v11769_v4  ;;  %v922_v3 = vshll.u32 %v13806_v62, 16  ;;  %v11827_v4 = vld [vmem:[#allocation2 + $0xae8] ss:$16 sps:$4 sm:$0xff]  }
  0x63   : > { %2290 = vmatprep.subr.bf16.mxu0 %v11770_v5  ;;  %2462 = vmatprep.subr.bf16.mxu1 %v11772_v9  ;;  %v11832_v5 = vld [vmem:[#allocation2 + $0xb04] ss:$16 sps:$4 sm:$0xff]   ;;  %v919_v9 = vrot.slane %v917_v2, 1 }
  0x66   : > { %2291 = vmatpush1.bf16.msra.mxu0 %v11774_v10  ;;  %2463 = vmatpush1.bf16.msra.mxu1 %v11775_v11  ;;  %v924_v10 = vrot.slane %v922_v3, 1  ;;  %v920_v11 = vor.u32 %v919_v9, %v915_v1  ;;  %v11884_v9 = vld [vmem:[#allocation2 + $0xc20] ss:$16 sps:$4 sm:$0xff]  }
  0x67   : > { %2292 = vmatprep.subr.bf16.mxu0 %v11776_v12  ;;  %2464 = vmatprep.subr.bf16.mxu1 %v11778_v16  ;;  %v11830_v12 = vld [vmem:[#allocation2 + $0xb00] ss:$16 sps:$4 sm:$0xff]   ;;  %v11838_v16 = vld [vmem:[#allocation2 + $0xb24] ss:$16 sps:$4 sm:$0xff]  }
  0x6a   : > { %2293 = vmatpush1.bf16.msra.mxu0 %v11780_v17  ;;  %2465 = vmatpush1.bf16.msra.mxu1 %v11781_v18  ;;  %v11841_v17 = vld [vmem:[#allocation2 + $0xb2c] ss:$16 sps:$4 sm:$0xff]   ;;  %v925_v18 = vsel %vm877_vm0, %v920_v11, %v924_v10  ;;  %v11887_v10 = vld [vmem:[#allocation2 + $0xc28] ss:$16 sps:$4 sm:$0xff]   ;;  %v11892_v11 = vld [vmem:[#allocation2 + $0xc44] ss:$16 sps:$4 sm:$0xff]  }
  0x6b   : > { %2305 = vmatprep.subr.bf16.mxu0 %v11784_v19  ;;  %2477 = vmatprep.subr.bf16.mxu1 %v11787_v22  ;;  %v11836_v19 = vld [vmem:[#allocation2 + $0xb20] ss:$16 sps:$4 sm:$0xff]   ;;  %v11847_v22 = vld [vmem:[#allocation2 + $0xb4c] ss:$16 sps:$4 sm:$0xff]  }
  0x6d   : > { %2295 = vmatmul.mubr.bf16.vlgmr.msra.gmra.mrb[0].mxu0 %v889_v25  ;;  %2467 = vmatmul.mubr.bf16.vlgmr.msra.gmra.mrb[0].mxu1 %v889_v25  ;;  %v11850_v25 = vld [vmem:[#allocation2 + $0xb64] ss:$16 sps:$4 sm:$0xff]  }
  0x6e   : > { %2306 = vmatpush1.bf16.msra.mxu0 %v11782_v23  ;;  %2478 = vmatpush1.bf16.msra.mxu1 %v11785_v24  ;;  %v11842_v23 = vld [vmem:[#allocation2 + $0xb40] ss:$16 sps:$4 sm:$0xff]   ;;  %v11845_v24 = vld [vmem:[#allocation2 + $0xb48] ss:$16 sps:$4 sm:$0xff]  }
  0x6f   : > { %2307 = vmatprep.subr.bf16.mxu0 %v11790_v26  ;;  %2479 = vmatprep.subr.bf16.mxu1 %v11793_v27  ;;  %v11853_v26 = vld [vmem:[#allocation2 + $0xb6c] ss:$16 sps:$4 sm:$0xff]   ;;  %v11848_v27 = vld [vmem:[#allocation2 + $0xb60] ss:$16 sps:$4 sm:$0xff]  }
  0x70   : > { %2337 = vmatprep.mubr.bf16.mxu0 %v925_v18  ;;  %2509 = vmatprep.mubr.bf16.mxu1 %v925_v18  ;;  %v13845_v18 = vld [vmem:[%s13757_s18 + $0x30] sm:$0xff] }
  0x72   : > { %2308 = vmatpush1.bf16.msra.mxu0 %v11788_v28  ;;  %2480 = vmatpush1.bf16.msra.mxu1 %v11791_v29  ;;  %v11851_v28 = vld [vmem:[#allocation2 + $0xb68] ss:$16 sps:$4 sm:$0xff]   ;;  %v11856_v29 = vld [vmem:[#allocation2 + $0xb84] ss:$16 sps:$4 sm:$0xff]  }
  0x73   : > { %2309 = vmatprep.subr.bf16.mxu0 %v11796_v30  ;;  %2481 = vmatprep.subr.bf16.mxu1 %v11799_v31  ;;  %v11859_v30 = vld [vmem:[#allocation2 + $0xb8c] ss:$16 sps:$4 sm:$0xff]   ;;  %v11854_v31 = vld [vmem:[#allocation2 + $0xb80] ss:$16 sps:$4 sm:$0xff]  }
  0x76   : > { %2310 = vmatpush1.bf16.msra.mxu0 %v11794_v32  ;;  %2482 = vmatpush1.bf16.msra.mxu1 %v11797_v33  ;;  %v11857_v32 = vld [vmem:[#allocation2 + $0xb88] ss:$16 sps:$4 sm:$0xff]   ;;  %v13819_v33 = vcombine.low %v13792_v51, %v281_v52 }
  0x77   : > { %2311 = vmatprep.subr.bf16.mxu0 %v11802_v34  ;;  %2483 = vmatprep.subr.bf16.mxu1 %v11805_v35  ;;  %v11862_v34 = vld [vmem:[#allocation2 + $0xba4] ss:$16 sps:$4 sm:$0xff]   ;;  %v11865_v35 = vld [vmem:[#allocation2 + $0xbac] ss:$16 sps:$4 sm:$0xff]  }
  0x7a   : > { %2312 = vmatpush1.bf16.msra.mxu0 %v11800_v36  ;;  %2484 = vmatpush1.bf16.msra.mxu1 %v11803_v37  ;;  %v11860_v36 = vld [vmem:[#allocation2 + $0xba0] ss:$16 sps:$4 sm:$0xff]   ;;  %v11863_v37 = vld [vmem:[#allocation2 + $0xba8] ss:$16 sps:$4 sm:$0xff]  }
  0x7b   : > { %2313 = vmatprep.subr.bf16.mxu0 %v11808_v38  ;;  %2485 = vmatprep.subr.bf16.mxu1 %v11811_v39  ;;  %v13823_v38 = vcombine.low %v13796_v55, %v13799_v59  ;;  %v905_v39 = vshll.u32 %v13819_v33, 16  ;;  %v11880_v55 = vld [vmem:[#allocation2 + $0xc04] ss:$16 sps:$4 sm:$0xff]   ;;  %v11883_v59 = vld [vmem:[#allocation2 + $0xc0c] ss:$16 sps:$4 sm:$0xff]  }
  0x7e   : > { %2314 = vmatpush1.bf16.msra.mxu0 %v11806_v40  ;;  %2486 = vmatpush1.bf16.msra.mxu1 %v11809_v41  ;;  %v11868_v40 = vld [vmem:[#allocation2 + $0xbc4] ss:$16 sps:$4 sm:$0xff]   ;;  %v11871_v41 = vld [vmem:[#allocation2 + $0xbcc] ss:$16 sps:$4 sm:$0xff]  }
  0x7f   : > { %2315 = vmatprep.subr.bf16.mxu0 %v11814_v42  ;;  %2487 = vmatprep.subr.bf16.mxu1 %v11817_v43  ;;  %v11866_v42 = vld [vmem:[#allocation2 + $0xbc0] ss:$16 sps:$4 sm:$0xff]   ;;  %v11869_v43 = vld [vmem:[#allocation2 + $0xbc8] ss:$16 sps:$4 sm:$0xff]  }
  0x82   : > { %2316 = vmatpush1.bf16.msra.mxu0 %v11812_v44  ;;  %2488 = vmatpush1.bf16.msra.mxu1 %v11815_v45  ;;  %v903_v44 = vshrl.u32 %v13819_v33, 16  ;;  %v907_v45 = vrot.slane %v905_v39, 1 }
  0x83   : > { %2317 = vmatprep.subr.bf16.mxu0 %v11820_v46  ;;  %2489 = vmatprep.subr.bf16.mxu1 %v11823_v47  ;;  %v910_v46 = vshll.u32 %v13823_v38, 16  ;;  %v11874_v47 = vld [vmem:[#allocation2 + $0xbe4] ss:$16 sps:$4 sm:$0xff]  }
  0x84   : > { %v908_v51 = vor.u32 %v907_v45, %v903_v44  ;;  %v11911_v45 = vld [vmem:[#allocation2 + $0xca8] ss:$16 sps:$4 sm:$0xff]  }
  0x85   : > { %v912_v52 = vrot.slane %v910_v46, 1 }
  0x86   : > { %2318 = vmatpush1.bf16.msra.mxu0 %v11818_v48  ;;  %2490 = vmatpush1.bf16.msra.mxu1 %v11821_v49  ;;  %v11877_v48 = vld [vmem:[#allocation2 + $0xbec] ss:$16 sps:$4 sm:$0xff]   ;;  %v11872_v49 = vld [vmem:[#allocation2 + $0xbe0] ss:$16 sps:$4 sm:$0xff]  }
  0x87   : > { %2319 = vmatprep.subr.bf16.mxu0 %v11826_v50  ;;  %2491 = vmatprep.subr.bf16.mxu1 %v11829_v60  ;;  %v11875_v50 = vld [vmem:[#allocation2 + $0xbe8] ss:$16 sps:$4 sm:$0xff]   ;;  %v11878_v60 = vld [vmem:[#allocation2 + $0xc00] ss:$16 sps:$4 sm:$0xff]  }
  0x8a   : > { %2320 = vmatpush1.bf16.msra.mxu0 %v11824_v63  ;;  %2492 = vmatpush1.bf16.msra.mxu1 %v11827_v4  ;;  %v11881_v63 = vld [vmem:[#allocation2 + $0xc08] ss:$16 sps:$4 sm:$0xff]   ;;  %v913_v4 = vsel %vm877_vm0, %v908_v51, %v912_v52  ;;  %v11922_v51 = vld [vmem:[#allocation2 + $0xce4] ss:$16 sps:$4 sm:$0xff]   ;;  %v11925_v52 = vld [vmem:[#allocation2 + $0xcec] ss:$16 sps:$4 sm:$0xff]  }
  0x8b   : > { %2321 = vmatprep.subr.bf16.mxu0 %v11832_v5  ;;  %2493 = vmatprep.subr.bf16.mxu1 %v11835_v6  ;;  %v11886_v5 = vld [vmem:[#allocation2 + $0xc24] ss:$16 sps:$4 sm:$0xff]   ;;  %v11889_v6 = vld [vmem:[#allocation2 + $0xc2c] ss:$16 sps:$4 sm:$0xff]  }
  0x8e   : > { %2322 = vmatpush1.bf16.msra.mxu0 %v11830_v12  ;;  %2494 = vmatpush1.bf16.msra.mxu1 %v11833_v14  ;;  %v11895_v12 = vld [vmem:[#allocation2 + $0xc4c] ss:$16 sps:$4 sm:$0xff]   ;;  %v13836_v14 = vld [vmem:[%s13752_s11 + $0x10] sm:$0xff] }
  0x8f   : > { %2323 = vmatprep.subr.bf16.mxu0 %v11838_v16  ;;  %2495 = vmatprep.subr.bf16.mxu1 %v11841_v17  ;;  %v13839_v16 = vld [vmem:[%s13752_s11 + $0x30] sm:$0xff] }
  0x90   : > { %v13842_v17 = vld [vmem:[%s13757_s18 + $0x10] sm:$0xff] }
  0x92   : > { %2324 = vmatpush1.bf16.msra.mxu0 %v11836_v19  ;;  %2496 = vmatpush1.bf16.msra.mxu1 %v11839_v20  ;;  %v11890_v19 = vld [vmem:[#allocation2 + $0xc40] ss:$16 sps:$4 sm:$0xff]   ;;  %v13849_v20 = vcombine.high %v13836_v14, %v13839_v16 }
  0x93   : > { %2325 = vmatprep.subr.bf16.mxu0 %v11844_v21  ;;  %2497 = vmatprep.subr.bf16.mxu1 %v11847_v22  ;;  %v13853_v21 = vcombine.high %v13842_v17, %v13845_v18  ;;  %v11893_v22 = vld [vmem:[#allocation2 + $0xc48] ss:$16 sps:$4 sm:$0xff]  }
  0x96   : > { %2326 = vmatpush1.bf16.msra.mxu0 %v11842_v23  ;;  %2498 = vmatpush1.bf16.msra.mxu1 %v11845_v24  ;;  %v11898_v23 = vld [vmem:[#allocation2 + $0xc64] ss:$16 sps:$4 sm:$0xff]   ;;  %v939_v24 = vshrl.u32 %v13849_v20, 16 }
  0x97   : > { %2327 = vmatprep.subr.bf16.mxu0 %v11850_v25  ;;  %2499 = vmatprep.subr.bf16.mxu1 %v11853_v26  ;;  %v941_v25 = vshll.u32 %v13849_v20, 16  ;;  %v946_v26 = vshll.u32 %v13853_v21, 16 }
  0x9a   : > { %2328 = vmatpush1.bf16.msra.mxu0 %v11848_v27  ;;  %2500 = vmatpush1.bf16.msra.mxu1 %v11851_v28  ;;  %v11901_v27 = vld [vmem:[#allocation2 + $0xc6c] ss:$16 sps:$4 sm:$0xff]   ;;  %v943_v28 = vrot.slane %v941_v25, 1 }
  0x9b   : > { %2329 = vmatprep.subr.bf16.mxu0 %v11856_v29  ;;  %2501 = vmatprep.subr.bf16.mxu1 %v11859_v30  ;;  %v948_v29 = vrot.slane %v946_v26, 1  ;;  %v11896_v30 = vld [vmem:[#allocation2 + $0xc60] ss:$16 sps:$4 sm:$0xff]  }
  0x9e   : > { %2330 = vmatpush1.bf16.msra.mxu0 %v11854_v31  ;;  %2502 = vmatpush1.bf16.msra.mxu1 %v11857_v32  ;;  %v11899_v31 = vld [vmem:[#allocation2 + $0xc68] ss:$16 sps:$4 sm:$0xff]   ;;  %v944_v32 = vor.u32 %v943_v28, %v939_v24  ;;  %v11949_v28 = vld [vmem:[#allocation2 + $0xd6c] ss:$16 sps:$4 sm:$0xff]  }
  0x9f   : > { %2331 = vmatprep.subr.bf16.mxu0 %v11862_v34  ;;  %2503 = vmatprep.subr.bf16.mxu1 %v11865_v35  ;;  %v11904_v34 = vld [vmem:[#allocation2 + $0xc84] ss:$16 sps:$4 sm:$0xff]   ;;  %v11907_v35 = vld [vmem:[#allocation2 + $0xc8c] ss:$16 sps:$4 sm:$0xff]  }
  0xa2   : > { %2332 = vmatpush1.bf16.msra.mxu0 %v11860_v36  ;;  %2504 = vmatpush1.bf16.msra.mxu1 %v11863_v37  ;;  %v949_v36 = vsel %vm877_vm0, %v944_v32, %v948_v29  ;;  %v11902_v37 = vld [vmem:[#allocation2 + $0xc80] ss:$16 sps:$4 sm:$0xff]   ;;  %v11955_v32 = vld [vmem:[#allocation2 + $0xd8c] ss:$16 sps:$4 sm:$0xff]  }
  0xa3   : > { %2333 = vmatprep.subr.bf16.mxu0 %v11868_v40  ;;  %2505 = vmatprep.subr.bf16.mxu1 %v11871_v41  ;;  %v11905_v40 = vld [vmem:[#allocation2 + $0xc88] ss:$16 sps:$4 sm:$0xff]   ;;  %v11910_v41 = vld [vmem:[#allocation2 + $0xca4] ss:$16 sps:$4 sm:$0xff]   ;;  %v11944_v29 = vld [vmem:[#allocation2 + $0xd60] ss:$16 sps:$4 sm:$0xff]  }
  0xa6   : > { %2334 = vmatpush1.bf16.msra.mxu0 %v11866_v42  ;;  %2506 = vmatpush1.bf16.msra.mxu1 %v11869_v43  ;;  %v11913_v42 = vld [vmem:[#allocation2 + $0xcac] ss:$16 sps:$4 sm:$0xff]   ;;  %v11908_v43 = vld [vmem:[#allocation2 + $0xca0] ss:$16 sps:$4 sm:$0xff]  }
  0xa7   : > { %2335 = vmatprep.subr.bf16.mxu0 %v11874_v47  ;;  %2507 = vmatprep.subr.bf16.mxu1 %v11877_v48  ;;  %v11916_v47 = vld [vmem:[#allocation2 + $0xcc4] ss:$16 sps:$4 sm:$0xff]   ;;  %v11919_v48 = vld [vmem:[#allocation2 + $0xccc] ss:$16 sps:$4 sm:$0xff]  }
  0xaa   : > { %2336 = vmatpush1.bf16.msra.mxu0 %v11872_v49  ;;  %2508 = vmatpush1.bf16.msra.mxu1 %v11875_v50  ;;  %v11914_v49 = vld [vmem:[#allocation2 + $0xcc0] ss:$16 sps:$4 sm:$0xff]   ;;  %v11917_v50 = vld [vmem:[#allocation2 + $0xcc8] ss:$16 sps:$4 sm:$0xff]  }
  0xab   : > { %2348 = vmatprep.subr.bf16.mxu0 %v11880_v55  ;;  %2520 = vmatprep.subr.bf16.mxu1 %v11883_v59  ;;  %v11920_v55 = vld [vmem:[#allocation2 + $0xce0] ss:$16 sps:$4 sm:$0xff]   ;;  %v11923_v59 = vld [vmem:[#allocation2 + $0xce8] ss:$16 sps:$4 sm:$0xff]  }
  0xad   : > { %2338 = vmatmul.mubr.bf16.vlgmr.msra.gmra.mrb[0].mxu0 %v913_v4  ;;  %2510 = vmatmul.mubr.bf16.vlgmr.msra.gmra.mrb[0].mxu1 %v913_v4  ;;  %v11926_v4 = vld [vmem:[#allocation2 + $0xd00] ss:$16 sps:$4 sm:$0xff]  }
  0xae   : > { %2349 = vmatpush1.bf16.msra.mxu0 %v11878_v60  ;;  %2521 = vmatpush1.bf16.msra.mxu1 %v11881_v63  ;;  %v11928_v60 = vld [vmem:[#allocation2 + $0xd04] ss:$16 sps:$4 sm:$0xff]   ;;  %v11931_v63 = vld [vmem:[#allocation2 + $0xd0c] ss:$16 sps:$4 sm:$0xff]  }
  0xaf   : > { %2350 = vmatprep.subr.bf16.mxu0 %v11886_v5  ;;  %2522 = vmatprep.subr.bf16.mxu1 %v11889_v6  ;;  %v11929_v5 = vld [vmem:[#allocation2 + $0xd08] ss:$16 sps:$4 sm:$0xff]   ;;  %v11934_v6 = vld [vmem:[#allocation2 + $0xd24] ss:$16 sps:$4 sm:$0xff]  }
  0xb0   : > { %2380 = vmatprep.mubr.bf16.mxu0 %v949_v36  ;;  %2552 = vmatprep.mubr.bf16.mxu1 %v949_v36  ;;  %v13867_v36 = vcombine.low %v13836_v14, %v13839_v16  ;;  %v13884_v14 = vcombine.low %v13842_v17, %v13845_v18 }
  0xb2   : > { %2351 = vmatpush1.bf16.msra.mxu0 %v11884_v9  ;;  %2523 = vmatpush1.bf16.msra.mxu1 %v11887_v10  ;;  %v11937_v9 = vld [vmem:[#allocation2 + $0xd2c] ss:$16 sps:$4 sm:$0xff]   ;;  %v11932_v10 = vld [vmem:[#allocation2 + $0xd20] ss:$16 sps:$4 sm:$0xff]   ;;  %v929_v16 = vshll.u32 %v13867_v36, 16  ;;  %v927_v17 = vshrl.u32 %v13867_v36, 16 }
  0xb3   : > { %2352 = vmatprep.subr.bf16.mxu0 %v11892_v11  ;;  %2524 = vmatprep.subr.bf16.mxu1 %v11895_v12  ;;  %v11935_v11 = vld [vmem:[#allocation2 + $0xd28] ss:$16 sps:$4 sm:$0xff]   ;;  %v11940_v12 = vld [vmem:[#allocation2 + $0xd44] ss:$16 sps:$4 sm:$0xff]  }
  0xb4   : > { %v931_v18 = vrot.slane %v929_v16, 1 }
  0xb6   : > { %2353 = vmatpush1.bf16.msra.mxu0 %v11890_v19  ;;  %2525 = vmatpush1.bf16.msra.mxu1 %v11893_v22  ;;  %v11943_v19 = vld [vmem:[#allocation2 + $0xd4c] ss:$16 sps:$4 sm:$0xff]   ;;  %v11938_v22 = vld [vmem:[#allocation2 + $0xd40] ss:$16 sps:$4 sm:$0xff]  }
  0xb7   : > { %2354 = vmatprep.subr.bf16.mxu0 %v11898_v23  ;;  %2526 = vmatprep.subr.bf16.mxu1 %v11901_v27  ;;  %v11941_v23 = vld [vmem:[#allocation2 + $0xd48] ss:$16 sps:$4 sm:$0xff]   ;;  %v11946_v27 = vld [vmem:[#allocation2 + $0xd64] ss:$16 sps:$4 sm:$0xff]  }
  0xba   : > { %2355 = vmatpush1.bf16.msra.mxu0 %v11896_v30  ;;  %2527 = vmatpush1.bf16.msra.mxu1 %v11899_v31  ;;  %v11947_v30 = vld [vmem:[#allocation2 + $0xd68] ss:$16 sps:$4 sm:$0xff]   ;;  %v11952_v31 = vld [vmem:[#allocation2 + $0xd84] ss:$16 sps:$4 sm:$0xff]  }
  0xbb   : > { %2356 = vmatprep.subr.bf16.mxu0 %v11904_v34  ;;  %2528 = vmatprep.subr.bf16.mxu1 %v11907_v35  ;;  %v11950_v34 = vld [vmem:[#allocation2 + $0xd80] ss:$16 sps:$4 sm:$0xff]   ;;  %v11953_v35 = vld [vmem:[#allocation2 + $0xd88] ss:$16 sps:$4 sm:$0xff]  }
  0xbe   : > { %2357 = vmatpush1.bf16.msra.mxu0 %v11902_v37  ;;  %2529 = vmatpush1.bf16.msra.mxu1 %v11905_v40  ;;  %v11958_v37 = vld [vmem:[#allocation2 + $0xda4] ss:$16 sps:$4 sm:$0xff]   ;;  %v11961_v40 = vld [vmem:[#allocation2 + $0xdac] ss:$16 sps:$4 sm:$0xff]  }
  0xbf   : > { %2358 = vmatprep.subr.bf16.mxu0 %v11910_v41  ;;  %2530 = vmatprep.subr.bf16.mxu1 %v11913_v42  ;;  %v13870_v41 = vld [vmem:[%s13752_s11 + $0x18] sm:$0xff]  ;;  %v11956_v42 = vld [vmem:[#allocation2 + $0xda0] ss:$16 sps:$4 sm:$0xff]  }
  0xc2   : > { %2359 = vmatpush1.bf16.msra.mxu0 %v11908_v43  ;;  %2531 = vmatpush1.bf16.msra.mxu1 %v11911_v45  ;;  %v11959_v43 = vld [vmem:[#allocation2 + $0xda8] ss:$16 sps:$4 sm:$0xff]  }
  0xc3   : > { %2360 = vmatprep.subr.bf16.mxu0 %v11916_v47  ;;  %2532 = vmatprep.subr.bf16.mxu1 %v11919_v48  ;;  %v13873_v45 = vld [vmem:[%s13752_s11 + $0x38] sm:$0xff] }
  0xc4   : > { %v13876_v47 = vld [vmem:[%s13757_s18 + $0x18] sm:$0xff]  ;;  %v13880_v48 = vcombine.high %v13870_v41, %v13873_v45 }
  0xc6   : > { %2361 = vmatpush1.bf16.msra.mxu0 %v11914_v49  ;;  %2533 = vmatpush1.bf16.msra.mxu1 %v11917_v50  ;;  %v13888_v49 = vld [vmem:[%s13757_s18 + $0x38] sm:$0xff]  ;;  %v11964_v50 = vld [vmem:[#allocation2 + $0xdc4] ss:$16 sps:$4 sm:$0xff]  }
  0xc7   : > { %2362 = vmatprep.subr.bf16.mxu0 %v11922_v51  ;;  %2534 = vmatprep.subr.bf16.mxu1 %v11925_v52  ;;  %v11967_v51 = vld [vmem:[#allocation2 + $0xdcc] ss:$16 sps:$4 sm:$0xff]   ;;  %v11962_v52 = vld [vmem:[#allocation2 + $0xdc0] ss:$16 sps:$4 sm:$0xff]  }
  0xca   : > { %2363 = vmatpush1.bf16.msra.mxu0 %v11920_v55  ;;  %2535 = vmatpush1.bf16.msra.mxu1 %v11923_v59  ;;  %v11965_v55 = vld [vmem:[#allocation2 + $0xdc8] ss:$16 sps:$4 sm:$0xff]   ;;  %v11970_v59 = vld [vmem:[#allocation2 + $0xde4] ss:$16 sps:$4 sm:$0xff]  }
  0xcb   : > { %2364 = vmatprep.subr.bf16.mxu0 %v11928_v60  ;;  %2536 = vmatprep.subr.bf16.mxu1 %v11931_v63  ;;  %v13892_v60 = vcombine.high %v13876_v47, %v13888_v49  ;;  %v965_v63 = vshll.u32 %v13880_v48, 16 }
  0xce   : > { %2365 = vmatpush1.bf16.msra.mxu0 %v11926_v4  ;;  %2537 = vmatpush1.bf16.msra.mxu1 %v11929_v5  ;;  %v934_v4 = vshll.u32 %v13884_v14, 16  ;;  %v11973_v5 = vld [vmem:[#allocation2 + $0xdec] ss:$16 sps:$4 sm:$0xff]  }
  0xcf   : > { %2366 = vmatprep.subr.bf16.mxu0 %v11934_v6  ;;  %2538 = vmatprep.subr.bf16.mxu1 %v11937_v9  ;;  %v11968_v6 = vld [vmem:[#allocation2 + $0xde0] ss:$16 sps:$4 sm:$0xff]   ;;  %v11971_v9 = vld [vmem:[#allocation2 + $0xde8] ss:$16 sps:$4 sm:$0xff]  }
  0xd2   : > { %2367 = vmatpush1.bf16.msra.mxu0 %v11932_v10  ;;  %2539 = vmatpush1.bf16.msra.mxu1 %v11935_v11  ;;  %v963_v10 = vshrl.u32 %v13880_v48, 16  ;;  %v967_v11 = vrot.slane %v965_v63, 1 }
  0xd3   : > { %2368 = vmatprep.subr.bf16.mxu0 %v11940_v12  ;;  %2540 = vmatprep.subr.bf16.mxu1 %v11943_v19  ;;  %v970_v12 = vshll.u32 %v13892_v60, 16  ;;  %v11976_v19 = vld [vmem:[#allocation2 + $0xe04] ss:$16 sps:$4 sm:$0xff]  }
  0xd6   : > { %2369 = vmatpush1.bf16.msra.mxu0 %v11938_v22  ;;  %2541 = vmatpush1.bf16.msra.mxu1 %v11941_v23  ;;  %v932_v22 = vor.u32 %v931_v18, %v927_v17  ;;  %v936_v23 = vrot.slane %v934_v4, 1  ;;  %v11992_v18 = vld [vmem:[#allocation2 + $0xe60] ss:$16 sps:$4 sm:$0xff]  }
  0xd7   : > { %2370 = vmatprep.subr.bf16.mxu0 %v11946_v27  ;;  %2542 = vmatprep.subr.bf16.mxu1 %v11949_v28  ;;  %v11979_v27 = vld [vmem:[#allocation2 + $0xe0c] ss:$16 sps:$4 sm:$0xff]   ;;  %v11974_v28 = vld [vmem:[#allocation2 + $0xe00] ss:$16 sps:$4 sm:$0xff]  }
  0xda   : > { %2371 = vmatpush1.bf16.msra.mxu0 %v11944_v29  ;;  %2543 = vmatpush1.bf16.msra.mxu1 %v11947_v30  ;;  %v11977_v29 = vld [vmem:[#allocation2 + $0xe08] ss:$16 sps:$4 sm:$0xff]   ;;  %v968_v30 = vor.u32 %v967_v11, %v963_v10  ;;  %v11998_v11 = vld [vmem:[#allocation2 + $0xe80] ss:$16 sps:$4 sm:$0xff]  }
  0xdb   : > { %2372 = vmatprep.subr.bf16.mxu0 %v11952_v31  ;;  %2544 = vmatprep.subr.bf16.mxu1 %v11955_v32  ;;  %v972_v31 = vrot.slane %v970_v12, 1  ;;  %v937_v32 = vsel %vm877_vm0, %v932_v22, %v936_v23  ;;  %v12006_v22 = vld [vmem:[#allocation2 + $0xea4] ss:$16 sps:$4 sm:$0xff]   ;;  %v12009_v23 = vld [vmem:[#allocation2 + $0xeac] ss:$16 sps:$4 sm:$0xff]  }
  0xde   : > { %2373 = vmatpush1.bf16.msra.mxu0 %v11950_v34  ;;  %2545 = vmatpush1.bf16.msra.mxu1 %v11953_v35  ;;  %v11982_v34 = vld [vmem:[#allocation2 + $0xe24] ss:$16 sps:$4 sm:$0xff]   ;;  %v11985_v35 = vld [vmem:[#allocation2 + $0xe2c] ss:$16 sps:$4 sm:$0xff]  }
  0xdf   : > { %2374 = vmatprep.subr.bf16.mxu0 %v11958_v37  ;;  %2546 = vmatprep.subr.bf16.mxu1 %v11961_v40  ;;  %v11980_v37 = vld [vmem:[#allocation2 + $0xe20] ss:$16 sps:$4 sm:$0xff]   ;;  %v11983_v40 = vld [vmem:[#allocation2 + $0xe28] ss:$16 sps:$4 sm:$0xff]  }
  0xe2   : > { %2375 = vmatpush1.bf16.msra.mxu0 %v11956_v42  ;;  %2547 = vmatpush1.bf16.msra.mxu1 %v11959_v43  ;;  %v973_v42 = vsel %vm877_vm0, %v968_v30, %v972_v31  ;;  %v11988_v43 = vld [vmem:[#allocation2 + $0xe44] ss:$16 sps:$4 sm:$0xff]   ;;  %v12015_v30 = vld [vmem:[#allocation2 + $0xecc] ss:$16 sps:$4 sm:$0xff]   ;;  %v12010_v31 = vld [vmem:[#allocation2 + $0xec0] ss:$16 sps:$4 sm:$0xff]  }
  0xe3   : > { %2376 = vmatprep.subr.bf16.mxu0 %v11964_v50  ;;  %2548 = vmatprep.subr.bf16.mxu1 %v11967_v51  ;;  %v11991_v50 = vld [vmem:[#allocation2 + $0xe4c] ss:$16 sps:$4 sm:$0xff]   ;;  %v11986_v51 = vld [vmem:[#allocation2 + $0xe40] ss:$16 sps:$4 sm:$0xff]  }
  0xe6   : > { %2377 = vmatpush1.bf16.msra.mxu0 %v11962_v52  ;;  %2549 = vmatpush1.bf16.msra.mxu1 %v11965_v55  ;;  %v11989_v52 = vld [vmem:[#allocation2 + $0xe48] ss:$16 sps:$4 sm:$0xff]   ;;  %v11994_v55 = vld [vmem:[#allocation2 + $0xe64] ss:$16 sps:$4 sm:$0xff]  }
  0xe7   : > { %2378 = vmatprep.subr.bf16.mxu0 %v11970_v59  ;;  %2550 = vmatprep.subr.bf16.mxu1 %v11973_v5  ;;  %v11997_v59 = vld [vmem:[#allocation2 + $0xe6c] ss:$16 sps:$4 sm:$0xff]   ;;  %v11995_v5 = vld [vmem:[#allocation2 + $0xe68] ss:$16 sps:$4 sm:$0xff]  }
  0xea   : > { %2379 = vmatpush1.bf16.msra.mxu0 %v11968_v6  ;;  %2551 = vmatpush1.bf16.msra.mxu1 %v11971_v9  ;;  %v12000_v6 = vld [vmem:[#allocation2 + $0xe84] ss:$16 sps:$4 sm:$0xff]   ;;  %v12003_v9 = vld [vmem:[#allocation2 + $0xe8c] ss:$16 sps:$4 sm:$0xff]  }
  0xeb   : > { %2391 = vmatprep.subr.bf16.mxu0 %v11976_v19  ;;  %2563 = vmatprep.subr.bf16.mxu1 %v11979_v27  ;;  %v12001_v19 = vld [vmem:[#allocation2 + $0xe88] ss:$16 sps:$4 sm:$0xff]   ;;  %v12004_v27 = vld [vmem:[#allocation2 + $0xea0] ss:$16 sps:$4 sm:$0xff]  }
  0xed   : > { %2381 = vmatmul.mubr.bf16.vlgmr.msra.gmra.mrb[0].mxu0 %v937_v32  ;;  %2553 = vmatmul.mubr.bf16.vlgmr.msra.gmra.mrb[0].mxu1 %v937_v32  ;;  %v12013_v32 = vld [vmem:[#allocation2 + $0xec8] ss:$16 sps:$4 sm:$0xff]  }
  0xee   : > { %2392 = vmatpush1.bf16.msra.mxu0 %v11974_v28  ;;  %2564 = vmatpush1.bf16.msra.mxu1 %v11977_v29  ;;  %v12007_v28 = vld [vmem:[#allocation2 + $0xea8] ss:$16 sps:$4 sm:$0xff]   ;;  %v12012_v29 = vld [vmem:[#allocation2 + $0xec4] ss:$16 sps:$4 sm:$0xff]  }
  0xef   : > { %2393 = vmatprep.subr.bf16.mxu0 %v11982_v34  ;;  %2565 = vmatprep.subr.bf16.mxu1 %v11985_v35  ;;  %v12018_v34 = vld [vmem:[#allocation2 + $0xee4] ss:$16 sps:$4 sm:$0xff]   ;;  %v12021_v35 = vld [vmem:[#allocation2 + $0xeec] ss:$16 sps:$4 sm:$0xff]  }
  0xf0   : > { %2423 = vmatprep.mubr.bf16.mxu0 %v973_v42  ;;  %2595 = vmatprep.mubr.bf16.mxu1 %v973_v42  ;;  %v12024_v42 = vld [vmem:[#allocation2 + $0xf04] ss:$16 sps:$4 sm:$0xff]  }
  0xf2   : > { %2394 = vmatpush1.bf16.msra.mxu0 %v11980_v37  ;;  %2566 = vmatpush1.bf16.msra.mxu1 %v11983_v40  ;;  %v12016_v37 = vld [vmem:[#allocation2 + $0xee0] ss:$16 sps:$4 sm:$0xff]   ;;  %v12019_v40 = vld [vmem:[#allocation2 + $0xee8] ss:$16 sps:$4 sm:$0xff]  }
  0xf3   : > { %2395 = vmatprep.subr.bf16.mxu0 %v11988_v43  ;;  %2567 = vmatprep.subr.bf16.mxu1 %v11991_v50  ;;  %v12027_v43 = vld [vmem:[#allocation2 + $0xf0c] ss:$16 sps:$4 sm:$0xff]   ;;  %v12022_v50 = vld [vmem:[#allocation2 + $0xf00] ss:$16 sps:$4 sm:$0xff]  }
  0xf6   : > { %2396 = vmatpush1.bf16.msra.mxu0 %v11986_v51  ;;  %2568 = vmatpush1.bf16.msra.mxu1 %v11989_v52  ;;  %v12025_v51 = vld [vmem:[#allocation2 + $0xf08] ss:$16 sps:$4 sm:$0xff]   ;;  %v12030_v52 = vld [vmem:[#allocation2 + $0xf24] ss:$16 sps:$4 sm:$0xff]  }
  0xf7   : > { %2397 = vmatprep.subr.bf16.mxu0 %v11994_v55  ;;  %2569 = vmatprep.subr.bf16.mxu1 %v11997_v59  ;;  %v12033_v55 = vld [vmem:[#allocation2 + $0xf2c] ss:$16 sps:$4 sm:$0xff]   ;;  %v12028_v59 = vld [vmem:[#allocation2 + $0xf20] ss:$16 sps:$4 sm:$0xff]  }
  0xfa   : > { %2398 = vmatpush1.bf16.msra.mxu0 %v11992_v18  ;;  %2570 = vmatpush1.bf16.msra.mxu1 %v11995_v5  ;;  %v12031_v18 = vld [vmem:[#allocation2 + $0xf28] ss:$16 sps:$4 sm:$0xff]   ;;  %v12036_v5 = vld [vmem:[#allocation2 + $0xf44] ss:$16 sps:$4 sm:$0xff]  }
  0xfb   : > { %2399 = vmatprep.subr.bf16.mxu0 %v12000_v6  ;;  %2571 = vmatprep.subr.bf16.mxu1 %v12003_v9  ;;  %v12039_v6 = vld [vmem:[#allocation2 + $0xf4c] ss:$16 sps:$4 sm:$0xff]   ;;  %v12034_v9 = vld [vmem:[#allocation2 + $0xf40] ss:$16 sps:$4 sm:$0xff]  }
  0xfe   : > { %2400 = vmatpush1.bf16.msra.mxu0 %v11998_v11  ;;  %2572 = vmatpush1.bf16.msra.mxu1 %v12001_v19  ;;  %v12037_v11 = vld [vmem:[#allocation2 + $0xf48] ss:$16 sps:$4 sm:$0xff]   ;;  %v12042_v19 = vld [vmem:[#allocation2 + $0xf64] ss:$16 sps:$4 sm:$0xff]  }
  0xff   : > { %2401 = vmatprep.subr.bf16.mxu0 %v12006_v22  ;;  %2573 = vmatprep.subr.bf16.mxu1 %v12009_v23  ;;  %v12045_v22 = vld [vmem:[#allocation2 + $0xf6c] ss:$16 sps:$4 sm:$0xff]   ;;  %v12040_v23 = vld [vmem:[#allocation2 + $0xf60] ss:$16 sps:$4 sm:$0xff]  }
 0x102   : > { %2402 = vmatpush1.bf16.msra.mxu0 %v12004_v27  ;;  %2574 = vmatpush1.bf16.msra.mxu1 %v12007_v28  ;;  %v12043_v27 = vld [vmem:[#allocation2 + $0xf68] ss:$16 sps:$4 sm:$0xff]   ;;  %v12048_v28 = vld [vmem:[#allocation2 + $0xf84] ss:$16 sps:$4 sm:$0xff]  }
 0x103   : > { %2403 = vmatprep.subr.bf16.mxu0 %v12012_v29  ;;  %2575 = vmatprep.subr.bf16.mxu1 %v12015_v30  ;;  %v12051_v29 = vld [vmem:[#allocation2 + $0xf8c] ss:$16 sps:$4 sm:$0xff]   ;;  %v12046_v30 = vld [vmem:[#allocation2 + $0xf80] ss:$16 sps:$4 sm:$0xff]  }
 0x106   : > { %2404 = vmatpush1.bf16.msra.mxu0 %v12010_v31  ;;  %2576 = vmatpush1.bf16.msra.mxu1 %v12013_v32  ;;  %v12049_v31 = vld [vmem:[#allocation2 + $0xf88] ss:$16 sps:$4 sm:$0xff]   ;;  %v12054_v32 = vld [vmem:[#allocation2 + $0xfa4] ss:$16 sps:$4 sm:$0xff]  }
 0x107   : > { %2405 = vmatprep.subr.bf16.mxu0 %v12018_v34  ;;  %2577 = vmatprep.subr.bf16.mxu1 %v12021_v35  ;;  %v13915_v34 = vcombine.low %v13870_v41, %v13873_v45  ;;  %v12057_v35 = vld [vmem:[#allocation2 + $0xfac] ss:$16 sps:$4 sm:$0xff]   ;;  %v12061_v41 = vld [vmem:[#allocation2 + $0xfc8] ss:$16 sps:$4 sm:$0xff]   ;;  %v12066_v45 = vld [vmem:[#allocation2 + $0xfe4] ss:$16 sps:$4 sm:$0xff]  }
 0x10a   : > { %2406 = vmatpush1.bf16.msra.mxu0 %v12016_v37  ;;  %2578 = vmatpush1.bf16.msra.mxu1 %v12019_v40  ;;  %v12052_v37 = vld [vmem:[#allocation2 + $0xfa0] ss:$16 sps:$4 sm:$0xff]   ;;  %v12055_v40 = vld [vmem:[#allocation2 + $0xfa8] ss:$16 sps:$4 sm:$0xff]  }
 0x10b   : > { %2407 = vmatprep.subr.bf16.mxu0 %v12024_v42  ;;  %2579 = vmatprep.subr.bf16.mxu1 %v12027_v43  ;;  %v12060_v42 = vld [vmem:[#allocation2 + $0xfc4] ss:$16 sps:$4 sm:$0xff]   ;;  %v13919_v43 = vcombine.low %v13876_v47, %v13888_v49  ;;  %v12069_v47 = vld [vmem:[#allocation2 + $0xfec] ss:$16 sps:$4 sm:$0xff]   ;;  %v12064_v49 = vld [vmem:[#allocation2 + $0xfe0] ss:$16 sps:$4 sm:$0xff]  }
 0x10e   : > { %2408 = vmatpush1.bf16.msra.mxu0 %v12022_v50  ;;  %2580 = vmatpush1.bf16.msra.mxu1 %v12025_v51  ;;  %v953_v50 = vshll.u32 %v13915_v34, 16  ;;  %v12063_v51 = vld [vmem:[#allocation2 + $0xfcc] ss:$16 sps:$4 sm:$0xff]  }
 0x10f   : > { %2409 = vmatprep.subr.bf16.mxu0 %v12030_v52  ;;  %2581 = vmatprep.subr.bf16.mxu1 %v12033_v55  ;;  %v12058_v52 = vld [vmem:[#allocation2 + $0xfc0] ss:$16 sps:$4 sm:$0xff]   ;;  %v951_v55 = vshrl.u32 %v13915_v34, 16 }
 0x112   : > { %2410 = vmatpush1.bf16.msra.mxu0 %v12028_v59  ;;  %2582 = vmatpush1.bf16.msra.mxu1 %v12031_v18  ;;  %v955_v59 = vrot.slane %v953_v50, 1  ;;  %v958_v18 = vshll.u32 %v13919_v43, 16 }
 0x113   : > { %2411 = vmatprep.subr.bf16.mxu0 %v12036_v5  ;;  %2583 = vmatprep.subr.bf16.mxu1 %v12039_v6  ;;  %v12067_v5 = vld [vmem:[#allocation2 + $0xfe8] ss:$16 sps:$4 sm:$0xff]   ;;  %v12072_v6 = vld [vmem:[#allocation2 + $0x4] ss:$16 sps:$4 sm:$0xff]  }
 0x116   : > { %2412 = vmatpush1.bf16.msra.mxu0 %v12034_v9  ;;  %2584 = vmatpush1.bf16.msra.mxu1 %v12037_v11  ;;  %v956_v9 = vor.u32 %v955_v59, %v951_v55  ;;  %v960_v11 = vrot.slane %v958_v18, 1  ;;  %v12099_v59 = vld [vmem:[#allocation2 + $0x8c] ss:$16 sps:$4 sm:$0xff]  }
 0x117   : > { %2413 = vmatprep.subr.bf16.mxu0 %v12042_v19  ;;  %2585 = vmatprep.subr.bf16.mxu1 %v12045_v22  ;;  %v12075_v19 = vld [vmem:[#allocation2 + $0xc] ss:$16 sps:$4 sm:$0xff]   ;;  %v12070_v22 = vld [vmem:[#allocation2] ss:$16 sps:$4 sm:$0xff]  }
 0x11a   : > { %2414 = vmatpush1.bf16.msra.mxu0 %v12040_v23  ;;  %2586 = vmatpush1.bf16.msra.mxu1 %v12043_v27  ;;  %v12073_v23 = vld [vmem:[#allocation2 + $0x8] ss:$16 sps:$4 sm:$0xff]   ;;  %v961_v27 = vsel %vm877_vm0, %v956_v9, %v960_v11  ;;  %v12100_v9 = vld [vmem:[#allocation2 + $0xa0] ss:$16 sps:$4 sm:$0xff]  }
 0x11b   : > { %2415 = vmatprep.subr.bf16.mxu0 %v12048_v28  ;;  %2587 = vmatprep.subr.bf16.mxu1 %v12051_v29  ;;  %v12078_v28 = vld [vmem:[#allocation2 + $0x24] ss:$16 sps:$4 sm:$0xff]   ;;  %v12081_v29 = vld [vmem:[#allocation2 + $0x2c] ss:$16 sps:$4 sm:$0xff]   ;;  %v12103_v11 = vld [vmem:[#allocation2 + $0xa8] ss:$16 sps:$4 sm:$0xff]  }
 0x11e   : > { %2416 = vmatpush1.bf16.msra.mxu0 %v12046_v30  ;;  %2588 = vmatpush1.bf16.msra.mxu1 %v12049_v31  ;;  %v12076_v30 = vld [vmem:[#allocation2 + $0x20] ss:$16 sps:$4 sm:$0xff]   ;;  %v12079_v31 = vld [vmem:[#allocation2 + $0x28] ss:$16 sps:$4 sm:$0xff]  }
 0x11f   : > { %2417 = vmatprep.subr.bf16.mxu0 %v12054_v32  ;;  %2589 = vmatprep.subr.bf16.mxu1 %v12057_v35  ;;  %v12084_v32 = vld [vmem:[#allocation2 + $0x44] ss:$16 sps:$4 sm:$0xff]   ;;  %v12087_v35 = vld [vmem:[#allocation2 + $0x4c] ss:$16 sps:$4 sm:$0xff]  }
 0x122   : > { %2418 = vmatpush1.bf16.msra.mxu0 %v12052_v37  ;;  %2590 = vmatpush1.bf16.msra.mxu1 %v12055_v40  ;;  %v12082_v37 = vld [vmem:[#allocation2 + $0x40] ss:$16 sps:$4 sm:$0xff]   ;;  %v12085_v40 = vld [vmem:[#allocation2 + $0x48] ss:$16 sps:$4 sm:$0xff]  }
 0x123   : > { %2419 = vmatprep.subr.bf16.mxu0 %v12060_v42  ;;  %2591 = vmatprep.subr.bf16.mxu1 %v12063_v51  ;;  %v12090_v42 = vld [vmem:[#allocation2 + $0x64] ss:$16 sps:$4 sm:$0xff]   ;;  %v12093_v51 = vld [vmem:[#allocation2 + $0x6c] ss:$16 sps:$4 sm:$0xff]  }
 0x126   : > { %2420 = vmatpush1.bf16.msra.mxu0 %v12058_v52  ;;  %2592 = vmatpush1.bf16.msra.mxu1 %v12061_v41  ;;  %v12088_v52 = vld [vmem:[#allocation2 + $0x60] ss:$16 sps:$4 sm:$0xff]   ;;  %v12091_v41 = vld [vmem:[#allocation2 + $0x68] ss:$16 sps:$4 sm:$0xff]  }
 0x127   : > { %2421 = vmatprep.subr.bf16.mxu0 %v12066_v45  ;;  %2593 = vmatprep.subr.bf16.mxu1 %v12069_v47  ;;  %v12096_v45 = vld [vmem:[#allocation2 + $0x84] ss:$16 sps:$4 sm:$0xff]   ;;  %v12094_v47 = vld [vmem:[#allocation2 + $0x80] ss:$16 sps:$4 sm:$0xff]  }
 0x12a   : > { %2422 = vmatpush1.bf16.msra.mxu0 %v12064_v49  ;;  %2594 = vmatpush1.bf16.msra.mxu1 %v12067_v5  ;;  %v12097_v49 = vld [vmem:[#allocation2 + $0x88] ss:$16 sps:$4 sm:$0xff]   ;;  %v12102_v5 = vld [vmem:[#allocation2 + $0xa4] ss:$16 sps:$4 sm:$0xff]  }
 0x12b   : > { %3886 = vmatprep.subr.bf16.mxu0 %v12072_v6  ;;  %4058 = vmatprep.subr.bf16.mxu1 %v12075_v19  ;;  %v12105_v6 = vld [vmem:[#allocation2 + $0xac] ss:$16 sps:$4 sm:$0xff]   ;;  %v12108_v19 = vld [vmem:[#allocation2 + $0xc4] ss:$16 sps:$4 sm:$0xff]  }
 0x12d   : > { %2424 = vmatmul.mubr.bf16.vlgmr.msra.gmra.mrb[0].mxu0 %v961_v27  ;;  %2596 = vmatmul.mubr.bf16.vlgmr.msra.gmra.mrb[0].mxu1 %v961_v27  ;;  %v12109_v27 = vld [vmem:[#allocation2 + $0xc8] ss:$16 sps:$4 sm:$0xff]  }
 0x12e   : > { %3887 = vmatpush1.bf16.msra.mxu0 %v12070_v22  ;;  %4059 = vmatpush1.bf16.msra.mxu1 %v12073_v23  ;;  %v12111_v22 = vld [vmem:[#allocation2 + $0xcc] ss:$16 sps:$4 sm:$0xff]   ;;  %v12106_v23 = vld [vmem:[#allocation2 + $0xc0] ss:$16 sps:$4 sm:$0xff]  }
 0x12f   : > { %3888 = vmatprep.subr.bf16.mxu0 %v12078_v28  ;;  %4060 = vmatprep.subr.bf16.mxu1 %v12081_v29  ;;  %v12114_v28 = vld [vmem:[#allocation2 + $0xe4] ss:$16 sps:$4 sm:$0xff]   ;;  %v12117_v29 = vld [vmem:[#allocation2 + $0xec] ss:$16 sps:$4 sm:$0xff]  }
 0x130   : > { %3918 = vmatprep.mubr.bf16.mxu0 %v13763_v53  ;;  %4090 = vmatprep.mubr.bf16.mxu1 %v13763_v53 }
 0x132   : > { %3889 = vmatpush1.bf16.msra.mxu0 %v12076_v30  ;;  %4061 = vmatpush1.bf16.msra.mxu1 %v12079_v31  ;;  %v12112_v30 = vld [vmem:[#allocation2 + $0xe0] ss:$16 sps:$4 sm:$0xff]   ;;  %v12115_v31 = vld [vmem:[#allocation2 + $0xe8] ss:$16 sps:$4 sm:$0xff]  }
 0x133   : > { %3890 = vmatprep.subr.bf16.mxu0 %v12084_v32  ;;  %4062 = vmatprep.subr.bf16.mxu1 %v12087_v35  ;;  %v12120_v32 = vld [vmem:[#allocation2 + $0x104] ss:$16 sps:$4 sm:$0xff]   ;;  %v12123_v35 = vld [vmem:[#allocation2 + $0x10c] ss:$16 sps:$4 sm:$0xff]  }
 0x136   : > { %3891 = vmatpush1.bf16.msra.mxu0 %v12082_v37  ;;  %4063 = vmatpush1.bf16.msra.mxu1 %v12085_v40  ;;  %v12118_v37 = vld [vmem:[#allocation2 + $0x100] ss:$16 sps:$4 sm:$0xff]   ;;  %v12121_v40 = vld [vmem:[#allocation2 + $0x108] ss:$16 sps:$4 sm:$0xff]  }
 0x137   : > { %3892 = vmatprep.subr.bf16.mxu0 %v12090_v42  ;;  %4064 = vmatprep.subr.bf16.mxu1 %v12093_v51  ;;  %v12126_v42 = vld [vmem:[#allocation2 + $0x124] ss:$16 sps:$4 sm:$0xff]   ;;  %v12129_v51 = vld [vmem:[#allocation2 + $0x12c] ss:$16 sps:$4 sm:$0xff]  }
 0x13a   : > { %3893 = vmatpush1.bf16.msra.mxu0 %v12088_v52  ;;  %4065 = vmatpush1.bf16.msra.mxu1 %v12091_v41  ;;  %v12124_v52 = vld [vmem:[#allocation2 + $0x120] ss:$16 sps:$4 sm:$0xff]   ;;  %v12127_v41 = vld [vmem:[#allocation2 + $0x128] ss:$16 sps:$4 sm:$0xff]  }
 0x13b   : > { %3894 = vmatprep.subr.bf16.mxu0 %v12096_v45  ;;  %4066 = vmatprep.subr.bf16.mxu1 %v12099_v59  ;;  %v12132_v45 = vld [vmem:[#allocation2 + $0x144] ss:$16 sps:$4 sm:$0xff]   ;;  %v12135_v59 = vld [vmem:[#allocation2 + $0x14c] ss:$16 sps:$4 sm:$0xff]  }
 0x13e   : > { %3895 = vmatpush1.bf16.msra.mxu0 %v12094_v47  ;;  %4067 = vmatpush1.bf16.msra.mxu1 %v12097_v49  ;;  %v12130_v47 = vld [vmem:[#allocation2 + $0x140] ss:$16 sps:$4 sm:$0xff]   ;;  %v12133_v49 = vld [vmem:[#allocation2 + $0x148] ss:$16 sps:$4 sm:$0xff]  }
 0x13f   : > { %3896 = vmatprep.subr.bf16.mxu0 %v12102_v5  ;;  %4068 = vmatprep.subr.bf16.mxu1 %v12105_v6  ;;  %v12138_v5 = vld [vmem:[#allocation2 + $0x164] ss:$16 sps:$4 sm:$0xff]   ;;  %v12141_v6 = vld [vmem:[#allocation2 + $0x16c] ss:$16 sps:$4 sm:$0xff]  }
 0x142   : > { %3897 = vmatpush1.bf16.msra.mxu0 %v12100_v9  ;;  %4069 = vmatpush1.bf16.msra.mxu1 %v12103_v11  ;;  %v12136_v9 = vld [vmem:[#allocation2 + $0x160] ss:$16 sps:$4 sm:$0xff]   ;;  %v12139_v11 = vld [vmem:[#allocation2 + $0x168] ss:$16 sps:$4 sm:$0xff]  }
 0x143   : > { %3898 = vmatprep.subr.bf16.mxu0 %v12108_v19  ;;  %4070 = vmatprep.subr.bf16.mxu1 %v12111_v22  ;;  %v12144_v19 = vld [vmem:[#allocation2 + $0x184] ss:$16 sps:$4 sm:$0xff]   ;;  %v12147_v22 = vld [vmem:[#allocation2 + $0x18c] ss:$16 sps:$4 sm:$0xff]  }
 0x146   : > { %3899 = vmatpush1.bf16.msra.mxu0 %v12106_v23  ;;  %4071 = vmatpush1.bf16.msra.mxu1 %v12109_v27  ;;  %v12142_v23 = vld [vmem:[#allocation2 + $0x180] ss:$16 sps:$4 sm:$0xff]   ;;  %v12145_v27 = vld [vmem:[#allocation2 + $0x188] ss:$16 sps:$4 sm:$0xff]  }
 0x147   : > { %3900 = vmatprep.subr.bf16.mxu0 %v12114_v28  ;;  %4072 = vmatprep.subr.bf16.mxu1 %v12117_v29  ;;  %v12150_v28 = vld [vmem:[#allocation2 + $0x1a4] ss:$16 sps:$4 sm:$0xff]   ;;  %v12153_v29 = vld [vmem:[#allocation2 + $0x1ac] ss:$16 sps:$4 sm:$0xff]  }
 0x14a   : > { %3901 = vmatpush1.bf16.msra.mxu0 %v12112_v30  ;;  %4073 = vmatpush1.bf16.msra.mxu1 %v12115_v31  ;;  %v12148_v30 = vld [vmem:[#allocation2 + $0x1a0] ss:$16 sps:$4 sm:$0xff]   ;;  %v12151_v31 = vld [vmem:[#allocation2 + $0x1a8] ss:$16 sps:$4 sm:$0xff]  }
 0x14b   : > { %3902 = vmatprep.subr.bf16.mxu0 %v12120_v32  ;;  %4074 = vmatprep.subr.bf16.mxu1 %v12123_v35  ;;  %v12156_v32 = vld [vmem:[#allocation2 + $0x1c4] ss:$16 sps:$4 sm:$0xff]   ;;  %v12159_v35 = vld [vmem:[#allocation2 + $0x1cc] ss:$16 sps:$4 sm:$0xff]  }
 0x14e   : > { %3903 = vmatpush1.bf16.msra.mxu0 %v12118_v37  ;;  %4075 = vmatpush1.bf16.msra.mxu1 %v12121_v40  ;;  %v12154_v37 = vld [vmem:[#allocation2 + $0x1c0] ss:$16 sps:$4 sm:$0xff]   ;;  %v12157_v40 = vld [vmem:[#allocation2 + $0x1c8] ss:$16 sps:$4 sm:$0xff]  }
 0x14f   : > { %3904 = vmatprep.subr.bf16.mxu0 %v12126_v42  ;;  %4076 = vmatprep.subr.bf16.mxu1 %v12129_v51  ;;  %v12162_v42 = vld [vmem:[#allocation2 + $0x1e4] ss:$16 sps:$4 sm:$0xff]   ;;  %v12165_v51 = vld [vmem:[#allocation2 + $0x1ec] ss:$16 sps:$4 sm:$0xff]  }
 0x152   : > { %3905 = vmatpush1.bf16.msra.mxu0 %v12124_v52  ;;  %4077 = vmatpush1.bf16.msra.mxu1 %v12127_v41  ;;  %v12160_v52 = vld [vmem:[#allocation2 + $0x1e0] ss:$16 sps:$4 sm:$0xff]   ;;  %v12163_v41 = vld [vmem:[#allocation2 + $0x1e8] ss:$16 sps:$4 sm:$0xff]  }
 0x153   : > { %3906 = vmatprep.subr.bf16.mxu0 %v12132_v45  ;;  %4078 = vmatprep.subr.bf16.mxu1 %v12135_v59  ;;  %v12168_v45 = vld [vmem:[#allocation2 + $0x204] ss:$16 sps:$4 sm:$0xff]   ;;  %v12171_v59 = vld [vmem:[#allocation2 + $0x20c] ss:$16 sps:$4 sm:$0xff]  }
 0x156   : > { %3907 = vmatpush1.bf16.msra.mxu0 %v12130_v47  ;;  %4079 = vmatpush1.bf16.msra.mxu1 %v12133_v49  ;;  %v12166_v47 = vld [vmem:[#allocation2 + $0x200] ss:$16 sps:$4 sm:$0xff]   ;;  %v12169_v49 = vld [vmem:[#allocation2 + $0x208] ss:$16 sps:$4 sm:$0xff]  }
 0x157   : > { %3908 = vmatprep.subr.bf16.mxu0 %v12138_v5  ;;  %4080 = vmatprep.subr.bf16.mxu1 %v12141_v6  ;;  %v12174_v5 = vld [vmem:[#allocation2 + $0x224] ss:$16 sps:$4 sm:$0xff]   ;;  %v12177_v6 = vld [vmem:[#allocation2 + $0x22c] ss:$16 sps:$4 sm:$0xff]  }
 0x15a   : > { %3909 = vmatpush1.bf16.msra.mxu0 %v12136_v9  ;;  %4081 = vmatpush1.bf16.msra.mxu1 %v12139_v11  ;;  %v12172_v9 = vld [vmem:[#allocation2 + $0x220] ss:$16 sps:$4 sm:$0xff]   ;;  %v12175_v11 = vld [vmem:[#allocation2 + $0x228] ss:$16 sps:$4 sm:$0xff]  }
 0x15b   : > { %3910 = vmatprep.subr.bf16.mxu0 %v12144_v19  ;;  %4082 = vmatprep.subr.bf16.mxu1 %v12147_v22  ;;  %v12180_v19 = vld [vmem:[#allocation2 + $0x244] ss:$16 sps:$4 sm:$0xff]   ;;  %v12183_v22 = vld [vmem:[#allocation2 + $0x24c] ss:$16 sps:$4 sm:$0xff]  }
 0x15e   : > { %3911 = vmatpush1.bf16.msra.mxu0 %v12142_v23  ;;  %4083 = vmatpush1.bf16.msra.mxu1 %v12145_v27  ;;  %v12178_v23 = vld [vmem:[#allocation2 + $0x240] ss:$16 sps:$4 sm:$0xff]   ;;  %v12181_v27 = vld [vmem:[#allocation2 + $0x248] ss:$16 sps:$4 sm:$0xff]  }
 0x15f   : > { %3912 = vmatprep.subr.bf16.mxu0 %v12150_v28  ;;  %4084 = vmatprep.subr.bf16.mxu1 %v12153_v29  ;;  %v12186_v28 = vld [vmem:[#allocation2 + $0x264] ss:$16 sps:$4 sm:$0xff]   ;;  %v12189_v29 = vld [vmem:[#allocation2 + $0x26c] ss:$16 sps:$4 sm:$0xff]  }
 0x162   : > { %3913 = vmatpush1.bf16.msra.mxu0 %v12148_v30  ;;  %4085 = vmatpush1.bf16.msra.mxu1 %v12151_v31  ;;  %v12184_v30 = vld [vmem:[#allocation2 + $0x260] ss:$16 sps:$4 sm:$0xff]   ;;  %v12187_v31 = vld [vmem:[#allocation2 + $0x268] ss:$16 sps:$4 sm:$0xff]  }
 0x163   : > { %3914 = vmatprep.subr.bf16.mxu0 %v12156_v32  ;;  %4086 = vmatprep.subr.bf16.mxu1 %v12159_v35  ;;  %v12192_v32 = vld [vmem:[#allocation2 + $0x284] ss:$16 sps:$4 sm:$0xff]   ;;  %v12195_v35 = vld [vmem:[#allocation2 + $0x28c] ss:$16 sps:$4 sm:$0xff]  }
 0x166   : > { %3915 = vmatpush1.bf16.msra.mxu0 %v12154_v37  ;;  %4087 = vmatpush1.bf16.msra.mxu1 %v12157_v40  ;;  %v12190_v37 = vld [vmem:[#allocation2 + $0x280] ss:$16 sps:$4 sm:$0xff]   ;;  %v12193_v40 = vld [vmem:[#allocation2 + $0x288] ss:$16 sps:$4 sm:$0xff]  }
 0x167   : > { %3916 = vmatprep.subr.bf16.mxu0 %v12162_v42  ;;  %4088 = vmatprep.subr.bf16.mxu1 %v12165_v51  ;;  %v12198_v42 = vld [vmem:[#allocation2 + $0x2a4] ss:$16 sps:$4 sm:$0xff]   ;;  %v12201_v51 = vld [vmem:[#allocation2 + $0x2ac] ss:$16 sps:$4 sm:$0xff]  }
 0x16a   : > { %3917 = vmatpush1.bf16.msra.mxu0 %v12160_v52  ;;  %4089 = vmatpush1.bf16.msra.mxu1 %v12163_v41  ;;  %v12196_v52 = vld [vmem:[#allocation2 + $0x2a0] ss:$16 sps:$4 sm:$0xff]   ;;  %v12199_v41 = vld [vmem:[#allocation2 + $0x2a8] ss:$16 sps:$4 sm:$0xff]  }
 0x16b   : > { %3929 = vmatprep.subr.bf16.mxu0 %v12168_v45  ;;  %4101 = vmatprep.subr.bf16.mxu1 %v12171_v59  ;;  %v12204_v45 = vld [vmem:[#allocation2 + $0x2c4] ss:$16 sps:$4 sm:$0xff]   ;;  %v12207_v59 = vld [vmem:[#allocation2 + $0x2cc] ss:$16 sps:$4 sm:$0xff]  }
 0x16d   : > { %3919 = vmatmul.mubr.bf16.vlgmr.msra.gmra.mrb[0].mxu0 %v13774_v0  ;;  %4091 = vmatmul.mubr.bf16.vlgmr.msra.gmra.mrb[0].mxu1 %v13774_v0 }
 0x16e   : > { %3930 = vmatpush1.bf16.msra.mxu0 %v12166_v47  ;;  %4102 = vmatpush1.bf16.msra.mxu1 %v12169_v49  ;;  %v12202_v47 = vld [vmem:[#allocation2 + $0x2c0] ss:$16 sps:$4 sm:$0xff]   ;;  %v12205_v49 = vld [vmem:[#allocation2 + $0x2c8] ss:$16 sps:$4 sm:$0xff]  }
 0x16f   : > { %3931 = vmatprep.subr.bf16.mxu0 %v12174_v5  ;;  %4103 = vmatprep.subr.bf16.mxu1 %v12177_v6  ;;  %v12210_v5 = vld [vmem:[#allocation2 + $0x2e4] ss:$16 sps:$4 sm:$0xff]   ;;  %v12213_v6 = vld [vmem:[#allocation2 + $0x2ec] ss:$16 sps:$4 sm:$0xff]  }
 0x170   : > { %3961 = vmatprep.mubr.bf16.mxu0 %v13802_v61  ;;  %4133 = vmatprep.mubr.bf16.mxu1 %v13802_v61 }
 0x172   : > { %3932 = vmatpush1.bf16.msra.mxu0 %v12172_v9  ;;  %4104 = vmatpush1.bf16.msra.mxu1 %v12175_v11  ;;  %v12208_v9 = vld [vmem:[#allocation2 + $0x2e0] ss:$16 sps:$4 sm:$0xff]   ;;  %v12211_v11 = vld [vmem:[#allocation2 + $0x2e8] ss:$16 sps:$4 sm:$0xff]  }
 0x173   : > { %3933 = vmatprep.subr.bf16.mxu0 %v12180_v19  ;;  %4105 = vmatprep.subr.bf16.mxu1 %v12183_v22  ;;  %v12216_v19 = vld [vmem:[#allocation2 + $0x304] ss:$16 sps:$4 sm:$0xff]   ;;  %v12219_v22 = vld [vmem:[#allocation2 + $0x30c] ss:$16 sps:$4 sm:$0xff]  }
 0x176   : > { %3934 = vmatpush1.bf16.msra.mxu0 %v12178_v23  ;;  %4106 = vmatpush1.bf16.msra.mxu1 %v12181_v27  ;;  %v12214_v23 = vld [vmem:[#allocation2 + $0x300] ss:$16 sps:$4 sm:$0xff]   ;;  %v12217_v27 = vld [vmem:[#allocation2 + $0x308] ss:$16 sps:$4 sm:$0xff]  }
 0x177   : > { %3935 = vmatprep.subr.bf16.mxu0 %v12186_v28  ;;  %4107 = vmatprep.subr.bf16.mxu1 %v12189_v29  ;;  %v12222_v28 = vld [vmem:[#allocation2 + $0x324] ss:$16 sps:$4 sm:$0xff]   ;;  %v12225_v29 = vld [vmem:[#allocation2 + $0x32c] ss:$16 sps:$4 sm:$0xff]  }
 0x17a   : > { %3936 = vmatpush1.bf16.msra.mxu0 %v12184_v30  ;;  %4108 = vmatpush1.bf16.msra.mxu1 %v12187_v31  ;;  %v12220_v30 = vld [vmem:[#allocation2 + $0x320] ss:$16 sps:$4 sm:$0xff]   ;;  %v12223_v31 = vld [vmem:[#allocation2 + $0x328] ss:$16 sps:$4 sm:$0xff]  }
 0x17b   : > { %3937 = vmatprep.subr.bf16.mxu0 %v12192_v32  ;;  %4109 = vmatprep.subr.bf16.mxu1 %v12195_v35  ;;  %v12228_v32 = vld [vmem:[#allocation2 + $0x344] ss:$16 sps:$4 sm:$0xff]   ;;  %v12231_v35 = vld [vmem:[#allocation2 + $0x34c] ss:$16 sps:$4 sm:$0xff]  }
 0x17e   : > { %3938 = vmatpush1.bf16.msra.mxu0 %v12190_v37  ;;  %4110 = vmatpush1.bf16.msra.mxu1 %v12193_v40  ;;  %v12226_v37 = vld [vmem:[#allocation2 + $0x340] ss:$16 sps:$4 sm:$0xff]   ;;  %v12229_v40 = vld [vmem:[#allocation2 + $0x348] ss:$16 sps:$4 sm:$0xff]  }
 0x17f   : > { %3939 = vmatprep.subr.bf16.mxu0 %v12198_v42  ;;  %4111 = vmatprep.subr.bf16.mxu1 %v12201_v51  ;;  %v12234_v42 = vld [vmem:[#allocation2 + $0x364] ss:$16 sps:$4 sm:$0xff]   ;;  %v12237_v51 = vld [vmem:[#allocation2 + $0x36c] ss:$16 sps:$4 sm:$0xff]  }
 0x182   : > { %3940 = vmatpush1.bf16.msra.mxu0 %v12196_v52  ;;  %4112 = vmatpush1.bf16.msra.mxu1 %v12199_v41  ;;  %v12232_v52 = vld [vmem:[#allocation2 + $0x360] ss:$16 sps:$4 sm:$0xff]   ;;  %v12235_v41 = vld [vmem:[#allocation2 + $0x368] ss:$16 sps:$4 sm:$0xff]  }
 0x183   : > { %3941 = vmatprep.subr.bf16.mxu0 %v12204_v45  ;;  %4113 = vmatprep.subr.bf16.mxu1 %v12207_v59  ;;  %v12240_v45 = vld [vmem:[#allocation2 + $0x384] ss:$16 sps:$4 sm:$0xff]   ;;  %v12243_v59 = vld [vmem:[#allocation2 + $0x38c] ss:$16 sps:$4 sm:$0xff]  }
 0x186   : > { %3942 = vmatpush1.bf16.msra.mxu0 %v12202_v47  ;;  %4114 = vmatpush1.bf16.msra.mxu1 %v12205_v49  ;;  %v12238_v47 = vld [vmem:[#allocation2 + $0x380] ss:$16 sps:$4 sm:$0xff]   ;;  %v12241_v49 = vld [vmem:[#allocation2 + $0x388] ss:$16 sps:$4 sm:$0xff]  }
 0x187   : > { %3943 = vmatprep.subr.bf16.mxu0 %v12210_v5  ;;  %4115 = vmatprep.subr.bf16.mxu1 %v12213_v6  ;;  %v12246_v5 = vld [vmem:[#allocation2 + $0x3a4] ss:$16 sps:$4 sm:$0xff]   ;;  %v12249_v6 = vld [vmem:[#allocation2 + $0x3ac] ss:$16 sps:$4 sm:$0xff]  }
 0x18a   : > { %3944 = vmatpush1.bf16.msra.mxu0 %v12208_v9  ;;  %4116 = vmatpush1.bf16.msra.mxu1 %v12211_v11  ;;  %v12244_v9 = vld [vmem:[#allocation2 + $0x3a0] ss:$16 sps:$4 sm:$0xff]   ;;  %v12247_v11 = vld [vmem:[#allocation2 + $0x3a8] ss:$16 sps:$4 sm:$0xff]  }
 0x18b   : > { %3945 = vmatprep.subr.bf16.mxu0 %v12216_v19  ;;  %4117 = vmatprep.subr.bf16.mxu1 %v12219_v22  ;;  %v12252_v19 = vld [vmem:[#allocation2 + $0x3c4] ss:$16 sps:$4 sm:$0xff]   ;;  %v12255_v22 = vld [vmem:[#allocation2 + $0x3cc] ss:$16 sps:$4 sm:$0xff]  }
 0x18e   : > { %3946 = vmatpush1.bf16.msra.mxu0 %v12214_v23  ;;  %4118 = vmatpush1.bf16.msra.mxu1 %v12217_v27  ;;  %v12250_v23 = vld [vmem:[#allocation2 + $0x3c0] ss:$16 sps:$4 sm:$0xff]   ;;  %v12253_v27 = vld [vmem:[#allocation2 + $0x3c8] ss:$16 sps:$4 sm:$0xff]  }
 0x18f   : > { %3947 = vmatprep.subr.bf16.mxu0 %v12222_v28  ;;  %4119 = vmatprep.subr.bf16.mxu1 %v12225_v29  ;;  %v12258_v28 = vld [vmem:[#allocation2 + $0x3e4] ss:$16 sps:$4 sm:$0xff]   ;;  %v12261_v29 = vld [vmem:[#allocation2 + $0x3ec] ss:$16 sps:$4 sm:$0xff]  }
 0x192   : > { %3948 = vmatpush1.bf16.msra.mxu0 %v12220_v30  ;;  %4120 = vmatpush1.bf16.msra.mxu1 %v12223_v31  ;;  %v12256_v30 = vld [vmem:[#allocation2 + $0x3e0] ss:$16 sps:$4 sm:$0xff]   ;;  %v12259_v31 = vld [vmem:[#allocation2 + $0x3e8] ss:$16 sps:$4 sm:$0xff]  }
 0x193   : > { %3949 = vmatprep.subr.bf16.mxu0 %v12228_v32  ;;  %4121 = vmatprep.subr.bf16.mxu1 %v12231_v35  ;;  %v12264_v32 = vld [vmem:[#allocation2 + $0x404] ss:$16 sps:$4 sm:$0xff]   ;;  %v12267_v35 = vld [vmem:[#allocation2 + $0x40c] ss:$16 sps:$4 sm:$0xff]  }
 0x196   : > { %3950 = vmatpush1.bf16.msra.mxu0 %v12226_v37  ;;  %4122 = vmatpush1.bf16.msra.mxu1 %v12229_v40  ;;  %v12262_v37 = vld [vmem:[#allocation2 + $0x400] ss:$16 sps:$4 sm:$0xff]   ;;  %v12265_v40 = vld [vmem:[#allocation2 + $0x408] ss:$16 sps:$4 sm:$0xff]  }
 0x197   : > { %3951 = vmatprep.subr.bf16.mxu0 %v12234_v42  ;;  %4123 = vmatprep.subr.bf16.mxu1 %v12237_v51  ;;  %v12270_v42 = vld [vmem:[#allocation2 + $0x424] ss:$16 sps:$4 sm:$0xff]   ;;  %v12273_v51 = vld [vmem:[#allocation2 + $0x42c] ss:$16 sps:$4 sm:$0xff]  }
 0x19a   : > { %3952 = vmatpush1.bf16.msra.mxu0 %v12232_v52  ;;  %4124 = vmatpush1.bf16.msra.mxu1 %v12235_v41  ;;  %v12268_v52 = vld [vmem:[#allocation2 + $0x420] ss:$16 sps:$4 sm:$0xff]   ;;  %v12271_v41 = vld [vmem:[#allocation2 + $0x428] ss:$16 sps:$4 sm:$0xff]  }
 0x19b   : > { %3953 = vmatprep.subr.bf16.mxu0 %v12240_v45  ;;  %4125 = vmatprep.subr.bf16.mxu1 %v12243_v59  ;;  %v12276_v45 = vld [vmem:[#allocation2 + $0x444] ss:$16 sps:$4 sm:$0xff]   ;;  %v12279_v59 = vld [vmem:[#allocation2 + $0x44c] ss:$16 sps:$4 sm:$0xff]  }
 0x19e   : > { %3954 = vmatpush1.bf16.msra.mxu0 %v12238_v47  ;;  %4126 = vmatpush1.bf16.msra.mxu1 %v12241_v49  ;;  %v12274_v47 = vld [vmem:[#allocation2 + $0x440] ss:$16 sps:$4 sm:$0xff]   ;;  %v12277_v49 = vld [vmem:[#allocation2 + $0x448] ss:$16 sps:$4 sm:$0xff]  }
 0x19f   : > { %3955 = vmatprep.subr.bf16.mxu0 %v12246_v5  ;;  %4127 = vmatprep.subr.bf16.mxu1 %v12249_v6  ;;  %v12282_v5 = vld [vmem:[#allocation2 + $0x464] ss:$16 sps:$4 sm:$0xff]   ;;  %v12285_v6 = vld [vmem:[#allocation2 + $0x46c] ss:$16 sps:$4 sm:$0xff]  }
 0x1a2   : > { %3956 = vmatpush1.bf16.msra.mxu0 %v12244_v9  ;;  %4128 = vmatpush1.bf16.msra.mxu1 %v12247_v11  ;;  %v12280_v9 = vld [vmem:[#allocation2 + $0x460] ss:$16 sps:$4 sm:$0xff]   ;;  %v12283_v11 = vld [vmem:[#allocation2 + $0x468] ss:$16 sps:$4 sm:$0xff]  }
 0x1a3   : > { %3957 = vmatprep.subr.bf16.mxu0 %v12252_v19  ;;  %4129 = vmatprep.subr.bf16.mxu1 %v12255_v22  ;;  %v12288_v19 = vld [vmem:[#allocation2 + $0x484] ss:$16 sps:$4 sm:$0xff]   ;;  %v12291_v22 = vld [vmem:[#allocation2 + $0x48c] ss:$16 sps:$4 sm:$0xff]  }
 0x1a6   : > { %3958 = vmatpush1.bf16.msra.mxu0 %v12250_v23  ;;  %4130 = vmatpush1.bf16.msra.mxu1 %v12253_v27  ;;  %v12286_v23 = vld [vmem:[#allocation2 + $0x480] ss:$16 sps:$4 sm:$0xff]   ;;  %v12289_v27 = vld [vmem:[#allocation2 + $0x488] ss:$16 sps:$4 sm:$0xff]  }
 0x1a7   : > { %3959 = vmatprep.subr.bf16.mxu0 %v12258_v28  ;;  %4131 = vmatprep.subr.bf16.mxu1 %v12261_v29  ;;  %v12294_v28 = vld [vmem:[#allocation2 + $0x4a4] ss:$16 sps:$4 sm:$0xff]   ;;  %v12297_v29 = vld [vmem:[#allocation2 + $0x4ac] ss:$16 sps:$4 sm:$0xff]  }
 0x1aa   : > { %3960 = vmatpush1.bf16.msra.mxu0 %v12256_v30  ;;  %4132 = vmatpush1.bf16.msra.mxu1 %v12259_v31  ;;  %v12292_v30 = vld [vmem:[#allocation2 + $0x4a0] ss:$16 sps:$4 sm:$0xff]   ;;  %v12295_v31 = vld [vmem:[#allocation2 + $0x4a8] ss:$16 sps:$4 sm:$0xff]  }
 0x1ab   : > { %3972 = vmatprep.subr.bf16.mxu0 %v12264_v32  ;;  %4144 = vmatprep.subr.bf16.mxu1 %v12267_v35  ;;  %v12300_v32 = vld [vmem:[#allocation2 + $0x4c4] ss:$16 sps:$4 sm:$0xff]   ;;  %v12303_v35 = vld [vmem:[#allocation2 + $0x4cc] ss:$16 sps:$4 sm:$0xff]  }
 0x1ad   : > { %3962 = vmatmul.mubr.bf16.vlgmr.msra.gmra.mrb[0].mxu0 %v13819_v33  ;;  %4134 = vmatmul.mubr.bf16.vlgmr.msra.gmra.mrb[0].mxu1 %v13819_v33 }
 0x1ae   : > { %3973 = vmatpush1.bf16.msra.mxu0 %v12262_v37  ;;  %4145 = vmatpush1.bf16.msra.mxu1 %v12265_v40  ;;  %v12298_v37 = vld [vmem:[#allocation2 + $0x4c0] ss:$16 sps:$4 sm:$0xff]   ;;  %v12301_v40 = vld [vmem:[#allocation2 + $0x4c8] ss:$16 sps:$4 sm:$0xff]  }
 0x1af   : > { %3974 = vmatprep.subr.bf16.mxu0 %v12270_v42  ;;  %4146 = vmatprep.subr.bf16.mxu1 %v12273_v51  ;;  %v12306_v42 = vld [vmem:[#allocation2 + $0x4e4] ss:$16 sps:$4 sm:$0xff]   ;;  %v12309_v51 = vld [vmem:[#allocation2 + $0x4ec] ss:$16 sps:$4 sm:$0xff]  }
 0x1b0   : > { %4004 = vmatprep.mubr.bf16.mxu0 %v13849_v20  ;;  %4176 = vmatprep.mubr.bf16.mxu1 %v13849_v20 }
 0x1b2   : > { %3975 = vmatpush1.bf16.msra.mxu0 %v12268_v52  ;;  %4147 = vmatpush1.bf16.msra.mxu1 %v12271_v41  ;;  %v12304_v52 = vld [vmem:[#allocation2 + $0x4e0] ss:$16 sps:$4 sm:$0xff]   ;;  %v12307_v41 = vld [vmem:[#allocation2 + $0x4e8] ss:$16 sps:$4 sm:$0xff]  }
 0x1b3   : > { %3976 = vmatprep.subr.bf16.mxu0 %v12276_v45  ;;  %4148 = vmatprep.subr.bf16.mxu1 %v12279_v59  ;;  %v12312_v45 = vld [vmem:[#allocation2 + $0x504] ss:$16 sps:$4 sm:$0xff]   ;;  %v12315_v59 = vld [vmem:[#allocation2 + $0x50c] ss:$16 sps:$4 sm:$0xff]  }
 0x1b6   : > { %3977 = vmatpush1.bf16.msra.mxu0 %v12274_v47  ;;  %4149 = vmatpush1.bf16.msra.mxu1 %v12277_v49  ;;  %v12310_v47 = vld [vmem:[#allocation2 + $0x500] ss:$16 sps:$4 sm:$0xff]   ;;  %v12313_v49 = vld [vmem:[#allocation2 + $0x508] ss:$16 sps:$4 sm:$0xff]  }
 0x1b7   : > { %3978 = vmatprep.subr.bf16.mxu0 %v12282_v5  ;;  %4150 = vmatprep.subr.bf16.mxu1 %v12285_v6  ;;  %v12318_v5 = vld [vmem:[#allocation2 + $0x524] ss:$16 sps:$4 sm:$0xff]   ;;  %v12321_v6 = vld [vmem:[#allocation2 + $0x52c] ss:$16 sps:$4 sm:$0xff]  }
 0x1ba   : > { %3979 = vmatpush1.bf16.msra.mxu0 %v12280_v9  ;;  %4151 = vmatpush1.bf16.msra.mxu1 %v12283_v11  ;;  %v12316_v9 = vld [vmem:[#allocation2 + $0x520] ss:$16 sps:$4 sm:$0xff]   ;;  %v12319_v11 = vld [vmem:[#allocation2 + $0x528] ss:$16 sps:$4 sm:$0xff]  }
 0x1bb   : > { %3980 = vmatprep.subr.bf16.mxu0 %v12288_v19  ;;  %4152 = vmatprep.subr.bf16.mxu1 %v12291_v22  ;;  %v12324_v19 = vld [vmem:[#allocation2 + $0x544] ss:$16 sps:$4 sm:$0xff]   ;;  %v12327_v22 = vld [vmem:[#allocation2 + $0x54c] ss:$16 sps:$4 sm:$0xff]  }
 0x1be   : > { %3981 = vmatpush1.bf16.msra.mxu0 %v12286_v23  ;;  %4153 = vmatpush1.bf16.msra.mxu1 %v12289_v27  ;;  %v12322_v23 = vld [vmem:[#allocation2 + $0x540] ss:$16 sps:$4 sm:$0xff]   ;;  %v12325_v27 = vld [vmem:[#allocation2 + $0x548] ss:$16 sps:$4 sm:$0xff]  }
 0x1bf   : > { %3982 = vmatprep.subr.bf16.mxu0 %v12294_v28  ;;  %4154 = vmatprep.subr.bf16.mxu1 %v12297_v29  ;;  %v12330_v28 = vld [vmem:[#allocation2 + $0x564] ss:$16 sps:$4 sm:$0xff]   ;;  %v12333_v29 = vld [vmem:[#allocation2 + $0x56c] ss:$16 sps:$4 sm:$0xff]  }
 0x1c2   : > { %3983 = vmatpush1.bf16.msra.mxu0 %v12292_v30  ;;  %4155 = vmatpush1.bf16.msra.mxu1 %v12295_v31  ;;  %v12328_v30 = vld [vmem:[#allocation2 + $0x560] ss:$16 sps:$4 sm:$0xff]   ;;  %v12331_v31 = vld [vmem:[#allocation2 + $0x568] ss:$16 sps:$4 sm:$0xff]  }
 0x1c3   : > { %3984 = vmatprep.subr.bf16.mxu0 %v12300_v32  ;;  %4156 = vmatprep.subr.bf16.mxu1 %v12303_v35  ;;  %v12336_v32 = vld [vmem:[#allocation2 + $0x584] ss:$16 sps:$4 sm:$0xff]   ;;  %v12339_v35 = vld [vmem:[#allocation2 + $0x58c] ss:$16 sps:$4 sm:$0xff]  }
 0x1c6   : > { %3985 = vmatpush1.bf16.msra.mxu0 %v12298_v37  ;;  %4157 = vmatpush1.bf16.msra.mxu1 %v12301_v40  ;;  %v12334_v37 = vld [vmem:[#allocation2 + $0x580] ss:$16 sps:$4 sm:$0xff]   ;;  %v12337_v40 = vld [vmem:[#allocation2 + $0x588] ss:$16 sps:$4 sm:$0xff]  }
 0x1c7   : > { %3986 = vmatprep.subr.bf16.mxu0 %v12306_v42  ;;  %4158 = vmatprep.subr.bf16.mxu1 %v12309_v51  ;;  %v12342_v42 = vld [vmem:[#allocation2 + $0x5a4] ss:$16 sps:$4 sm:$0xff]   ;;  %v12345_v51 = vld [vmem:[#allocation2 + $0x5ac] ss:$16 sps:$4 sm:$0xff]  }
 0x1ca   : > { %3987 = vmatpush1.bf16.msra.mxu0 %v12304_v52  ;;  %4159 = vmatpush1.bf16.msra.mxu1 %v12307_v41  ;;  %v12340_v52 = vld [vmem:[#allocation2 + $0x5a0] ss:$16 sps:$4 sm:$0xff]   ;;  %v12343_v41 = vld [vmem:[#allocation2 + $0x5a8] ss:$16 sps:$4 sm:$0xff]  }
 0x1cb   : > { %3988 = vmatprep.subr.bf16.mxu0 %v12312_v45  ;;  %4160 = vmatprep.subr.bf16.mxu1 %v12315_v59  ;;  %v12348_v45 = vld [vmem:[#allocation2 + $0x5c4] ss:$16 sps:$4 sm:$0xff]   ;;  %v12351_v59 = vld [vmem:[#allocation2 + $0x5cc] ss:$16 sps:$4 sm:$0xff]  }
 0x1ce   : > { %3989 = vmatpush1.bf16.msra.mxu0 %v12310_v47  ;;  %4161 = vmatpush1.bf16.msra.mxu1 %v12313_v49  ;;  %v12346_v47 = vld [vmem:[#allocation2 + $0x5c0] ss:$16 sps:$4 sm:$0xff]   ;;  %v12349_v49 = vld [vmem:[#allocation2 + $0x5c8] ss:$16 sps:$4 sm:$0xff]  }
 0x1cf   : > { %3990 = vmatprep.subr.bf16.mxu0 %v12318_v5  ;;  %4162 = vmatprep.subr.bf16.mxu1 %v12321_v6  ;;  %v12354_v5 = vld [vmem:[#allocation2 + $0x5e4] ss:$16 sps:$4 sm:$0xff]   ;;  %v12357_v6 = vld [vmem:[#allocation2 + $0x5ec] ss:$16 sps:$4 sm:$0xff]  }
 0x1d2   : > { %3991 = vmatpush1.bf16.msra.mxu0 %v12316_v9  ;;  %4163 = vmatpush1.bf16.msra.mxu1 %v12319_v11  ;;  %v12352_v9 = vld [vmem:[#allocation2 + $0x5e0] ss:$16 sps:$4 sm:$0xff]   ;;  %v12355_v11 = vld [vmem:[#allocation2 + $0x5e8] ss:$16 sps:$4 sm:$0xff]  }
 0x1d3   : > { %3992 = vmatprep.subr.bf16.mxu0 %v12324_v19  ;;  %4164 = vmatprep.subr.bf16.mxu1 %v12327_v22  ;;  %v12360_v19 = vld [vmem:[#allocation2 + $0x604] ss:$16 sps:$4 sm:$0xff]   ;;  %v12363_v22 = vld [vmem:[#allocation2 + $0x60c] ss:$16 sps:$4 sm:$0xff]  }
 0x1d6   : > { %3993 = vmatpush1.bf16.msra.mxu0 %v12322_v23  ;;  %4165 = vmatpush1.bf16.msra.mxu1 %v12325_v27  ;;  %v12358_v23 = vld [vmem:[#allocation2 + $0x600] ss:$16 sps:$4 sm:$0xff]   ;;  %v12361_v27 = vld [vmem:[#allocation2 + $0x608] ss:$16 sps:$4 sm:$0xff]  }
 0x1d7   : > { %3994 = vmatprep.subr.bf16.mxu0 %v12330_v28  ;;  %4166 = vmatprep.subr.bf16.mxu1 %v12333_v29  ;;  %v12366_v28 = vld [vmem:[#allocation2 + $0x624] ss:$16 sps:$4 sm:$0xff]   ;;  %v12369_v29 = vld [vmem:[#allocation2 + $0x62c] ss:$16 sps:$4 sm:$0xff]  }
 0x1da   : > { %3995 = vmatpush1.bf16.msra.mxu0 %v12328_v30  ;;  %4167 = vmatpush1.bf16.msra.mxu1 %v12331_v31  ;;  %v12364_v30 = vld [vmem:[#allocation2 + $0x620] ss:$16 sps:$4 sm:$0xff]   ;;  %v12367_v31 = vld [vmem:[#allocation2 + $0x628] ss:$16 sps:$4 sm:$0xff]  }
 0x1db   : > { %3996 = vmatprep.subr.bf16.mxu0 %v12336_v32  ;;  %4168 = vmatprep.subr.bf16.mxu1 %v12339_v35  ;;  %v12372_v32 = vld [vmem:[#allocation2 + $0x644] ss:$16 sps:$4 sm:$0xff]   ;;  %v12375_v35 = vld [vmem:[#allocation2 + $0x64c] ss:$16 sps:$4 sm:$0xff]  }
 0x1de   : > { %3997 = vmatpush1.bf16.msra.mxu0 %v12334_v37  ;;  %4169 = vmatpush1.bf16.msra.mxu1 %v12337_v40  ;;  %v12370_v37 = vld [vmem:[#allocation2 + $0x640] ss:$16 sps:$4 sm:$0xff]   ;;  %v12373_v40 = vld [vmem:[#allocation2 + $0x648] ss:$16 sps:$4 sm:$0xff]  }
 0x1df   : > { %3998 = vmatprep.subr.bf16.mxu0 %v12342_v42  ;;  %4170 = vmatprep.subr.bf16.mxu1 %v12345_v51  ;;  %v12378_v42 = vld [vmem:[#allocation2 + $0x664] ss:$16 sps:$4 sm:$0xff]   ;;  %v12381_v51 = vld [vmem:[#allocation2 + $0x66c] ss:$16 sps:$4 sm:$0xff]  }
 0x1e2   : > { %3999 = vmatpush1.bf16.msra.mxu0 %v12340_v52  ;;  %4171 = vmatpush1.bf16.msra.mxu1 %v12343_v41  ;;  %v12376_v52 = vld [vmem:[#allocation2 + $0x660] ss:$16 sps:$4 sm:$0xff]   ;;  %v12379_v41 = vld [vmem:[#allocation2 + $0x668] ss:$16 sps:$4 sm:$0xff]  }
 0x1e3   : > { %4000 = vmatprep.subr.bf16.mxu0 %v12348_v45  ;;  %4172 = vmatprep.subr.bf16.mxu1 %v12351_v59  ;;  %v12384_v45 = vld [vmem:[#allocation2 + $0x684] ss:$16 sps:$4 sm:$0xff]   ;;  %v12387_v59 = vld [vmem:[#allocation2 + $0x68c] ss:$16 sps:$4 sm:$0xff]  }
 0x1e6   : > { %4001 = vmatpush1.bf16.msra.mxu0 %v12346_v47  ;;  %4173 = vmatpush1.bf16.msra.mxu1 %v12349_v49  ;;  %v12382_v47 = vld [vmem:[#allocation2 + $0x680] ss:$16 sps:$4 sm:$0xff]   ;;  %v12385_v49 = vld [vmem:[#allocation2 + $0x688] ss:$16 sps:$4 sm:$0xff]  }
 0x1e7   : > { %4002 = vmatprep.subr.bf16.mxu0 %v12354_v5  ;;  %4174 = vmatprep.subr.bf16.mxu1 %v12357_v6  ;;  %v12390_v5 = vld [vmem:[#allocation2 + $0x6a4] ss:$16 sps:$4 sm:$0xff]   ;;  %v12393_v6 = vld [vmem:[#allocation2 + $0x6ac] ss:$16 sps:$4 sm:$0xff]  }
 0x1ea   : > { %4003 = vmatpush1.bf16.msra.mxu0 %v12352_v9  ;;  %4175 = vmatpush1.bf16.msra.mxu1 %v12355_v11  ;;  %v12388_v9 = vld [vmem:[#allocation2 + $0x6a0] ss:$16 sps:$4 sm:$0xff]   ;;  %v12391_v11 = vld [vmem:[#allocation2 + $0x6a8] ss:$16 sps:$4 sm:$0xff]  }
 0x1eb   : > { %4015 = vmatprep.subr.bf16.mxu0 %v12360_v19  ;;  %4187 = vmatprep.subr.bf16.mxu1 %v12363_v22  ;;  %v12396_v19 = vld [vmem:[#allocation2 + $0x6c4] ss:$16 sps:$4 sm:$0xff]   ;;  %v12399_v22 = vld [vmem:[#allocation2 + $0x6cc] ss:$16 sps:$4 sm:$0xff]  }
 0x1ed   : > { %4005 = vmatmul.mubr.bf16.vlgmr.msra.gmra.mrb[0].mxu0 %v13867_v36  ;;  %4177 = vmatmul.mubr.bf16.vlgmr.msra.gmra.mrb[0].mxu1 %v13867_v36 }
 0x1ee   : > { %4016 = vmatpush1.bf16.msra.mxu0 %v12358_v23  ;;  %4188 = vmatpush1.bf16.msra.mxu1 %v12361_v27  ;;  %v12394_v23 = vld [vmem:[#allocation2 + $0x6c0] ss:$16 sps:$4 sm:$0xff]   ;;  %v12397_v27 = vld [vmem:[#allocation2 + $0x6c8] ss:$16 sps:$4 sm:$0xff]  }
 0x1ef   : > { %4017 = vmatprep.subr.bf16.mxu0 %v12366_v28  ;;  %4189 = vmatprep.subr.bf16.mxu1 %v12369_v29  ;;  %v12402_v28 = vld [vmem:[#allocation2 + $0x6e4] ss:$16 sps:$4 sm:$0xff]   ;;  %v12405_v29 = vld [vmem:[#allocation2 + $0x6ec] ss:$16 sps:$4 sm:$0xff]  }
 0x1f0   : > { %4047 = vmatprep.mubr.bf16.mxu0 %v13880_v48  ;;  %4219 = vmatprep.mubr.bf16.mxu1 %v13880_v48 }
 0x1f2   : > { %4018 = vmatpush1.bf16.msra.mxu0 %v12364_v30  ;;  %4190 = vmatpush1.bf16.msra.mxu1 %v12367_v31  ;;  %v12400_v30 = vld [vmem:[#allocation2 + $0x6e0] ss:$16 sps:$4 sm:$0xff]   ;;  %v12403_v31 = vld [vmem:[#allocation2 + $0x6e8] ss:$16 sps:$4 sm:$0xff]  }
 0x1f3   : > { %4019 = vmatprep.subr.bf16.mxu0 %v12372_v32  ;;  %4191 = vmatprep.subr.bf16.mxu1 %v12375_v35  ;;  %v12408_v32 = vld [vmem:[#allocation2 + $0x704] ss:$16 sps:$4 sm:$0xff]   ;;  %v12411_v35 = vld [vmem:[#allocation2 + $0x70c] ss:$16 sps:$4 sm:$0xff]  }
 0x1f6   : > { %4020 = vmatpush1.bf16.msra.mxu0 %v12370_v37  ;;  %4192 = vmatpush1.bf16.msra.mxu1 %v12373_v40  ;;  %v12406_v37 = vld [vmem:[#allocation2 + $0x700] ss:$16 sps:$4 sm:$0xff]   ;;  %v12409_v40 = vld [vmem:[#allocation2 + $0x708] ss:$16 sps:$4 sm:$0xff]  }
 0x1f7   : > { %4021 = vmatprep.subr.bf16.mxu0 %v12378_v42  ;;  %4193 = vmatprep.subr.bf16.mxu1 %v12381_v51  ;;  %v12414_v42 = vld [vmem:[#allocation2 + $0x724] ss:$16 sps:$4 sm:$0xff]   ;;  %v12417_v51 = vld [vmem:[#allocation2 + $0x72c] ss:$16 sps:$4 sm:$0xff]  }
 0x1fa   : > { %4022 = vmatpush1.bf16.msra.mxu0 %v12376_v52  ;;  %4194 = vmatpush1.bf16.msra.mxu1 %v12379_v41  ;;  %v12412_v52 = vld [vmem:[#allocation2 + $0x720] ss:$16 sps:$4 sm:$0xff]   ;;  %v12415_v41 = vld [vmem:[#allocation2 + $0x728] ss:$16 sps:$4 sm:$0xff]  }
 0x1fb   : > { %4023 = vmatprep.subr.bf16.mxu0 %v12384_v45  ;;  %4195 = vmatprep.subr.bf16.mxu1 %v12387_v59  ;;  %v12420_v45 = vld [vmem:[#allocation2 + $0x744] ss:$16 sps:$4 sm:$0xff]   ;;  %v12423_v59 = vld [vmem:[#allocation2 + $0x74c] ss:$16 sps:$4 sm:$0xff]  }
 0x1fe   : > { %4024 = vmatpush1.bf16.msra.mxu0 %v12382_v47  ;;  %4196 = vmatpush1.bf16.msra.mxu1 %v12385_v49  ;;  %v12418_v47 = vld [vmem:[#allocation2 + $0x740] ss:$16 sps:$4 sm:$0xff]   ;;  %v12421_v49 = vld [vmem:[#allocation2 + $0x748] ss:$16 sps:$4 sm:$0xff]  }
 0x1ff   : > { %4025 = vmatprep.subr.bf16.mxu0 %v12390_v5  ;;  %4197 = vmatprep.subr.bf16.mxu1 %v12393_v6  ;;  %v12426_v5 = vld [vmem:[#allocation2 + $0x764] ss:$16 sps:$4 sm:$0xff]   ;;  %v12429_v6 = vld [vmem:[#allocation2 + $0x76c] ss:$16 sps:$4 sm:$0xff]  }
 0x202   : > { %4026 = vmatpush1.bf16.msra.mxu0 %v12388_v9  ;;  %4198 = vmatpush1.bf16.msra.mxu1 %v12391_v11  ;;  %v12424_v9 = vld [vmem:[#allocation2 + $0x760] ss:$16 sps:$4 sm:$0xff]   ;;  %v12427_v11 = vld [vmem:[#allocation2 + $0x768] ss:$16 sps:$4 sm:$0xff]  }
 0x203   : > { %4027 = vmatprep.subr.bf16.mxu0 %v12396_v19  ;;  %4199 = vmatprep.subr.bf16.mxu1 %v12399_v22  ;;  %v12432_v19 = vld [vmem:[#allocation2 + $0x784] ss:$16 sps:$4 sm:$0xff]   ;;  %v12435_v22 = vld [vmem:[#allocation2 + $0x78c] ss:$16 sps:$4 sm:$0xff]  }
 0x206   : > { %4028 = vmatpush1.bf16.msra.mxu0 %v12394_v23  ;;  %4200 = vmatpush1.bf16.msra.mxu1 %v12397_v27  ;;  %v12430_v23 = vld [vmem:[#allocation2 + $0x780] ss:$16 sps:$4 sm:$0xff]   ;;  %v12433_v27 = vld [vmem:[#allocation2 + $0x788] ss:$16 sps:$4 sm:$0xff]  }
 0x207   : > { %4029 = vmatprep.subr.bf16.mxu0 %v12402_v28  ;;  %4201 = vmatprep.subr.bf16.mxu1 %v12405_v29  ;;  %v12438_v28 = vld [vmem:[#allocation2 + $0x7a4] ss:$16 sps:$4 sm:$0xff]   ;;  %v12441_v29 = vld [vmem:[#allocation2 + $0x7ac] ss:$16 sps:$4 sm:$0xff]  }
 0x20a   : > { %4030 = vmatpush1.bf16.msra.mxu0 %v12400_v30  ;;  %4202 = vmatpush1.bf16.msra.mxu1 %v12403_v31  ;;  %v12436_v30 = vld [vmem:[#allocation2 + $0x7a0] ss:$16 sps:$4 sm:$0xff]   ;;  %v12439_v31 = vld [vmem:[#allocation2 + $0x7a8] ss:$16 sps:$4 sm:$0xff]  }
 0x20b   : > { %4031 = vmatprep.subr.bf16.mxu0 %v12408_v32  ;;  %4203 = vmatprep.subr.bf16.mxu1 %v12411_v35  ;;  %v12444_v32 = vld [vmem:[#allocation2 + $0x7c4] ss:$16 sps:$4 sm:$0xff]   ;;  %v12447_v35 = vld [vmem:[#allocation2 + $0x7cc] ss:$16 sps:$4 sm:$0xff]  }
 0x20e   : > { %4032 = vmatpush1.bf16.msra.mxu0 %v12406_v37  ;;  %4204 = vmatpush1.bf16.msra.mxu1 %v12409_v40  ;;  %v12442_v37 = vld [vmem:[#allocation2 + $0x7c0] ss:$16 sps:$4 sm:$0xff]   ;;  %v12445_v40 = vld [vmem:[#allocation2 + $0x7c8] ss:$16 sps:$4 sm:$0xff]  }
 0x20f   : > { %4033 = vmatprep.subr.bf16.mxu0 %v12414_v42  ;;  %4205 = vmatprep.subr.bf16.mxu1 %v12417_v51  ;;  %v12450_v42 = vld [vmem:[#allocation2 + $0x7e4] ss:$16 sps:$4 sm:$0xff]   ;;  %v12453_v51 = vld [vmem:[#allocation2 + $0x7ec] ss:$16 sps:$4 sm:$0xff]  }
 0x212   : > { %4034 = vmatpush1.bf16.msra.mxu0 %v12412_v52  ;;  %4206 = vmatpush1.bf16.msra.mxu1 %v12415_v41  ;;  %v12448_v52 = vld [vmem:[#allocation2 + $0x7e0] ss:$16 sps:$4 sm:$0xff]   ;;  %v12451_v41 = vld [vmem:[#allocation2 + $0x7e8] ss:$16 sps:$4 sm:$0xff]  }
 0x213   : > { %4035 = vmatprep.subr.bf16.mxu0 %v12420_v45  ;;  %4207 = vmatprep.subr.bf16.mxu1 %v12423_v59  ;;  %v12456_v45 = vld [vmem:[#allocation2 + $0x1004] ss:$16 sps:$4 sm:$0xff]   ;;  %v12459_v59 = vld [vmem:[#allocation2 + $0x100c] ss:$16 sps:$4 sm:$0xff]  }
 0x216   : > { %4036 = vmatpush1.bf16.msra.mxu0 %v12418_v47  ;;  %4208 = vmatpush1.bf16.msra.mxu1 %v12421_v49  ;;  %v4491_v47 = vrot.slane %v13763_v53, 1  ;;  %v4492_v49 = vrot.slane %v13765_v54, 1 }
 0x217   : > { %4037 = vmatprep.subr.bf16.mxu0 %v12426_v5  ;;  %4209 = vmatprep.subr.bf16.mxu1 %v12429_v6  ;;  %v12454_v5 = vld [vmem:[#allocation2 + $0x1000] ss:$16 sps:$4 sm:$0xff]   ;;  %v12457_v6 = vld [vmem:[#allocation2 + $0x1008] ss:$16 sps:$4 sm:$0xff]  }
 0x21a   : > { %4038 = vmatpush1.bf16.msra.mxu0 %v12424_v9  ;;  %4210 = vmatpush1.bf16.msra.mxu1 %v12427_v11  ;;  %v12462_v9 = vld [vmem:[#allocation2 + $0x1024] ss:$16 sps:$4 sm:$0xff]   ;;  %v12465_v11 = vld [vmem:[#allocation2 + $0x102c] ss:$16 sps:$4 sm:$0xff]  }
 0x21b   : > { %4039 = vmatprep.subr.bf16.mxu0 %v12432_v19  ;;  %4211 = vmatprep.subr.bf16.mxu1 %v12435_v22  ;;  %v4493_v19 = vsel %vm4487_vm1, %v4491_v47, %v4492_v49  ;;  %v12460_v22 = vld [vmem:[#allocation2 + $0x1020] ss:$16 sps:$4 sm:$0xff]   ;;  %v12487_v47 = vld [vmem:[#allocation2 + $0x10a8] ss:$16 sps:$4 sm:$0xff]   ;;  %v12492_v49 = vld [vmem:[#allocation2 + $0x10c4] ss:$16 sps:$4 sm:$0xff]  }
 0x21e   : > { %4040 = vmatpush1.bf16.msra.mxu0 %v12430_v23  ;;  %4212 = vmatpush1.bf16.msra.mxu1 %v12433_v27  ;;  %v12463_v23 = vld [vmem:[#allocation2 + $0x1028] ss:$16 sps:$4 sm:$0xff]   ;;  %v12468_v27 = vld [vmem:[#allocation2 + $0x1044] ss:$16 sps:$4 sm:$0xff]  }
 0x21f   : > { %4041 = vmatprep.subr.bf16.mxu0 %v12438_v28  ;;  %4213 = vmatprep.subr.bf16.mxu1 %v12441_v29  ;;  %v12471_v28 = vld [vmem:[#allocation2 + $0x104c] ss:$16 sps:$4 sm:$0xff]   ;;  %v12466_v29 = vld [vmem:[#allocation2 + $0x1040] ss:$16 sps:$4 sm:$0xff]  }
 0x222   : > { %4042 = vmatpush1.bf16.msra.mxu0 %v12436_v30  ;;  %4214 = vmatpush1.bf16.msra.mxu1 %v12439_v31  ;;  %v12469_v30 = vld [vmem:[#allocation2 + $0x1048] ss:$16 sps:$4 sm:$0xff]   ;;  %v12474_v31 = vld [vmem:[#allocation2 + $0x1064] ss:$16 sps:$4 sm:$0xff]  }
 0x223   : > { %4043 = vmatprep.subr.bf16.mxu0 %v12444_v32  ;;  %4215 = vmatprep.subr.bf16.mxu1 %v12447_v35  ;;  %v12477_v32 = vld [vmem:[#allocation2 + $0x106c] ss:$16 sps:$4 sm:$0xff]   ;;  %v12472_v35 = vld [vmem:[#allocation2 + $0x1060] ss:$16 sps:$4 sm:$0xff]  }
 0x226   : > { %4044 = vmatpush1.bf16.msra.mxu0 %v12442_v37  ;;  %4216 = vmatpush1.bf16.msra.mxu1 %v12445_v40  ;;  %v12475_v37 = vld [vmem:[#allocation2 + $0x1068] ss:$16 sps:$4 sm:$0xff]   ;;  %v12480_v40 = vld [vmem:[#allocation2 + $0x1084] ss:$16 sps:$4 sm:$0xff]  }
 0x227   : > { %4045 = vmatprep.subr.bf16.mxu0 %v12450_v42  ;;  %4217 = vmatprep.subr.bf16.mxu1 %v12453_v51  ;;  %v12483_v42 = vld [vmem:[#allocation2 + $0x108c] ss:$16 sps:$4 sm:$0xff]   ;;  %v12478_v51 = vld [vmem:[#allocation2 + $0x1080] ss:$16 sps:$4 sm:$0xff]  }
 0x22a   : > { %4046 = vmatpush1.bf16.msra.mxu0 %v12448_v52  ;;  %4218 = vmatpush1.bf16.msra.mxu1 %v12451_v41  ;;  %v12481_v52 = vld [vmem:[#allocation2 + $0x1088] ss:$16 sps:$4 sm:$0xff]   ;;  %v12486_v41 = vld [vmem:[#allocation2 + $0x10a4] ss:$16 sps:$4 sm:$0xff]  }
 0x22b   : > { %5800 = vmatprep.subr.bf16.mxu0 %v12456_v45  ;;  %5972 = vmatprep.subr.bf16.mxu1 %v12459_v59  ;;  %v12489_v45 = vld [vmem:[#allocation2 + $0x10ac] ss:$16 sps:$4 sm:$0xff]   ;;  %v12484_v59 = vld [vmem:[#allocation2 + $0x10a0] ss:$16 sps:$4 sm:$0xff]  }
 0x22d   : > { %4048 = vmatmul.mubr.bf16.vlgmr.msra.gmra.mrb[0].mxu0 %v13915_v34  ;;  %4220 = vmatmul.mubr.bf16.vlgmr.msra.gmra.mrb[0].mxu1 %v13915_v34 }
 0x22e   : > { %5801 = vmatpush1.bf16.msra.mxu0 %v12454_v5  ;;  %5973 = vmatpush1.bf16.msra.mxu1 %v12457_v6  ;;  %v12495_v5 = vld [vmem:[#allocation2 + $0x10cc] ss:$16 sps:$4 sm:$0xff]   ;;  %v12490_v6 = vld [vmem:[#allocation2 + $0x10c0] ss:$16 sps:$4 sm:$0xff]  }
 0x22f   : > { %5802 = vmatprep.subr.bf16.mxu0 %v12462_v9  ;;  %5974 = vmatprep.subr.bf16.mxu1 %v12465_v11  ;;  %v12493_v9 = vld [vmem:[#allocation2 + $0x10c8] ss:$16 sps:$4 sm:$0xff]   ;;  %v12498_v11 = vld [vmem:[#allocation2 + $0x10e4] ss:$16 sps:$4 sm:$0xff]  }
 0x230   : > { %5832 = vmatprep.mubr.bf16.mxu0 %v4493_v19  ;;  %6004 = vmatprep.mubr.bf16.mxu1 %v4493_v19  ;;  %v12501_v19 = vld [vmem:[#allocation2 + $0x10ec] ss:$16 sps:$4 sm:$0xff]  }
 0x232   : > { %5803 = vmatpush1.bf16.msra.mxu0 %v12460_v22  ;;  %5975 = vmatpush1.bf16.msra.mxu1 %v12463_v23  ;;  %v12496_v22 = vld [vmem:[#allocation2 + $0x10e0] ss:$16 sps:$4 sm:$0xff]   ;;  %v12499_v23 = vld [vmem:[#allocation2 + $0x10e8] ss:$16 sps:$4 sm:$0xff]  }
 0x233   : > { %5804 = vmatprep.subr.bf16.mxu0 %v12468_v27  ;;  %5976 = vmatprep.subr.bf16.mxu1 %v12471_v28  ;;  %v12504_v27 = vld [vmem:[#allocation2 + $0x1104] ss:$16 sps:$4 sm:$0xff]   ;;  %v12507_v28 = vld [vmem:[#allocation2 + $0x110c] ss:$16 sps:$4 sm:$0xff]  }
 0x236   : > { %5805 = vmatpush1.bf16.msra.mxu0 %v12466_v29  ;;  %5977 = vmatpush1.bf16.msra.mxu1 %v12469_v30  ;;  %v12502_v29 = vld [vmem:[#allocation2 + $0x1100] ss:$16 sps:$4 sm:$0xff]   ;;  %v12505_v30 = vld [vmem:[#allocation2 + $0x1108] ss:$16 sps:$4 sm:$0xff]  }
 0x237   : > { %5806 = vmatprep.subr.bf16.mxu0 %v12474_v31  ;;  %5978 = vmatprep.subr.bf16.mxu1 %v12477_v32  ;;  %v12510_v31 = vld [vmem:[#allocation2 + $0x1124] ss:$16 sps:$4 sm:$0xff]   ;;  %v12513_v32 = vld [vmem:[#allocation2 + $0x112c] ss:$16 sps:$4 sm:$0xff]  }
 0x23a   : > { %5807 = vmatpush1.bf16.msra.mxu0 %v12472_v35  ;;  %5979 = vmatpush1.bf16.msra.mxu1 %v12475_v37  ;;  %v12508_v35 = vld [vmem:[#allocation2 + $0x1120] ss:$16 sps:$4 sm:$0xff]   ;;  %v12511_v37 = vld [vmem:[#allocation2 + $0x1128] ss:$16 sps:$4 sm:$0xff]  }
 0x23b   : > { %5808 = vmatprep.subr.bf16.mxu0 %v12480_v40  ;;  %5980 = vmatprep.subr.bf16.mxu1 %v12483_v42  ;;  %v12516_v40 = vld [vmem:[#allocation2 + $0x1144] ss:$16 sps:$4 sm:$0xff]   ;;  %v12519_v42 = vld [vmem:[#allocation2 + $0x114c] ss:$16 sps:$4 sm:$0xff]  }
 0x23e   : > { %5809 = vmatpush1.bf16.msra.mxu0 %v12478_v51  ;;  %5981 = vmatpush1.bf16.msra.mxu1 %v12481_v52  ;;  %v12514_v51 = vld [vmem:[#allocation2 + $0x1140] ss:$16 sps:$4 sm:$0xff]   ;;  %v12517_v52 = vld [vmem:[#allocation2 + $0x1148] ss:$16 sps:$4 sm:$0xff]  }
 0x23f   : > { %5810 = vmatprep.subr.bf16.mxu0 %v12486_v41  ;;  %5982 = vmatprep.subr.bf16.mxu1 %v12489_v45  ;;  %v12522_v41 = vld [vmem:[#allocation2 + $0x1164] ss:$16 sps:$4 sm:$0xff]   ;;  %v12525_v45 = vld [vmem:[#allocation2 + $0x116c] ss:$16 sps:$4 sm:$0xff]  }
 0x242   : > { %5811 = vmatpush1.bf16.msra.mxu0 %v12484_v59  ;;  %5983 = vmatpush1.bf16.msra.mxu1 %v12487_v47  ;;  %v12520_v59 = vld [vmem:[#allocation2 + $0x1160] ss:$16 sps:$4 sm:$0xff]   ;;  %v12523_v47 = vld [vmem:[#allocation2 + $0x1168] ss:$16 sps:$4 sm:$0xff]  }
 0x243   : > { %5812 = vmatprep.subr.bf16.mxu0 %v12492_v49  ;;  %5984 = vmatprep.subr.bf16.mxu1 %v12495_v5  ;;  %v12528_v49 = vld [vmem:[#allocation2 + $0x1184] ss:$16 sps:$4 sm:$0xff]   ;;  %v12531_v5 = vld [vmem:[#allocation2 + $0x118c] ss:$16 sps:$4 sm:$0xff]  }
 0x246   : > { %5813 = vmatpush1.bf16.msra.mxu0 %v12490_v6  ;;  %5985 = vmatpush1.bf16.msra.mxu1 %v12493_v9  ;;  %v12526_v6 = vld [vmem:[#allocation2 + $0x1180] ss:$16 sps:$4 sm:$0xff]   ;;  %v12529_v9 = vld [vmem:[#allocation2 + $0x1188] ss:$16 sps:$4 sm:$0xff]  }
 0x247   : > { %5814 = vmatprep.subr.bf16.mxu0 %v12498_v11  ;;  %5986 = vmatprep.subr.bf16.mxu1 %v12501_v19  ;;  %v12534_v11 = vld [vmem:[#allocation2 + $0x11a4] ss:$16 sps:$4 sm:$0xff]   ;;  %v12537_v19 = vld [vmem:[#allocation2 + $0x11ac] ss:$16 sps:$4 sm:$0xff]  }
 0x24a   : > { %5815 = vmatpush1.bf16.msra.mxu0 %v12496_v22  ;;  %5987 = vmatpush1.bf16.msra.mxu1 %v12499_v23  ;;  %v12532_v22 = vld [vmem:[#allocation2 + $0x11a0] ss:$16 sps:$4 sm:$0xff]   ;;  %v12535_v23 = vld [vmem:[#allocation2 + $0x11a8] ss:$16 sps:$4 sm:$0xff]  }
 0x24b   : > { %5816 = vmatprep.subr.bf16.mxu0 %v12504_v27  ;;  %5988 = vmatprep.subr.bf16.mxu1 %v12507_v28  ;;  %v12540_v27 = vld [vmem:[#allocation2 + $0x11c4] ss:$16 sps:$4 sm:$0xff]   ;;  %v12543_v28 = vld [vmem:[#allocation2 + $0x11cc] ss:$16 sps:$4 sm:$0xff]  }
 0x24e   : > { %5817 = vmatpush1.bf16.msra.mxu0 %v12502_v29  ;;  %5989 = vmatpush1.bf16.msra.mxu1 %v12505_v30  ;;  %v12538_v29 = vld [vmem:[#allocation2 + $0x11c0] ss:$16 sps:$4 sm:$0xff]   ;;  %v12541_v30 = vld [vmem:[#allocation2 + $0x11c8] ss:$16 sps:$4 sm:$0xff]  }
 0x24f   : > { %5818 = vmatprep.subr.bf16.mxu0 %v12510_v31  ;;  %5990 = vmatprep.subr.bf16.mxu1 %v12513_v32  ;;  %v12546_v31 = vld [vmem:[#allocation2 + $0x11e4] ss:$16 sps:$4 sm:$0xff]   ;;  %v12549_v32 = vld [vmem:[#allocation2 + $0x11ec] ss:$16 sps:$4 sm:$0xff]  }
 0x252   : > { %5819 = vmatpush1.bf16.msra.mxu0 %v12508_v35  ;;  %5991 = vmatpush1.bf16.msra.mxu1 %v12511_v37  ;;  %v12544_v35 = vld [vmem:[#allocation2 + $0x11e0] ss:$16 sps:$4 sm:$0xff]   ;;  %v12547_v37 = vld [vmem:[#allocation2 + $0x11e8] ss:$16 sps:$4 sm:$0xff]  }
 0x253   : > { %5820 = vmatprep.subr.bf16.mxu0 %v12516_v40  ;;  %5992 = vmatprep.subr.bf16.mxu1 %v12519_v42  ;;  %v4488_v40 = vrot.slane %v13774_v0, 1  ;;  %v4489_v42 = vrot.slane %v13779_v7, 1 }
 0x256   : > { %5821 = vmatpush1.bf16.msra.mxu0 %v12514_v51  ;;  %5993 = vmatpush1.bf16.msra.mxu1 %v12517_v52  ;;  %v12552_v51 = vld [vmem:[#allocation2 + $0x1204] ss:$16 sps:$4 sm:$0xff]   ;;  %v12555_v52 = vld [vmem:[#allocation2 + $0x120c] ss:$16 sps:$4 sm:$0xff]  }
 0x257   : > { %5822 = vmatprep.subr.bf16.mxu0 %v12522_v41  ;;  %5994 = vmatprep.subr.bf16.mxu1 %v12525_v45  ;;  %v4497_v41 = vrot.slane %v13802_v61, 1  ;;  %v4498_v45 = vrot.slane %v13806_v62, 1 }
 0x25a   : > { %5823 = vmatpush1.bf16.msra.mxu0 %v12520_v59  ;;  %5995 = vmatpush1.bf16.msra.mxu1 %v12523_v47  ;;  %v12550_v59 = vld [vmem:[#allocation2 + $0x1200] ss:$16 sps:$4 sm:$0xff]   ;;  %v12553_v47 = vld [vmem:[#allocation2 + $0x1208] ss:$16 sps:$4 sm:$0xff]  }
 0x25b   : > { %5824 = vmatprep.subr.bf16.mxu0 %v12528_v49  ;;  %5996 = vmatprep.subr.bf16.mxu1 %v12531_v5  ;;  %v4490_v49 = vsel %vm4487_vm1, %v4488_v40, %v4489_v42  ;;  %v12558_v5 = vld [vmem:[#allocation2 + $0x1224] ss:$16 sps:$4 sm:$0xff]   ;;  %v12574_v40 = vld [vmem:[#allocation2 + $0x1280] ss:$16 sps:$4 sm:$0xff]   ;;  %v12577_v42 = vld [vmem:[#allocation2 + $0x1288] ss:$16 sps:$4 sm:$0xff]  }
 0x25e   : > { %5825 = vmatpush1.bf16.msra.mxu0 %v12526_v6  ;;  %5997 = vmatpush1.bf16.msra.mxu1 %v12529_v9  ;;  %v12561_v6 = vld [vmem:[#allocation2 + $0x122c] ss:$16 sps:$4 sm:$0xff]   ;;  %v4499_v9 = vsel %vm4487_vm1, %v4497_v41, %v4498_v45  ;;  %v12580_v41 = vld [vmem:[#allocation2 + $0x12a0] ss:$16 sps:$4 sm:$0xff]   ;;  %v12583_v45 = vld [vmem:[#allocation2 + $0x12a8] ss:$16 sps:$4 sm:$0xff]  }
 0x25f   : > { %5826 = vmatprep.subr.bf16.mxu0 %v12534_v11  ;;  %5998 = vmatprep.subr.bf16.mxu1 %v12537_v19  ;;  %v12556_v11 = vld [vmem:[#allocation2 + $0x1220] ss:$16 sps:$4 sm:$0xff]   ;;  %v12559_v19 = vld [vmem:[#allocation2 + $0x1228] ss:$16 sps:$4 sm:$0xff]  }
 0x262   : > { %5827 = vmatpush1.bf16.msra.mxu0 %v12532_v22  ;;  %5999 = vmatpush1.bf16.msra.mxu1 %v12535_v23  ;;  %v12564_v22 = vld [vmem:[#allocation2 + $0x1244] ss:$16 sps:$4 sm:$0xff]   ;;  %v12567_v23 = vld [vmem:[#allocation2 + $0x124c] ss:$16 sps:$4 sm:$0xff]  }
 0x263   : > { %5828 = vmatprep.subr.bf16.mxu0 %v12540_v27  ;;  %6000 = vmatprep.subr.bf16.mxu1 %v12543_v28  ;;  %v12562_v27 = vld [vmem:[#allocation2 + $0x1240] ss:$16 sps:$4 sm:$0xff]   ;;  %v12565_v28 = vld [vmem:[#allocation2 + $0x1248] ss:$16 sps:$4 sm:$0xff]  }
 0x266   : > { %5829 = vmatpush1.bf16.msra.mxu0 %v12538_v29  ;;  %6001 = vmatpush1.bf16.msra.mxu1 %v12541_v30  ;;  %v12570_v29 = vld [vmem:[#allocation2 + $0x1264] ss:$16 sps:$4 sm:$0xff]   ;;  %v12573_v30 = vld [vmem:[#allocation2 + $0x126c] ss:$16 sps:$4 sm:$0xff]  }
 0x267   : > { %5830 = vmatprep.subr.bf16.mxu0 %v12546_v31  ;;  %6002 = vmatprep.subr.bf16.mxu1 %v12549_v32  ;;  %v12568_v31 = vld [vmem:[#allocation2 + $0x1260] ss:$16 sps:$4 sm:$0xff]   ;;  %v12571_v32 = vld [vmem:[#allocation2 + $0x1268] ss:$16 sps:$4 sm:$0xff]  }
 0x26a   : > { %5831 = vmatpush1.bf16.msra.mxu0 %v12544_v35  ;;  %6003 = vmatpush1.bf16.msra.mxu1 %v12547_v37  ;;  %v12576_v35 = vld [vmem:[#allocation2 + $0x1284] ss:$16 sps:$4 sm:$0xff]   ;;  %v12579_v37 = vld [vmem:[#allocation2 + $0x128c] ss:$16 sps:$4 sm:$0xff]  }
 0x26b   : > { %5843 = vmatprep.subr.bf16.mxu0 %v12552_v51  ;;  %6015 = vmatprep.subr.bf16.mxu1 %v12555_v52  ;;  %v12582_v51 = vld [vmem:[#allocation2 + $0x12a4] ss:$16 sps:$4 sm:$0xff]   ;;  %v12585_v52 = vld [vmem:[#allocation2 + $0x12ac] ss:$16 sps:$4 sm:$0xff]  }
 0x26d   : > { %5833 = vmatmul.mubr.bf16.vlgmr.msra.gmra.mrb[0].mxu0 %v4490_v49  ;;  %6005 = vmatmul.mubr.bf16.vlgmr.msra.gmra.mrb[0].mxu1 %v4490_v49  ;;  %v12586_v49 = vld [vmem:[#allocation2 + $0x12c0] ss:$16 sps:$4 sm:$0xff]  }
 0x26e   : > { %5844 = vmatpush1.bf16.msra.mxu0 %v12550_v59  ;;  %6016 = vmatpush1.bf16.msra.mxu1 %v12553_v47  ;;  %v12588_v59 = vld [vmem:[#allocation2 + $0x12c4] ss:$16 sps:$4 sm:$0xff]   ;;  %v12591_v47 = vld [vmem:[#allocation2 + $0x12cc] ss:$16 sps:$4 sm:$0xff]  }
 0x26f   : > { %5845 = vmatprep.subr.bf16.mxu0 %v12558_v5  ;;  %6017 = vmatprep.subr.bf16.mxu1 %v12561_v6  ;;  %v12589_v5 = vld [vmem:[#allocation2 + $0x12c8] ss:$16 sps:$4 sm:$0xff]   ;;  %v12594_v6 = vld [vmem:[#allocation2 + $0x12e4] ss:$16 sps:$4 sm:$0xff]  }
 0x270   : > { %5875 = vmatprep.mubr.bf16.mxu0 %v4499_v9  ;;  %6047 = vmatprep.mubr.bf16.mxu1 %v4499_v9  ;;  %v12597_v9 = vld [vmem:[#allocation2 + $0x12ec] ss:$16 sps:$4 sm:$0xff]  }
 0x272   : > { %5846 = vmatpush1.bf16.msra.mxu0 %v12556_v11  ;;  %6018 = vmatpush1.bf16.msra.mxu1 %v12559_v19  ;;  %v12592_v11 = vld [vmem:[#allocation2 + $0x12e0] ss:$16 sps:$4 sm:$0xff]   ;;  %v12595_v19 = vld [vmem:[#allocation2 + $0x12e8] ss:$16 sps:$4 sm:$0xff]  }
 0x273   : > { %5847 = vmatprep.subr.bf16.mxu0 %v12564_v22  ;;  %6019 = vmatprep.subr.bf16.mxu1 %v12567_v23  ;;  %v12600_v22 = vld [vmem:[#allocation2 + $0x1304] ss:$16 sps:$4 sm:$0xff]   ;;  %v12603_v23 = vld [vmem:[#allocation2 + $0x130c] ss:$16 sps:$4 sm:$0xff]  }
 0x276   : > { %5848 = vmatpush1.bf16.msra.mxu0 %v12562_v27  ;;  %6020 = vmatpush1.bf16.msra.mxu1 %v12565_v28  ;;  %v12598_v27 = vld [vmem:[#allocation2 + $0x1300] ss:$16 sps:$4 sm:$0xff]   ;;  %v12601_v28 = vld [vmem:[#allocation2 + $0x1308] ss:$16 sps:$4 sm:$0xff]  }
 0x277   : > { %5849 = vmatprep.subr.bf16.mxu0 %v12570_v29  ;;  %6021 = vmatprep.subr.bf16.mxu1 %v12573_v30  ;;  %v12606_v29 = vld [vmem:[#allocation2 + $0x1324] ss:$16 sps:$4 sm:$0xff]   ;;  %v12609_v30 = vld [vmem:[#allocation2 + $0x132c] ss:$16 sps:$4 sm:$0xff]  }
 0x27a   : > { %5850 = vmatpush1.bf16.msra.mxu0 %v12568_v31  ;;  %6022 = vmatpush1.bf16.msra.mxu1 %v12571_v32  ;;  %v12604_v31 = vld [vmem:[#allocation2 + $0x1320] ss:$16 sps:$4 sm:$0xff]   ;;  %v12607_v32 = vld [vmem:[#allocation2 + $0x1328] ss:$16 sps:$4 sm:$0xff]  }
 0x27b   : > { %5851 = vmatprep.subr.bf16.mxu0 %v12576_v35  ;;  %6023 = vmatprep.subr.bf16.mxu1 %v12579_v37  ;;  %v12612_v35 = vld [vmem:[#allocation2 + $0x1344] ss:$16 sps:$4 sm:$0xff]   ;;  %v12615_v37 = vld [vmem:[#allocation2 + $0x134c] ss:$16 sps:$4 sm:$0xff]  }
 0x27e   : > { %5852 = vmatpush1.bf16.msra.mxu0 %v12574_v40  ;;  %6024 = vmatpush1.bf16.msra.mxu1 %v12577_v42  ;;  %v12610_v40 = vld [vmem:[#allocation2 + $0x1340] ss:$16 sps:$4 sm:$0xff]   ;;  %v12613_v42 = vld [vmem:[#allocation2 + $0x1348] ss:$16 sps:$4 sm:$0xff]  }
 0x27f   : > { %5853 = vmatprep.subr.bf16.mxu0 %v12582_v51  ;;  %6025 = vmatprep.subr.bf16.mxu1 %v12585_v52  ;;  %v12618_v51 = vld [vmem:[#allocation2 + $0x1364] ss:$16 sps:$4 sm:$0xff]   ;;  %v12621_v52 = vld [vmem:[#allocation2 + $0x136c] ss:$16 sps:$4 sm:$0xff]  }
 0x282   : > { %5854 = vmatpush1.bf16.msra.mxu0 %v12580_v41  ;;  %6026 = vmatpush1.bf16.msra.mxu1 %v12583_v45  ;;  %v12616_v41 = vld [vmem:[#allocation2 + $0x1360] ss:$16 sps:$4 sm:$0xff]   ;;  %v12619_v45 = vld [vmem:[#allocation2 + $0x1368] ss:$16 sps:$4 sm:$0xff]  }
 0x283   : > { %5855 = vmatprep.subr.bf16.mxu0 %v12588_v59  ;;  %6027 = vmatprep.subr.bf16.mxu1 %v12591_v47  ;;  %v12624_v59 = vld [vmem:[#allocation2 + $0x1384] ss:$16 sps:$4 sm:$0xff]   ;;  %v12627_v47 = vld [vmem:[#allocation2 + $0x138c] ss:$16 sps:$4 sm:$0xff]  }
 0x286   : > { %5856 = vmatpush1.bf16.msra.mxu0 %v12586_v49  ;;  %6028 = vmatpush1.bf16.msra.mxu1 %v12589_v5  ;;  %v12622_v49 = vld [vmem:[#allocation2 + $0x1380] ss:$16 sps:$4 sm:$0xff]   ;;  %v12625_v5 = vld [vmem:[#allocation2 + $0x1388] ss:$16 sps:$4 sm:$0xff]  }
 0x287   : > { %5857 = vmatprep.subr.bf16.mxu0 %v12594_v6  ;;  %6029 = vmatprep.subr.bf16.mxu1 %v12597_v9  ;;  %v12630_v6 = vld [vmem:[#allocation2 + $0x13a4] ss:$16 sps:$4 sm:$0xff]   ;;  %v12633_v9 = vld [vmem:[#allocation2 + $0x13ac] ss:$16 sps:$4 sm:$0xff]  }
 0x28a   : > { %5858 = vmatpush1.bf16.msra.mxu0 %v12592_v11  ;;  %6030 = vmatpush1.bf16.msra.mxu1 %v12595_v19  ;;  %v12628_v11 = vld [vmem:[#allocation2 + $0x13a0] ss:$16 sps:$4 sm:$0xff]   ;;  %v12631_v19 = vld [vmem:[#allocation2 + $0x13a8] ss:$16 sps:$4 sm:$0xff]  }
 0x28b   : > { %5859 = vmatprep.subr.bf16.mxu0 %v12600_v22  ;;  %6031 = vmatprep.subr.bf16.mxu1 %v12603_v23  ;;  %v12636_v22 = vld [vmem:[#allocation2 + $0x13c4] ss:$16 sps:$4 sm:$0xff]   ;;  %v12639_v23 = vld [vmem:[#allocation2 + $0x13cc] ss:$16 sps:$4 sm:$0xff]  }
 0x28e   : > { %5860 = vmatpush1.bf16.msra.mxu0 %v12598_v27  ;;  %6032 = vmatpush1.bf16.msra.mxu1 %v12601_v28  ;;  %v12634_v27 = vld [vmem:[#allocation2 + $0x13c0] ss:$16 sps:$4 sm:$0xff]   ;;  %v12637_v28 = vld [vmem:[#allocation2 + $0x13c8] ss:$16 sps:$4 sm:$0xff]  }
 0x28f   : > { %5861 = vmatprep.subr.bf16.mxu0 %v12606_v29  ;;  %6033 = vmatprep.subr.bf16.mxu1 %v12609_v30  ;;  %v12642_v29 = vld [vmem:[#allocation2 + $0x13e4] ss:$16 sps:$4 sm:$0xff]   ;;  %v12645_v30 = vld [vmem:[#allocation2 + $0x13ec] ss:$16 sps:$4 sm:$0xff]  }
 0x292   : > { %5862 = vmatpush1.bf16.msra.mxu0 %v12604_v31  ;;  %6034 = vmatpush1.bf16.msra.mxu1 %v12607_v32  ;;  %v12640_v31 = vld [vmem:[#allocation2 + $0x13e0] ss:$16 sps:$4 sm:$0xff]   ;;  %v12643_v32 = vld [vmem:[#allocation2 + $0x13e8] ss:$16 sps:$4 sm:$0xff]  }
 0x293   : > { %5863 = vmatprep.subr.bf16.mxu0 %v12612_v35  ;;  %6035 = vmatprep.subr.bf16.mxu1 %v12615_v37  ;;  %v4494_v35 = vrot.slane %v13819_v33, 1  ;;  %v4495_v37 = vrot.slane %v13823_v38, 1 }
 0x296   : > { %5864 = vmatpush1.bf16.msra.mxu0 %v12610_v40  ;;  %6036 = vmatpush1.bf16.msra.mxu1 %v12613_v42  ;;  %v12648_v40 = vld [vmem:[#allocation2 + $0x1404] ss:$16 sps:$4 sm:$0xff]   ;;  %v12651_v42 = vld [vmem:[#allocation2 + $0x140c] ss:$16 sps:$4 sm:$0xff]  }
 0x297   : > { %5865 = vmatprep.subr.bf16.mxu0 %v12618_v51  ;;  %6037 = vmatprep.subr.bf16.mxu1 %v12621_v52  ;;  %v4503_v51 = vrot.slane %v13849_v20, 1  ;;  %v4504_v52 = vrot.slane %v13853_v21, 1 }
 0x29a   : > { %5866 = vmatpush1.bf16.msra.mxu0 %v12616_v41  ;;  %6038 = vmatpush1.bf16.msra.mxu1 %v12619_v45  ;;  %v12646_v41 = vld [vmem:[#allocation2 + $0x1400] ss:$16 sps:$4 sm:$0xff]   ;;  %v12649_v45 = vld [vmem:[#allocation2 + $0x1408] ss:$16 sps:$4 sm:$0xff]  }
 0x29b   : > { %5867 = vmatprep.subr.bf16.mxu0 %v12624_v59  ;;  %6039 = vmatprep.subr.bf16.mxu1 %v12627_v47  ;;  %v4496_v59 = vsel %vm4487_vm1, %v4494_v35, %v4495_v37  ;;  %v12654_v47 = vld [vmem:[#allocation2 + $0x1424] ss:$16 sps:$4 sm:$0xff]   ;;  %v12670_v35 = vld [vmem:[#allocation2 + $0x1480] ss:$16 sps:$4 sm:$0xff]   ;;  %v12673_v37 = vld [vmem:[#allocation2 + $0x1488] ss:$16 sps:$4 sm:$0xff]  }
 0x29e   : > { %5868 = vmatpush1.bf16.msra.mxu0 %v12622_v49  ;;  %6040 = vmatpush1.bf16.msra.mxu1 %v12625_v5  ;;  %v12657_v49 = vld [vmem:[#allocation2 + $0x142c] ss:$16 sps:$4 sm:$0xff]   ;;  %v4505_v5 = vsel %vm4487_vm1, %v4503_v51, %v4504_v52  ;;  %v12676_v51 = vld [vmem:[#allocation2 + $0x14a0] ss:$16 sps:$4 sm:$0xff]   ;;  %v12679_v52 = vld [vmem:[#allocation2 + $0x14a8] ss:$16 sps:$4 sm:$0xff]  }
 0x29f   : > { %5869 = vmatprep.subr.bf16.mxu0 %v12630_v6  ;;  %6041 = vmatprep.subr.bf16.mxu1 %v12633_v9  ;;  %v12652_v6 = vld [vmem:[#allocation2 + $0x1420] ss:$16 sps:$4 sm:$0xff]   ;;  %v12655_v9 = vld [vmem:[#allocation2 + $0x1428] ss:$16 sps:$4 sm:$0xff]  }
 0x2a2   : > { %5870 = vmatpush1.bf16.msra.mxu0 %v12628_v11  ;;  %6042 = vmatpush1.bf16.msra.mxu1 %v12631_v19  ;;  %v12660_v11 = vld [vmem:[#allocation2 + $0x1444] ss:$16 sps:$4 sm:$0xff]   ;;  %v12663_v19 = vld [vmem:[#allocation2 + $0x144c] ss:$16 sps:$4 sm:$0xff]  }
 0x2a3   : > { %5871 = vmatprep.subr.bf16.mxu0 %v12636_v22  ;;  %6043 = vmatprep.subr.bf16.mxu1 %v12639_v23  ;;  %v12658_v22 = vld [vmem:[#allocation2 + $0x1440] ss:$16 sps:$4 sm:$0xff]   ;;  %v12661_v23 = vld [vmem:[#allocation2 + $0x1448] ss:$16 sps:$4 sm:$0xff]  }
 0x2a6   : > { %5872 = vmatpush1.bf16.msra.mxu0 %v12634_v27  ;;  %6044 = vmatpush1.bf16.msra.mxu1 %v12637_v28  ;;  %v12666_v27 = vld [vmem:[#allocation2 + $0x1464] ss:$16 sps:$4 sm:$0xff]   ;;  %v12669_v28 = vld [vmem:[#allocation2 + $0x146c] ss:$16 sps:$4 sm:$0xff]  }
 0x2a7   : > { %5873 = vmatprep.subr.bf16.mxu0 %v12642_v29  ;;  %6045 = vmatprep.subr.bf16.mxu1 %v12645_v30  ;;  %v12664_v29 = vld [vmem:[#allocation2 + $0x1460] ss:$16 sps:$4 sm:$0xff]   ;;  %v12667_v30 = vld [vmem:[#allocation2 + $0x1468] ss:$16 sps:$4 sm:$0xff]  }
 0x2aa   : > { %5874 = vmatpush1.bf16.msra.mxu0 %v12640_v31  ;;  %6046 = vmatpush1.bf16.msra.mxu1 %v12643_v32  ;;  %v12672_v31 = vld [vmem:[#allocation2 + $0x1484] ss:$16 sps:$4 sm:$0xff]   ;;  %v12675_v32 = vld [vmem:[#allocation2 + $0x148c] ss:$16 sps:$4 sm:$0xff]  }
 0x2ab   : > { %5886 = vmatprep.subr.bf16.mxu0 %v12648_v40  ;;  %6058 = vmatprep.subr.bf16.mxu1 %v12651_v42  ;;  %v12678_v40 = vld [vmem:[#allocation2 + $0x14a4] ss:$16 sps:$4 sm:$0xff]   ;;  %v12681_v42 = vld [vmem:[#allocation2 + $0x14ac] ss:$16 sps:$4 sm:$0xff]  }
 0x2ad   : > { %5876 = vmatmul.mubr.bf16.vlgmr.msra.gmra.mrb[0].mxu0 %v4496_v59  ;;  %6048 = vmatmul.mubr.bf16.vlgmr.msra.gmra.mrb[0].mxu1 %v4496_v59  ;;  %v12682_v59 = vld [vmem:[#allocation2 + $0x14c0] ss:$16 sps:$4 sm:$0xff]  }
 0x2ae   : > { %5887 = vmatpush1.bf16.msra.mxu0 %v12646_v41  ;;  %6059 = vmatpush1.bf16.msra.mxu1 %v12649_v45  ;;  %v12684_v41 = vld [vmem:[#allocation2 + $0x14c4] ss:$16 sps:$4 sm:$0xff]   ;;  %v12687_v45 = vld [vmem:[#allocation2 + $0x14cc] ss:$16 sps:$4 sm:$0xff]  }
 0x2af   : > { %5888 = vmatprep.subr.bf16.mxu0 %v12654_v47  ;;  %6060 = vmatprep.subr.bf16.mxu1 %v12657_v49  ;;  %v12685_v47 = vld [vmem:[#allocation2 + $0x14c8] ss:$16 sps:$4 sm:$0xff]   ;;  %v12690_v49 = vld [vmem:[#allocation2 + $0x14e4] ss:$16 sps:$4 sm:$0xff]  }
 0x2b0   : > { %5918 = vmatprep.mubr.bf16.mxu0 %v4505_v5  ;;  %6090 = vmatprep.mubr.bf16.mxu1 %v4505_v5  ;;  %v12693_v5 = vld [vmem:[#allocation2 + $0x14ec] ss:$16 sps:$4 sm:$0xff]  }
 0x2b2   : > { %5889 = vmatpush1.bf16.msra.mxu0 %v12652_v6  ;;  %6061 = vmatpush1.bf16.msra.mxu1 %v12655_v9  ;;  %v12688_v6 = vld [vmem:[#allocation2 + $0x14e0] ss:$16 sps:$4 sm:$0xff]   ;;  %v12691_v9 = vld [vmem:[#allocation2 + $0x14e8] ss:$16 sps:$4 sm:$0xff]  }
 0x2b3   : > { %5890 = vmatprep.subr.bf16.mxu0 %v12660_v11  ;;  %6062 = vmatprep.subr.bf16.mxu1 %v12663_v19  ;;  %v12696_v11 = vld [vmem:[#allocation2 + $0x1504] ss:$16 sps:$4 sm:$0xff]   ;;  %v12699_v19 = vld [vmem:[#allocation2 + $0x150c] ss:$16 sps:$4 sm:$0xff]  }
 0x2b6   : > { %5891 = vmatpush1.bf16.msra.mxu0 %v12658_v22  ;;  %6063 = vmatpush1.bf16.msra.mxu1 %v12661_v23  ;;  %v12694_v22 = vld [vmem:[#allocation2 + $0x1500] ss:$16 sps:$4 sm:$0xff]   ;;  %v12697_v23 = vld [vmem:[#allocation2 + $0x1508] ss:$16 sps:$4 sm:$0xff]  }
 0x2b7   : > { %5892 = vmatprep.subr.bf16.mxu0 %v12666_v27  ;;  %6064 = vmatprep.subr.bf16.mxu1 %v12669_v28  ;;  %v12702_v27 = vld [vmem:[#allocation2 + $0x1524] ss:$16 sps:$4 sm:$0xff]   ;;  %v12705_v28 = vld [vmem:[#allocation2 + $0x152c] ss:$16 sps:$4 sm:$0xff]  }
 0x2ba   : > { %5893 = vmatpush1.bf16.msra.mxu0 %v12664_v29  ;;  %6065 = vmatpush1.bf16.msra.mxu1 %v12667_v30  ;;  %v12700_v29 = vld [vmem:[#allocation2 + $0x1520] ss:$16 sps:$4 sm:$0xff]   ;;  %v12703_v30 = vld [vmem:[#allocation2 + $0x1528] ss:$16 sps:$4 sm:$0xff]  }
 0x2bb   : > { %5894 = vmatprep.subr.bf16.mxu0 %v12672_v31  ;;  %6066 = vmatprep.subr.bf16.mxu1 %v12675_v32  ;;  %v12708_v31 = vld [vmem:[#allocation2 + $0x1544] ss:$16 sps:$4 sm:$0xff]   ;;  %v12711_v32 = vld [vmem:[#allocation2 + $0x154c] ss:$16 sps:$4 sm:$0xff]  }
 0x2be   : > { %5895 = vmatpush1.bf16.msra.mxu0 %v12670_v35  ;;  %6067 = vmatpush1.bf16.msra.mxu1 %v12673_v37  ;;  %v12706_v35 = vld [vmem:[#allocation2 + $0x1540] ss:$16 sps:$4 sm:$0xff]   ;;  %v12709_v37 = vld [vmem:[#allocation2 + $0x1548] ss:$16 sps:$4 sm:$0xff]  }
 0x2bf   : > { %5896 = vmatprep.subr.bf16.mxu0 %v12678_v40  ;;  %6068 = vmatprep.subr.bf16.mxu1 %v12681_v42  ;;  %v12714_v40 = vld [vmem:[#allocation2 + $0x1564] ss:$16 sps:$4 sm:$0xff]   ;;  %v12717_v42 = vld [vmem:[#allocation2 + $0x156c] ss:$16 sps:$4 sm:$0xff]  }
 0x2c2   : > { %5897 = vmatpush1.bf16.msra.mxu0 %v12676_v51  ;;  %6069 = vmatpush1.bf16.msra.mxu1 %v12679_v52  ;;  %v12712_v51 = vld [vmem:[#allocation2 + $0x1560] ss:$16 sps:$4 sm:$0xff]   ;;  %v12715_v52 = vld [vmem:[#allocation2 + $0x1568] ss:$16 sps:$4 sm:$0xff]  }
 0x2c3   : > { %5898 = vmatprep.subr.bf16.mxu0 %v12684_v41  ;;  %6070 = vmatprep.subr.bf16.mxu1 %v12687_v45  ;;  %v12720_v41 = vld [vmem:[#allocation2 + $0x1584] ss:$16 sps:$4 sm:$0xff]   ;;  %v12723_v45 = vld [vmem:[#allocation2 + $0x158c] ss:$16 sps:$4 sm:$0xff]  }
 0x2c6   : > { %5899 = vmatpush1.bf16.msra.mxu0 %v12682_v59  ;;  %6071 = vmatpush1.bf16.msra.mxu1 %v12685_v47  ;;  %v12718_v59 = vld [vmem:[#allocation2 + $0x1580] ss:$16 sps:$4 sm:$0xff]   ;;  %v12721_v47 = vld [vmem:[#allocation2 + $0x1588] ss:$16 sps:$4 sm:$0xff]  }
 0x2c7   : > { %5900 = vmatprep.subr.bf16.mxu0 %v12690_v49  ;;  %6072 = vmatprep.subr.bf16.mxu1 %v12693_v5  ;;  %v12726_v49 = vld [vmem:[#allocation2 + $0x15a4] ss:$16 sps:$4 sm:$0xff]   ;;  %v12729_v5 = vld [vmem:[#allocation2 + $0x15ac] ss:$16 sps:$4 sm:$0xff]  }
 0x2ca   : > { %5901 = vmatpush1.bf16.msra.mxu0 %v12688_v6  ;;  %6073 = vmatpush1.bf16.msra.mxu1 %v12691_v9  ;;  %v12724_v6 = vld [vmem:[#allocation2 + $0x15a0] ss:$16 sps:$4 sm:$0xff]   ;;  %v12727_v9 = vld [vmem:[#allocation2 + $0x15a8] ss:$16 sps:$4 sm:$0xff]  }
 0x2cb   : > { %5902 = vmatprep.subr.bf16.mxu0 %v12696_v11  ;;  %6074 = vmatprep.subr.bf16.mxu1 %v12699_v19  ;;  %v12732_v11 = vld [vmem:[#allocation2 + $0x15c4] ss:$16 sps:$4 sm:$0xff]   ;;  %v12735_v19 = vld [vmem:[#allocation2 + $0x15cc] ss:$16 sps:$4 sm:$0xff]  }
 0x2ce   : > { %5903 = vmatpush1.bf16.msra.mxu0 %v12694_v22  ;;  %6075 = vmatpush1.bf16.msra.mxu1 %v12697_v23  ;;  %v12730_v22 = vld [vmem:[#allocation2 + $0x15c0] ss:$16 sps:$4 sm:$0xff]   ;;  %v12733_v23 = vld [vmem:[#allocation2 + $0x15c8] ss:$16 sps:$4 sm:$0xff]  }
 0x2cf   : > { %5904 = vmatprep.subr.bf16.mxu0 %v12702_v27  ;;  %6076 = vmatprep.subr.bf16.mxu1 %v12705_v28  ;;  %v12738_v27 = vld [vmem:[#allocation2 + $0x15e4] ss:$16 sps:$4 sm:$0xff]   ;;  %v12741_v28 = vld [vmem:[#allocation2 + $0x15ec] ss:$16 sps:$4 sm:$0xff]  }
 0x2d2   : > { %5905 = vmatpush1.bf16.msra.mxu0 %v12700_v29  ;;  %6077 = vmatpush1.bf16.msra.mxu1 %v12703_v30  ;;  %v12736_v29 = vld [vmem:[#allocation2 + $0x15e0] ss:$16 sps:$4 sm:$0xff]   ;;  %v12739_v30 = vld [vmem:[#allocation2 + $0x15e8] ss:$16 sps:$4 sm:$0xff]  }
 0x2d3   : > { %5906 = vmatprep.subr.bf16.mxu0 %v12708_v31  ;;  %6078 = vmatprep.subr.bf16.mxu1 %v12711_v32  ;;  %v4500_v31 = vrot.slane %v13867_v36, 1  ;;  %v4501_v32 = vrot.slane %v13884_v14, 1 }
 0x2d6   : > { %5907 = vmatpush1.bf16.msra.mxu0 %v12706_v35  ;;  %6079 = vmatpush1.bf16.msra.mxu1 %v12709_v37  ;;  %v12744_v35 = vld [vmem:[#allocation2 + $0x1604] ss:$16 sps:$4 sm:$0xff]   ;;  %v12747_v37 = vld [vmem:[#allocation2 + $0x160c] ss:$16 sps:$4 sm:$0xff]  }
 0x2d7   : > { %5908 = vmatprep.subr.bf16.mxu0 %v12714_v40  ;;  %6080 = vmatprep.subr.bf16.mxu1 %v12717_v42  ;;  %v4509_v40 = vrot.slane %v13880_v48, 1  ;;  %v4510_v42 = vrot.slane %v13892_v60, 1 }
 0x2da   : > { %5909 = vmatpush1.bf16.msra.mxu0 %v12712_v51  ;;  %6081 = vmatpush1.bf16.msra.mxu1 %v12715_v52  ;;  %v12742_v51 = vld [vmem:[#allocation2 + $0x1600] ss:$16 sps:$4 sm:$0xff]   ;;  %v12745_v52 = vld [vmem:[#allocation2 + $0x1608] ss:$16 sps:$4 sm:$0xff]  }
 0x2db   : > { %5910 = vmatprep.subr.bf16.mxu0 %v12720_v41  ;;  %6082 = vmatprep.subr.bf16.mxu1 %v12723_v45  ;;  %v4502_v41 = vsel %vm4487_vm1, %v4500_v31, %v4501_v32  ;;  %v12750_v45 = vld [vmem:[#allocation2 + $0x1624] ss:$16 sps:$4 sm:$0xff]   ;;  %v12766_v31 = vld [vmem:[#allocation2 + $0x1680] ss:$16 sps:$4 sm:$0xff]   ;;  %v12769_v32 = vld [vmem:[#allocation2 + $0x1688] ss:$16 sps:$4 sm:$0xff]  }
 0x2de   : > { %5911 = vmatpush1.bf16.msra.mxu0 %v12718_v59  ;;  %6083 = vmatpush1.bf16.msra.mxu1 %v12721_v47  ;;  %v12753_v59 = vld [vmem:[#allocation2 + $0x162c] ss:$16 sps:$4 sm:$0xff]   ;;  %v4511_v47 = vsel %vm4487_vm1, %v4509_v40, %v4510_v42  ;;  %v12772_v40 = vld [vmem:[#allocation2 + $0x16a0] ss:$16 sps:$4 sm:$0xff]   ;;  %v12775_v42 = vld [vmem:[#allocation2 + $0x16a8] ss:$16 sps:$4 sm:$0xff]  }
 0x2df   : > { %5912 = vmatprep.subr.bf16.mxu0 %v12726_v49  ;;  %6084 = vmatprep.subr.bf16.mxu1 %v12729_v5  ;;  %v12748_v49 = vld [vmem:[#allocation2 + $0x1620] ss:$16 sps:$4 sm:$0xff]   ;;  %v12751_v5 = vld [vmem:[#allocation2 + $0x1628] ss:$16 sps:$4 sm:$0xff]  }
 0x2e2   : > { %5913 = vmatpush1.bf16.msra.mxu0 %v12724_v6  ;;  %6085 = vmatpush1.bf16.msra.mxu1 %v12727_v9  ;;  %v12756_v6 = vld [vmem:[#allocation2 + $0x1644] ss:$16 sps:$4 sm:$0xff]   ;;  %v12759_v9 = vld [vmem:[#allocation2 + $0x164c] ss:$16 sps:$4 sm:$0xff]  }
 0x2e3   : > { %5914 = vmatprep.subr.bf16.mxu0 %v12732_v11  ;;  %6086 = vmatprep.subr.bf16.mxu1 %v12735_v19  ;;  %v12754_v11 = vld [vmem:[#allocation2 + $0x1640] ss:$16 sps:$4 sm:$0xff]   ;;  %v12757_v19 = vld [vmem:[#allocation2 + $0x1648] ss:$16 sps:$4 sm:$0xff]  }
 0x2e6   : > { %5915 = vmatpush1.bf16.msra.mxu0 %v12730_v22  ;;  %6087 = vmatpush1.bf16.msra.mxu1 %v12733_v23  ;;  %v12762_v22 = vld [vmem:[#allocation2 + $0x1664] ss:$16 sps:$4 sm:$0xff]   ;;  %v12765_v23 = vld [vmem:[#allocation2 + $0x166c] ss:$16 sps:$4 sm:$0xff]  }
 0x2e7   : > { %5916 = vmatprep.subr.bf16.mxu0 %v12738_v27  ;;  %6088 = vmatprep.subr.bf16.mxu1 %v12741_v28  ;;  %v12760_v27 = vld [vmem:[#allocation2 + $0x1660] ss:$16 sps:$4 sm:$0xff]   ;;  %v12763_v28 = vld [vmem:[#allocation2 + $0x1668] ss:$16 sps:$4 sm:$0xff]  }
 0x2ea   : > { %5917 = vmatpush1.bf16.msra.mxu0 %v12736_v29  ;;  %6089 = vmatpush1.bf16.msra.mxu1 %v12739_v30  ;;  %v12768_v29 = vld [vmem:[#allocation2 + $0x1684] ss:$16 sps:$4 sm:$0xff]   ;;  %v12771_v30 = vld [vmem:[#allocation2 + $0x168c] ss:$16 sps:$4 sm:$0xff]  }
 0x2eb   : > { %5929 = vmatprep.subr.bf16.mxu0 %v12744_v35  ;;  %6101 = vmatprep.subr.bf16.mxu1 %v12747_v37  ;;  %v12774_v35 = vld [vmem:[#allocation2 + $0x16a4] ss:$16 sps:$4 sm:$0xff]   ;;  %v12777_v37 = vld [vmem:[#allocation2 + $0x16ac] ss:$16 sps:$4 sm:$0xff]  }
 0x2ed   : > { %5919 = vmatmul.mubr.bf16.vlgmr.msra.gmra.mrb[0].mxu0 %v4502_v41  ;;  %6091 = vmatmul.mubr.bf16.vlgmr.msra.gmra.mrb[0].mxu1 %v4502_v41  ;;  %v12778_v41 = vld [vmem:[#allocation2 + $0x16c0] ss:$16 sps:$4 sm:$0xff]  }
 0x2ee   : > { %5930 = vmatpush1.bf16.msra.mxu0 %v12742_v51  ;;  %6102 = vmatpush1.bf16.msra.mxu1 %v12745_v52  ;;  %v12780_v51 = vld [vmem:[#allocation2 + $0x16c4] ss:$16 sps:$4 sm:$0xff]   ;;  %v12783_v52 = vld [vmem:[#allocation2 + $0x16cc] ss:$16 sps:$4 sm:$0xff]  }
 0x2ef   : > { %5931 = vmatprep.subr.bf16.mxu0 %v12750_v45  ;;  %6103 = vmatprep.subr.bf16.mxu1 %v12753_v59  ;;  %v12781_v45 = vld [vmem:[#allocation2 + $0x16c8] ss:$16 sps:$4 sm:$0xff]   ;;  %v12786_v59 = vld [vmem:[#allocation2 + $0x16e4] ss:$16 sps:$4 sm:$0xff]  }
 0x2f0   : > { %5961 = vmatprep.mubr.bf16.mxu0 %v4511_v47  ;;  %6133 = vmatprep.mubr.bf16.mxu1 %v4511_v47  ;;  %v12789_v47 = vld [vmem:[#allocation2 + $0x16ec] ss:$16 sps:$4 sm:$0xff]  }
 0x2f2   : > { %5932 = vmatpush1.bf16.msra.mxu0 %v12748_v49  ;;  %6104 = vmatpush1.bf16.msra.mxu1 %v12751_v5  ;;  %v12784_v49 = vld [vmem:[#allocation2 + $0x16e0] ss:$16 sps:$4 sm:$0xff]   ;;  %v12787_v5 = vld [vmem:[#allocation2 + $0x16e8] ss:$16 sps:$4 sm:$0xff]  }
 0x2f3   : > { %5933 = vmatprep.subr.bf16.mxu0 %v12756_v6  ;;  %6105 = vmatprep.subr.bf16.mxu1 %v12759_v9  ;;  %v12792_v6 = vld [vmem:[#allocation2 + $0x1704] ss:$16 sps:$4 sm:$0xff]   ;;  %v12795_v9 = vld [vmem:[#allocation2 + $0x170c] ss:$16 sps:$4 sm:$0xff]  }
 0x2f6   : > { %5934 = vmatpush1.bf16.msra.mxu0 %v12754_v11  ;;  %6106 = vmatpush1.bf16.msra.mxu1 %v12757_v19  ;;  %v12790_v11 = vld [vmem:[#allocation2 + $0x1700] ss:$16 sps:$4 sm:$0xff]   ;;  %v12793_v19 = vld [vmem:[#allocation2 + $0x1708] ss:$16 sps:$4 sm:$0xff]  }
 0x2f7   : > { %5935 = vmatprep.subr.bf16.mxu0 %v12762_v22  ;;  %6107 = vmatprep.subr.bf16.mxu1 %v12765_v23  ;;  %v12798_v22 = vld [vmem:[#allocation2 + $0x1724] ss:$16 sps:$4 sm:$0xff]   ;;  %v12801_v23 = vld [vmem:[#allocation2 + $0x172c] ss:$16 sps:$4 sm:$0xff]  }
 0x2fa   : > { %5936 = vmatpush1.bf16.msra.mxu0 %v12760_v27  ;;  %6108 = vmatpush1.bf16.msra.mxu1 %v12763_v28  ;;  %v12796_v27 = vld [vmem:[#allocation2 + $0x1720] ss:$16 sps:$4 sm:$0xff]   ;;  %v12799_v28 = vld [vmem:[#allocation2 + $0x1728] ss:$16 sps:$4 sm:$0xff]  }
 0x2fb   : > { %5937 = vmatprep.subr.bf16.mxu0 %v12768_v29  ;;  %6109 = vmatprep.subr.bf16.mxu1 %v12771_v30  ;;  %v12804_v29 = vld [vmem:[#allocation2 + $0x1744] ss:$16 sps:$4 sm:$0xff]   ;;  %v12807_v30 = vld [vmem:[#allocation2 + $0x174c] ss:$16 sps:$4 sm:$0xff]  }
 0x2fe   : > { %5938 = vmatpush1.bf16.msra.mxu0 %v12766_v31  ;;  %6110 = vmatpush1.bf16.msra.mxu1 %v12769_v32  ;;  %v12802_v31 = vld [vmem:[#allocation2 + $0x1740] ss:$16 sps:$4 sm:$0xff]   ;;  %v12805_v32 = vld [vmem:[#allocation2 + $0x1748] ss:$16 sps:$4 sm:$0xff]  }
 0x2ff   : > { %5939 = vmatprep.subr.bf16.mxu0 %v12774_v35  ;;  %6111 = vmatprep.subr.bf16.mxu1 %v12777_v37  ;;  %v12810_v35 = vld [vmem:[#allocation2 + $0x1764] ss:$16 sps:$4 sm:$0xff]   ;;  %v12813_v37 = vld [vmem:[#allocation2 + $0x176c] ss:$16 sps:$4 sm:$0xff]  }
 0x302   : > { %5940 = vmatpush1.bf16.msra.mxu0 %v12772_v40  ;;  %6112 = vmatpush1.bf16.msra.mxu1 %v12775_v42  ;;  %v12808_v40 = vld [vmem:[#allocation2 + $0x1760] ss:$16 sps:$4 sm:$0xff]   ;;  %v12811_v42 = vld [vmem:[#allocation2 + $0x1768] ss:$16 sps:$4 sm:$0xff]  }
 0x303   : > { %5941 = vmatprep.subr.bf16.mxu0 %v12780_v51  ;;  %6113 = vmatprep.subr.bf16.mxu1 %v12783_v52  ;;  %v12816_v51 = vld [vmem:[#allocation2 + $0x1784] ss:$16 sps:$4 sm:$0xff]   ;;  %v12819_v52 = vld [vmem:[#allocation2 + $0x178c] ss:$16 sps:$4 sm:$0xff]  }
 0x306   : > { %5942 = vmatpush1.bf16.msra.mxu0 %v12778_v41  ;;  %6114 = vmatpush1.bf16.msra.mxu1 %v12781_v45  ;;  %v12814_v41 = vld [vmem:[#allocation2 + $0x1780] ss:$16 sps:$4 sm:$0xff]   ;;  %v12817_v45 = vld [vmem:[#allocation2 + $0x1788] ss:$16 sps:$4 sm:$0xff]  }
 0x307   : > { %5943 = vmatprep.subr.bf16.mxu0 %v12786_v59  ;;  %6115 = vmatprep.subr.bf16.mxu1 %v12789_v47  ;;  %v12822_v59 = vld [vmem:[#allocation2 + $0x17a4] ss:$16 sps:$4 sm:$0xff]   ;;  %v12825_v47 = vld [vmem:[#allocation2 + $0x17ac] ss:$16 sps:$4 sm:$0xff]  }
 0x30a   : > { %5944 = vmatpush1.bf16.msra.mxu0 %v12784_v49  ;;  %6116 = vmatpush1.bf16.msra.mxu1 %v12787_v5  ;;  %v12820_v49 = vld [vmem:[#allocation2 + $0x17a0] ss:$16 sps:$4 sm:$0xff]   ;;  %v12823_v5 = vld [vmem:[#allocation2 + $0x17a8] ss:$16 sps:$4 sm:$0xff]  }
 0x30b   : > { %5945 = vmatprep.subr.bf16.mxu0 %v12792_v6  ;;  %6117 = vmatprep.subr.bf16.mxu1 %v12795_v9  ;;  %v12828_v6 = vld [vmem:[#allocation2 + $0x17c4] ss:$16 sps:$4 sm:$0xff]   ;;  %v12831_v9 = vld [vmem:[#allocation2 + $0x17cc] ss:$16 sps:$4 sm:$0xff]  }
 0x30e   : > { %5946 = vmatpush1.bf16.msra.mxu0 %v12790_v11  ;;  %6118 = vmatpush1.bf16.msra.mxu1 %v12793_v19  ;;  %v6422_v11 = vshrl.u32 %v13765_v54, 16  ;;  %v12826_v19 = vld [vmem:[#allocation2 + $0x17c0] ss:$16 sps:$4 sm:$0xff]  }
 0x30f   : > { %5947 = vmatprep.subr.bf16.mxu0 %v12798_v22  ;;  %6119 = vmatprep.subr.bf16.mxu1 %v12801_v23  ;;  %v12829_v22 = vld [vmem:[#allocation2 + $0x17c8] ss:$16 sps:$4 sm:$0xff]   ;;  %v12834_v23 = vld [vmem:[#allocation2 + $0x17e4] ss:$16 sps:$4 sm:$0xff]  }
 0x312   : > { %5948 = vmatpush1.bf16.msra.mxu0 %v12796_v27  ;;  %6120 = vmatpush1.bf16.msra.mxu1 %v12799_v28  ;;  %v12837_v27 = vld [vmem:[#allocation2 + $0x17ec] ss:$16 sps:$4 sm:$0xff]   ;;  %v6419_v28 = vrot.slane %v891_v56, 1 }
 0x313   : > { %5949 = vmatprep.subr.bf16.mxu0 %v12804_v29  ;;  %6121 = vmatprep.subr.bf16.mxu1 %v12807_v30  ;;  %v6420_v29 = vrot.slane %v893_v57, 2  ;;  %v6424_v30 = vrot.slane %v6422_v11, 1  ;;  %v12838_v57 = vld [vmem:[#allocation2 + $0x1800] ss:$16 sps:$4 sm:$0xff]  }
 0x314   : > { %v12850_v11 = vld [vmem:[#allocation2 + $0x1840] ss:$16 sps:$4 sm:$0xff]  }
 0x315   : > { %v6421_v56 = vor.u32 %v6420_v29, %v6419_v28  ;;  %v12859_v28 = vld [vmem:[#allocation2 + $0x1868] ss:$16 sps:$4 sm:$0xff]   ;;  %v12864_v29 = vld [vmem:[#allocation2 + $0x1884] ss:$16 sps:$4 sm:$0xff]  }
 0x316   : > { %5950 = vmatpush1.bf16.msra.mxu0 %v12802_v31  ;;  %6122 = vmatpush1.bf16.msra.mxu1 %v12805_v32  ;;  %v6425_v31 = vrot.slane %v898_v58, 2  ;;  %v12832_v32 = vld [vmem:[#allocation2 + $0x17e0] ss:$16 sps:$4 sm:$0xff]  }
 0x317   : > { %5951 = vmatprep.subr.bf16.mxu0 %v12810_v35  ;;  %6123 = vmatprep.subr.bf16.mxu1 %v12813_v37  ;;  %v12835_v35 = vld [vmem:[#allocation2 + $0x17e8] ss:$16 sps:$4 sm:$0xff]   ;;  %v4506_v37 = vrot.slane %v13915_v34, 1 }
 0x31a   : > { %5952 = vmatpush1.bf16.msra.mxu0 %v12808_v40  ;;  %6124 = vmatpush1.bf16.msra.mxu1 %v12811_v42  ;;  %v4507_v40 = vrot.slane %v13919_v43, 1  ;;  %v12840_v42 = vld [vmem:[#allocation2 + $0x1804] ss:$16 sps:$4 sm:$0xff]  }
 0x31b   : > { %5953 = vmatprep.subr.bf16.mxu0 %v12816_v51  ;;  %6125 = vmatprep.subr.bf16.mxu1 %v12819_v52  ;;  %v12843_v51 = vld [vmem:[#allocation2 + $0x180c] ss:$16 sps:$4 sm:$0xff]   ;;  %v6426_v52 = vor.u32 %v6425_v31, %v6424_v30  ;;  %v12862_v31 = vld [vmem:[#allocation2 + $0x1880] ss:$16 sps:$4 sm:$0xff]  }
 0x31c   : > { %v4508_v58 = vsel %vm4487_vm1, %v4506_v37, %v4507_v40  ;;  %v12867_v30 = vld [vmem:[#allocation2 + $0x188c] ss:$16 sps:$4 sm:$0xff]   ;;  %v12868_v40 = vld [vmem:[#allocation2 + $0x18a0] ss:$16 sps:$4 sm:$0xff]  }
 0x31d   : > { %v12873_v37 = vld [vmem:[#allocation2 + $0x18ac] ss:$16 sps:$4 sm:$0xff]  }
 0x31e   : > { %5954 = vmatpush1.bf16.msra.mxu0 %v12814_v41  ;;  %6126 = vmatpush1.bf16.msra.mxu1 %v12817_v45  ;;  %v12841_v41 = vld [vmem:[#allocation2 + $0x1808] ss:$16 sps:$4 sm:$0xff]   ;;  %v12846_v45 = vld [vmem:[#allocation2 + $0x1824] ss:$16 sps:$4 sm:$0xff]  }
 0x31f   : > { %5955 = vmatprep.subr.bf16.mxu0 %v12822_v59  ;;  %6127 = vmatprep.subr.bf16.mxu1 %v12825_v47  ;;  %v12849_v59 = vld [vmem:[#allocation2 + $0x182c] ss:$16 sps:$4 sm:$0xff]   ;;  %v6427_v47 = vsel %vm6409_vm2, %v6421_v56, %v6426_v52  ;;  %v12874_v52 = vld [vmem:[#allocation2 + $0x18c0] ss:$16 sps:$4 sm:$0xff]  }
 0x320   : > { %v12879_v56 = vld [vmem:[#allocation2 + $0x18cc] ss:$16 sps:$4 sm:$0xff]  }
 0x322   : > { %5956 = vmatpush1.bf16.msra.mxu0 %v12820_v49  ;;  %6128 = vmatpush1.bf16.msra.mxu1 %v12823_v5  ;;  %v12844_v49 = vld [vmem:[#allocation2 + $0x1820] ss:$16 sps:$4 sm:$0xff]   ;;  %v12847_v5 = vld [vmem:[#allocation2 + $0x1828] ss:$16 sps:$4 sm:$0xff]  }
 0x323   : > { %5957 = vmatprep.subr.bf16.mxu0 %v12828_v6  ;;  %6129 = vmatprep.subr.bf16.mxu1 %v12831_v9  ;;  %v12852_v6 = vld [vmem:[#allocation2 + $0x1844] ss:$16 sps:$4 sm:$0xff]   ;;  %v12855_v9 = vld [vmem:[#allocation2 + $0x184c] ss:$16 sps:$4 sm:$0xff]  }
 0x326   : > { %5958 = vmatpush1.bf16.msra.mxu0 %v12826_v19  ;;  %6130 = vmatpush1.bf16.msra.mxu1 %v12829_v22  ;;  %v12853_v19 = vld [vmem:[#allocation2 + $0x1848] ss:$16 sps:$4 sm:$0xff]   ;;  %v12858_v22 = vld [vmem:[#allocation2 + $0x1864] ss:$16 sps:$4 sm:$0xff]  }
 0x327   : > { %5959 = vmatprep.subr.bf16.mxu0 %v12834_v23  ;;  %6131 = vmatprep.subr.bf16.mxu1 %v12837_v27  ;;  %v12861_v23 = vld [vmem:[#allocation2 + $0x186c] ss:$16 sps:$4 sm:$0xff]   ;;  %v12856_v27 = vld [vmem:[#allocation2 + $0x1860] ss:$16 sps:$4 sm:$0xff]  }
 0x32a   : > { %5960 = vmatpush1.bf16.msra.mxu0 %v12832_v32  ;;  %6132 = vmatpush1.bf16.msra.mxu1 %v12835_v35  ;;  %v12865_v32 = vld [vmem:[#allocation2 + $0x1888] ss:$16 sps:$4 sm:$0xff]   ;;  %v12870_v35 = vld [vmem:[#allocation2 + $0x18a4] ss:$16 sps:$4 sm:$0xff]  }
 0x32b   : > { %7770 = vmatprep.subr.bf16.mxu0 %v12840_v42  ;;  %7942 = vmatprep.subr.bf16.mxu1 %v12843_v51  ;;  %v12871_v42 = vld [vmem:[#allocation2 + $0x18a8] ss:$16 sps:$4 sm:$0xff]   ;;  %v12876_v51 = vld [vmem:[#allocation2 + $0x18c4] ss:$16 sps:$4 sm:$0xff]  }
 0x32d   : > { %5962 = vmatmul.mubr.bf16.vlgmr.msra.gmra.mrb[0].mxu0 %v4508_v58  ;;  %6134 = vmatmul.mubr.bf16.vlgmr.msra.gmra.mrb[0].mxu1 %v4508_v58  ;;  %v12885_v58 = vld [vmem:[#allocation2 + $0x18ec] ss:$16 sps:$4 sm:$0xff]  }
 0x32e   : > { %7771 = vmatpush1.bf16.msra.mxu0 %v12838_v57  ;;  %7943 = vmatpush1.bf16.msra.mxu1 %v12841_v41  ;;  %v12877_v57 = vld [vmem:[#allocation2 + $0x18c8] ss:$16 sps:$4 sm:$0xff]   ;;  %v12882_v41 = vld [vmem:[#allocation2 + $0x18e4] ss:$16 sps:$4 sm:$0xff]  }
 0x32f   : > { %7772 = vmatprep.subr.bf16.mxu0 %v12846_v45  ;;  %7944 = vmatprep.subr.bf16.mxu1 %v12849_v59  ;;  %v12880_v45 = vld [vmem:[#allocation2 + $0x18e0] ss:$16 sps:$4 sm:$0xff]   ;;  %v12883_v59 = vld [vmem:[#allocation2 + $0x18e8] ss:$16 sps:$4 sm:$0xff]  }
 0x330   : > { %7802 = vmatprep.mubr.bf16.mxu0 %v6427_v47  ;;  %7974 = vmatprep.mubr.bf16.mxu1 %v6427_v47  ;;  %v12888_v47 = vld [vmem:[#allocation2 + $0x1904] ss:$16 sps:$4 sm:$0xff]  }
 0x332   : > { %7773 = vmatpush1.bf16.msra.mxu0 %v12844_v49  ;;  %7945 = vmatpush1.bf16.msra.mxu1 %v12847_v5  ;;  %v12891_v49 = vld [vmem:[#allocation2 + $0x190c] ss:$16 sps:$4 sm:$0xff]   ;;  %v12886_v5 = vld [vmem:[#allocation2 + $0x1900] ss:$16 sps:$4 sm:$0xff]  }
 0x333   : > { %7774 = vmatprep.subr.bf16.mxu0 %v12852_v6  ;;  %7946 = vmatprep.subr.bf16.mxu1 %v12855_v9  ;;  %v12889_v6 = vld [vmem:[#allocation2 + $0x1908] ss:$16 sps:$4 sm:$0xff]   ;;  %v12894_v9 = vld [vmem:[#allocation2 + $0x1924] ss:$16 sps:$4 sm:$0xff]  }
 0x336   : > { %7775 = vmatpush1.bf16.msra.mxu0 %v12850_v11  ;;  %7947 = vmatpush1.bf16.msra.mxu1 %v12853_v19  ;;  %v12897_v11 = vld [vmem:[#allocation2 + $0x192c] ss:$16 sps:$4 sm:$0xff]   ;;  %v12892_v19 = vld [vmem:[#allocation2 + $0x1920] ss:$16 sps:$4 sm:$0xff]  }
 0x337   : > { %7776 = vmatprep.subr.bf16.mxu0 %v12858_v22  ;;  %7948 = vmatprep.subr.bf16.mxu1 %v12861_v23  ;;  %v12895_v22 = vld [vmem:[#allocation2 + $0x1928] ss:$16 sps:$4 sm:$0xff]   ;;  %v12900_v23 = vld [vmem:[#allocation2 + $0x1944] ss:$16 sps:$4 sm:$0xff]  }
 0x33a   : > { %7777 = vmatpush1.bf16.msra.mxu0 %v12856_v27  ;;  %7949 = vmatpush1.bf16.msra.mxu1 %v12859_v28  ;;  %v12903_v27 = vld [vmem:[#allocation2 + $0x194c] ss:$16 sps:$4 sm:$0xff]   ;;  %v12898_v28 = vld [vmem:[#allocation2 + $0x1940] ss:$16 sps:$4 sm:$0xff]  }
 0x33b   : > { %7778 = vmatprep.subr.bf16.mxu0 %v12864_v29  ;;  %7950 = vmatprep.subr.bf16.mxu1 %v12867_v30  ;;  %v12901_v29 = vld [vmem:[#allocation2 + $0x1948] ss:$16 sps:$4 sm:$0xff]   ;;  %v12906_v30 = vld [vmem:[#allocation2 + $0x1964] ss:$16 sps:$4 sm:$0xff]  }
 0x33e   : > { %7779 = vmatpush1.bf16.msra.mxu0 %v12862_v31  ;;  %7951 = vmatpush1.bf16.msra.mxu1 %v12865_v32  ;;  %v12909_v31 = vld [vmem:[#allocation2 + $0x196c] ss:$16 sps:$4 sm:$0xff]   ;;  %v12904_v32 = vld [vmem:[#allocation2 + $0x1960] ss:$16 sps:$4 sm:$0xff]  }
 0x33f   : > { %7780 = vmatprep.subr.bf16.mxu0 %v12870_v35  ;;  %7952 = vmatprep.subr.bf16.mxu1 %v12873_v37  ;;  %v12907_v35 = vld [vmem:[#allocation2 + $0x1968] ss:$16 sps:$4 sm:$0xff]   ;;  %v12912_v37 = vld [vmem:[#allocation2 + $0x1984] ss:$16 sps:$4 sm:$0xff]  }
 0x342   : > { %7781 = vmatpush1.bf16.msra.mxu0 %v12868_v40  ;;  %7953 = vmatpush1.bf16.msra.mxu1 %v12871_v42  ;;  %v12915_v40 = vld [vmem:[#allocation2 + $0x198c] ss:$16 sps:$4 sm:$0xff]   ;;  %v12910_v42 = vld [vmem:[#allocation2 + $0x1980] ss:$16 sps:$4 sm:$0xff]  }
 0x343   : > { %7782 = vmatprep.subr.bf16.mxu0 %v12876_v51  ;;  %7954 = vmatprep.subr.bf16.mxu1 %v12879_v56  ;;  %v12913_v51 = vld [vmem:[#allocation2 + $0x1988] ss:$16 sps:$4 sm:$0xff]   ;;  %v12918_v56 = vld [vmem:[#allocation2 + $0x19a4] ss:$16 sps:$4 sm:$0xff]  }
 0x346   : > { %7783 = vmatpush1.bf16.msra.mxu0 %v12874_v52  ;;  %7955 = vmatpush1.bf16.msra.mxu1 %v12877_v57  ;;  %v12921_v52 = vld [vmem:[#allocation2 + $0x19ac] ss:$16 sps:$4 sm:$0xff]   ;;  %v12916_v57 = vld [vmem:[#allocation2 + $0x19a0] ss:$16 sps:$4 sm:$0xff]  }
 0x347   : > { %7784 = vmatprep.subr.bf16.mxu0 %v12882_v41  ;;  %7956 = vmatprep.subr.bf16.mxu1 %v12885_v58  ;;  %v12919_v41 = vld [vmem:[#allocation2 + $0x19a8] ss:$16 sps:$4 sm:$0xff]   ;;  %v6413_v58 = vshrl.u32 %v13779_v7, 16 }
 0x34a   : > { %7785 = vmatpush1.bf16.msra.mxu0 %v12880_v45  ;;  %7957 = vmatpush1.bf16.msra.mxu1 %v12883_v59  ;;  %v12924_v45 = vld [vmem:[#allocation2 + $0x19c4] ss:$16 sps:$4 sm:$0xff]   ;;  %v12927_v59 = vld [vmem:[#allocation2 + $0x19cc] ss:$16 sps:$4 sm:$0xff]  }
 0x34b   : > { %7786 = vmatprep.subr.bf16.mxu0 %v12888_v47  ;;  %7958 = vmatprep.subr.bf16.mxu1 %v12891_v49  ;;  %v12922_v47 = vld [vmem:[#allocation2 + $0x19c0] ss:$16 sps:$4 sm:$0xff]   ;;  %v6440_v49 = vshrl.u32 %v13806_v62, 16 }
 0x34e   : > { %7787 = vmatpush1.bf16.msra.mxu0 %v12886_v5  ;;  %7959 = vmatpush1.bf16.msra.mxu1 %v12889_v6  ;;  %v12925_v5 = vld [vmem:[#allocation2 + $0x19c8] ss:$16 sps:$4 sm:$0xff]   ;;  %v6410_v6 = vrot.slane %v879_v13, 1  ;;  %v6443_v13 = vrot.slane %v922_v3, 2  ;;  %v12942_v3 = vld [vmem:[#allocation2 + $0x1a24] ss:$16 sps:$4 sm:$0xff]  }
 0x34f   : > { %7788 = vmatprep.subr.bf16.mxu0 %v12894_v9  ;;  %7960 = vmatprep.subr.bf16.mxu1 %v12897_v11  ;;  %v6411_v9 = vrot.slane %v881_v8, 2  ;;  %v6415_v11 = vrot.slane %v6413_v58, 1  ;;  %v12928_v8 = vld [vmem:[#allocation2 + $0x19e0] ss:$16 sps:$4 sm:$0xff]   ;;  %v12951_v58 = vld [vmem:[#allocation2 + $0x1a4c] ss:$16 sps:$4 sm:$0xff]  }
 0x352   : > { %7789 = vmatpush1.bf16.msra.mxu0 %v12892_v19  ;;  %7961 = vmatpush1.bf16.msra.mxu1 %v12895_v22  ;;  %v6416_v19 = vrot.slane %v886_v15, 2  ;;  %v12930_v22 = vld [vmem:[#allocation2 + $0x19e4] ss:$16 sps:$4 sm:$0xff]  }
 0x353   : > { %7790 = vmatprep.subr.bf16.mxu0 %v12900_v23  ;;  %7962 = vmatprep.subr.bf16.mxu1 %v12903_v27  ;;  %v12933_v23 = vld [vmem:[#allocation2 + $0x19ec] ss:$16 sps:$4 sm:$0xff]   ;;  %v6437_v27 = vrot.slane %v915_v1, 1  ;;  %v12934_v1 = vld [vmem:[#allocation2 + $0x1a00] ss:$16 sps:$4 sm:$0xff]  }
 0x354   : > { %v6417_v15 = vor.u32 %v6416_v19, %v6415_v11  ;;  %v12963_v11 = vld [vmem:[#allocation2 + $0x1a8c] ss:$16 sps:$4 sm:$0xff]   ;;  %v12958_v19 = vld [vmem:[#allocation2 + $0x1a80] ss:$16 sps:$4 sm:$0xff]  }
 0x356   : > { %7791 = vmatpush1.bf16.msra.mxu0 %v12898_v28  ;;  %7963 = vmatpush1.bf16.msra.mxu1 %v12901_v29  ;;  %v6438_v28 = vrot.slane %v917_v2, 2  ;;  %v6442_v29 = vrot.slane %v6440_v49, 1  ;;  %v12937_v2 = vld [vmem:[#allocation2 + $0x1a08] ss:$16 sps:$4 sm:$0xff]   ;;  %v12957_v49 = vld [vmem:[#allocation2 + $0x1a6c] ss:$16 sps:$4 sm:$0xff]  }
 0x357   : > { %7792 = vmatprep.subr.bf16.mxu0 %v12906_v30  ;;  %7964 = vmatprep.subr.bf16.mxu1 %v12909_v31  ;;  %v12931_v30 = vld [vmem:[#allocation2 + $0x19e8] ss:$16 sps:$4 sm:$0xff]   ;;  %v6412_v31 = vor.u32 %v6411_v9, %v6410_v6  ;;  %v12960_v9 = vld [vmem:[#allocation2 + $0x1a84] ss:$16 sps:$4 sm:$0xff]  }
 0x358   : > { %v12955_v6 = vld [vmem:[#allocation2 + $0x1a68] ss:$16 sps:$4 sm:$0xff]  }
 0x35a   : > { %7793 = vmatpush1.bf16.msra.mxu0 %v12904_v32  ;;  %7965 = vmatpush1.bf16.msra.mxu1 %v12907_v35  ;;  %v12936_v32 = vld [vmem:[#allocation2 + $0x1a04] ss:$16 sps:$4 sm:$0xff]   ;;  %v12939_v35 = vld [vmem:[#allocation2 + $0x1a0c] ss:$16 sps:$4 sm:$0xff]  }
 0x35b   : > { %7794 = vmatprep.subr.bf16.mxu0 %v12912_v37  ;;  %7966 = vmatprep.subr.bf16.mxu1 %v12915_v40  ;;  %v6439_v37 = vor.u32 %v6438_v28, %v6437_v27  ;;  %v6444_v40 = vor.u32 %v6443_v13, %v6442_v29  ;;  %v12969_v27 = vld [vmem:[#allocation2 + $0x1aac] ss:$16 sps:$4 sm:$0xff]   ;;  %v12964_v28 = vld [vmem:[#allocation2 + $0x1aa0] ss:$16 sps:$4 sm:$0xff]   ;;  %v12967_v29 = vld [vmem:[#allocation2 + $0x1aa8] ss:$16 sps:$4 sm:$0xff]  }
 0x35c   : > { %v12972_v13 = vld [vmem:[#allocation2 + $0x1ac4] ss:$16 sps:$4 sm:$0xff]  }
 0x35e   : > { %7795 = vmatpush1.bf16.msra.mxu0 %v12910_v42  ;;  %7967 = vmatpush1.bf16.msra.mxu1 %v12913_v51  ;;  %v6418_v42 = vsel %vm6409_vm2, %v6412_v31, %v6417_v15  ;;  %v12945_v51 = vld [vmem:[#allocation2 + $0x1a2c] ss:$16 sps:$4 sm:$0xff]   ;;  %v12973_v31 = vld [vmem:[#allocation2 + $0x1ac8] ss:$16 sps:$4 sm:$0xff]   ;;  %v12978_v15 = vld [vmem:[#allocation2 + $0x1ae4] ss:$16 sps:$4 sm:$0xff]  }
 0x35f   : > { %7796 = vmatprep.subr.bf16.mxu0 %v12918_v56  ;;  %7968 = vmatprep.subr.bf16.mxu1 %v12921_v52  ;;  %v6445_v56 = vsel %vm6409_vm2, %v6439_v37, %v6444_v40  ;;  %v12940_v52 = vld [vmem:[#allocation2 + $0x1a20] ss:$16 sps:$4 sm:$0xff]   ;;  %v12979_v37 = vld [vmem:[#allocation2 + $0x1ae8] ss:$16 sps:$4 sm:$0xff]   ;;  %v12984_v40 = vld [vmem:[#allocation2 + $0x1b04] ss:$16 sps:$4 sm:$0xff]  }
 0x362   : > { %7797 = vmatpush1.bf16.msra.mxu0 %v12916_v57  ;;  %7969 = vmatpush1.bf16.msra.mxu1 %v12919_v41  ;;  %v12943_v57 = vld [vmem:[#allocation2 + $0x1a28] ss:$16 sps:$4 sm:$0xff]   ;;  %v12948_v41 = vld [vmem:[#allocation2 + $0x1a44] ss:$16 sps:$4 sm:$0xff]  }
 0x363   : > { %7798 = vmatprep.subr.bf16.mxu0 %v12924_v45  ;;  %7970 = vmatprep.subr.bf16.mxu1 %v12927_v59  ;;  %v12946_v45 = vld [vmem:[#allocation2 + $0x1a40] ss:$16 sps:$4 sm:$0xff]   ;;  %v12949_v59 = vld [vmem:[#allocation2 + $0x1a48] ss:$16 sps:$4 sm:$0xff]  }
 0x366   : > { %7799 = vmatpush1.bf16.msra.mxu0 %v12922_v47  ;;  %7971 = vmatpush1.bf16.msra.mxu1 %v12925_v5  ;;  %v12954_v47 = vld [vmem:[#allocation2 + $0x1a64] ss:$16 sps:$4 sm:$0xff]   ;;  %v12952_v5 = vld [vmem:[#allocation2 + $0x1a60] ss:$16 sps:$4 sm:$0xff]  }
 0x367   : > { %7800 = vmatprep.subr.bf16.mxu0 %v12930_v22  ;;  %7972 = vmatprep.subr.bf16.mxu1 %v12933_v23  ;;  %v12961_v22 = vld [vmem:[#allocation2 + $0x1a88] ss:$16 sps:$4 sm:$0xff]   ;;  %v12966_v23 = vld [vmem:[#allocation2 + $0x1aa4] ss:$16 sps:$4 sm:$0xff]  }
 0x36a   : > { %7801 = vmatpush1.bf16.msra.mxu0 %v12928_v8  ;;  %7973 = vmatpush1.bf16.msra.mxu1 %v12931_v30  ;;  %v12975_v8 = vld [vmem:[#allocation2 + $0x1acc] ss:$16 sps:$4 sm:$0xff]   ;;  %v12970_v30 = vld [vmem:[#allocation2 + $0x1ac0] ss:$16 sps:$4 sm:$0xff]  }
 0x36b   : > { %7813 = vmatprep.subr.bf16.mxu0 %v12936_v32  ;;  %7985 = vmatprep.subr.bf16.mxu1 %v12939_v35  ;;  %v12981_v32 = vld [vmem:[#allocation2 + $0x1aec] ss:$16 sps:$4 sm:$0xff]   ;;  %v12976_v35 = vld [vmem:[#allocation2 + $0x1ae0] ss:$16 sps:$4 sm:$0xff]  }
 0x36d   : > { %7803 = vmatmul.mubr.bf16.vlgmr.msra.gmra.mrb[0].mxu0 %v6418_v42  ;;  %7975 = vmatmul.mubr.bf16.vlgmr.msra.gmra.mrb[0].mxu1 %v6418_v42  ;;  %v12985_v42 = vld [vmem:[#allocation2 + $0x1b08] ss:$16 sps:$4 sm:$0xff]  }
 0x36e   : > { %7814 = vmatpush1.bf16.msra.mxu0 %v12934_v1  ;;  %7986 = vmatpush1.bf16.msra.mxu1 %v12937_v2  ;;  %v12987_v1 = vld [vmem:[#allocation2 + $0x1b0c] ss:$16 sps:$4 sm:$0xff]   ;;  %v12982_v2 = vld [vmem:[#allocation2 + $0x1b00] ss:$16 sps:$4 sm:$0xff]  }
 0x36f   : > { %7815 = vmatprep.subr.bf16.mxu0 %v12942_v3  ;;  %7987 = vmatprep.subr.bf16.mxu1 %v12945_v51  ;;  %v12990_v3 = vld [vmem:[#allocation2 + $0x1b24] ss:$16 sps:$4 sm:$0xff]   ;;  %v12993_v51 = vld [vmem:[#allocation2 + $0x1b2c] ss:$16 sps:$4 sm:$0xff]  }
 0x370   : > { %7845 = vmatprep.mubr.bf16.mxu0 %v6445_v56  ;;  %8017 = vmatprep.mubr.bf16.mxu1 %v6445_v56  ;;  %v12988_v56 = vld [vmem:[#allocation2 + $0x1b20] ss:$16 sps:$4 sm:$0xff]  }
 0x372   : > { %7816 = vmatpush1.bf16.msra.mxu0 %v12940_v52  ;;  %7988 = vmatpush1.bf16.msra.mxu1 %v12943_v57  ;;  %v12991_v52 = vld [vmem:[#allocation2 + $0x1b28] ss:$16 sps:$4 sm:$0xff]   ;;  %v12996_v57 = vld [vmem:[#allocation2 + $0x1b44] ss:$16 sps:$4 sm:$0xff]  }
 0x373   : > { %7817 = vmatprep.subr.bf16.mxu0 %v12948_v41  ;;  %7989 = vmatprep.subr.bf16.mxu1 %v12951_v58  ;;  %v12999_v41 = vld [vmem:[#allocation2 + $0x1b4c] ss:$16 sps:$4 sm:$0xff]   ;;  %v12994_v58 = vld [vmem:[#allocation2 + $0x1b40] ss:$16 sps:$4 sm:$0xff]  }
 0x376   : > { %7818 = vmatpush1.bf16.msra.mxu0 %v12946_v45  ;;  %7990 = vmatpush1.bf16.msra.mxu1 %v12949_v59  ;;  %v12997_v45 = vld [vmem:[#allocation2 + $0x1b48] ss:$16 sps:$4 sm:$0xff]   ;;  %v13002_v59 = vld [vmem:[#allocation2 + $0x1b64] ss:$16 sps:$4 sm:$0xff]  }
 0x377   : > { %7819 = vmatprep.subr.bf16.mxu0 %v12954_v47  ;;  %7991 = vmatprep.subr.bf16.mxu1 %v12957_v49  ;;  %v13005_v47 = vld [vmem:[#allocation2 + $0x1b6c] ss:$16 sps:$4 sm:$0xff]   ;;  %v13000_v49 = vld [vmem:[#allocation2 + $0x1b60] ss:$16 sps:$4 sm:$0xff]  }
 0x37a   : > { %7820 = vmatpush1.bf16.msra.mxu0 %v12952_v5  ;;  %7992 = vmatpush1.bf16.msra.mxu1 %v12955_v6  ;;  %v13003_v5 = vld [vmem:[#allocation2 + $0x1b68] ss:$16 sps:$4 sm:$0xff]   ;;  %v13008_v6 = vld [vmem:[#allocation2 + $0x1b84] ss:$16 sps:$4 sm:$0xff]  }
 0x37b   : > { %7821 = vmatprep.subr.bf16.mxu0 %v12960_v9  ;;  %7993 = vmatprep.subr.bf16.mxu1 %v12963_v11  ;;  %v13011_v9 = vld [vmem:[#allocation2 + $0x1b8c] ss:$16 sps:$4 sm:$0xff]   ;;  %v13006_v11 = vld [vmem:[#allocation2 + $0x1b80] ss:$16 sps:$4 sm:$0xff]  }
 0x37e   : > { %7822 = vmatpush1.bf16.msra.mxu0 %v12958_v19  ;;  %7994 = vmatpush1.bf16.msra.mxu1 %v12961_v22  ;;  %v13009_v19 = vld [vmem:[#allocation2 + $0x1b88] ss:$16 sps:$4 sm:$0xff]   ;;  %v13014_v22 = vld [vmem:[#allocation2 + $0x1ba4] ss:$16 sps:$4 sm:$0xff]  }
 0x37f   : > { %7823 = vmatprep.subr.bf16.mxu0 %v12966_v23  ;;  %7995 = vmatprep.subr.bf16.mxu1 %v12969_v27  ;;  %v13017_v23 = vld [vmem:[#allocation2 + $0x1bac] ss:$16 sps:$4 sm:$0xff]   ;;  %v13012_v27 = vld [vmem:[#allocation2 + $0x1ba0] ss:$16 sps:$4 sm:$0xff]  }
 0x382   : > { %7824 = vmatpush1.bf16.msra.mxu0 %v12964_v28  ;;  %7996 = vmatpush1.bf16.msra.mxu1 %v12967_v29  ;;  %v13015_v28 = vld [vmem:[#allocation2 + $0x1ba8] ss:$16 sps:$4 sm:$0xff]   ;;  %v6431_v29 = vshrl.u32 %v13823_v38, 16 }
 0x383   : > { %7825 = vmatprep.subr.bf16.mxu0 %v12972_v13  ;;  %7997 = vmatprep.subr.bf16.mxu1 %v12975_v8  ;;  %v13020_v13 = vld [vmem:[#allocation2 + $0x1bc4] ss:$16 sps:$4 sm:$0xff]   ;;  %v13023_v8 = vld [vmem:[#allocation2 + $0x1bcc] ss:$16 sps:$4 sm:$0xff]  }
 0x386   : > { %7826 = vmatpush1.bf16.msra.mxu0 %v12970_v30  ;;  %7998 = vmatpush1.bf16.msra.mxu1 %v12973_v31  ;;  %v13018_v30 = vld [vmem:[#allocation2 + $0x1bc0] ss:$16 sps:$4 sm:$0xff]   ;;  %v6458_v31 = vshrl.u32 %v13853_v21, 16 }
 0x387   : > { %7827 = vmatprep.subr.bf16.mxu0 %v12978_v15  ;;  %7999 = vmatprep.subr.bf16.mxu1 %v12981_v32  ;;  %v13021_v15 = vld [vmem:[#allocation2 + $0x1bc8] ss:$16 sps:$4 sm:$0xff]   ;;  %v6428_v32 = vrot.slane %v903_v44, 1  ;;  %v6461_v44 = vrot.slane %v946_v26, 2  ;;  %v13038_v26 = vld [vmem:[#allocation2 + $0x1c24] ss:$16 sps:$4 sm:$0xff]  }
 0x38a   : > { %7828 = vmatpush1.bf16.msra.mxu0 %v12976_v35  ;;  %8000 = vmatpush1.bf16.msra.mxu1 %v12979_v37  ;;  %v6429_v35 = vrot.slane %v905_v39, 2  ;;  %v6433_v37 = vrot.slane %v6431_v29, 1  ;;  %v13024_v39 = vld [vmem:[#allocation2 + $0x1be0] ss:$16 sps:$4 sm:$0xff]   ;;  %v13051_v29 = vld [vmem:[#allocation2 + $0x1c68] ss:$16 sps:$4 sm:$0xff]  }
 0x38b   : > { %7829 = vmatprep.subr.bf16.mxu0 %v12984_v40  ;;  %8001 = vmatprep.subr.bf16.mxu1 %v12987_v1  ;;  %v6434_v40 = vrot.slane %v910_v46, 2  ;;  %v13026_v1 = vld [vmem:[#allocation2 + $0x1be4] ss:$16 sps:$4 sm:$0xff]  }
 0x38d   : > { %v6435_v46 = vor.u32 %v6434_v40, %v6433_v37  ;;  %v13063_v37 = vld [vmem:[#allocation2 + $0x1ca8] ss:$16 sps:$4 sm:$0xff]   ;;  %v13068_v40 = vld [vmem:[#allocation2 + $0x1cc4] ss:$16 sps:$4 sm:$0xff]  }
 0x38e   : > { %7830 = vmatpush1.bf16.msra.mxu0 %v12982_v2  ;;  %8002 = vmatpush1.bf16.msra.mxu1 %v12985_v42  ;;  %v13029_v2 = vld [vmem:[#allocation2 + $0x1bec] ss:$16 sps:$4 sm:$0xff]   ;;  %v6455_v42 = vrot.slane %v939_v24, 1  ;;  %v13030_v24 = vld [vmem:[#allocation2 + $0x1c00] ss:$16 sps:$4 sm:$0xff]  }
 0x38f   : > { %7831 = vmatprep.subr.bf16.mxu0 %v12990_v3  ;;  %8003 = vmatprep.subr.bf16.mxu1 %v12993_v51  ;;  %v6456_v3 = vrot.slane %v941_v25, 2  ;;  %v6460_v51 = vrot.slane %v6458_v31, 1  ;;  %v13033_v25 = vld [vmem:[#allocation2 + $0x1c08] ss:$16 sps:$4 sm:$0xff]  }
 0x390   : > { %v13057_v31 = vld [vmem:[#allocation2 + $0x1c88] ss:$16 sps:$4 sm:$0xff]  }
 0x392   : > { %7832 = vmatpush1.bf16.msra.mxu0 %v12988_v56  ;;  %8004 = vmatpush1.bf16.msra.mxu1 %v12991_v52  ;;  %v13027_v56 = vld [vmem:[#allocation2 + $0x1be8] ss:$16 sps:$4 sm:$0xff]   ;;  %v6430_v52 = vor.u32 %v6429_v35, %v6428_v32  ;;  %v13065_v32 = vld [vmem:[#allocation2 + $0x1cac] ss:$16 sps:$4 sm:$0xff]   ;;  %v13060_v35 = vld [vmem:[#allocation2 + $0x1ca0] ss:$16 sps:$4 sm:$0xff]  }
 0x393   : > { %7833 = vmatprep.subr.bf16.mxu0 %v12996_v57  ;;  %8005 = vmatprep.subr.bf16.mxu1 %v12999_v41  ;;  %v13032_v57 = vld [vmem:[#allocation2 + $0x1c04] ss:$16 sps:$4 sm:$0xff]   ;;  %v13035_v41 = vld [vmem:[#allocation2 + $0x1c0c] ss:$16 sps:$4 sm:$0xff]  }
 0x396   : > { %7834 = vmatpush1.bf16.msra.mxu0 %v12994_v58  ;;  %8006 = vmatpush1.bf16.msra.mxu1 %v12997_v45  ;;  %v6457_v58 = vor.u32 %v6456_v3, %v6455_v42  ;;  %v6462_v45 = vor.u32 %v6461_v44, %v6460_v51  ;;  %v13069_v42 = vld [vmem:[#allocation2 + $0x1cc8] ss:$16 sps:$4 sm:$0xff]   ;;  %v13074_v3 = vld [vmem:[#allocation2 + $0x1ce4] ss:$16 sps:$4 sm:$0xff]   ;;  %v13077_v51 = vld [vmem:[#allocation2 + $0x1cec] ss:$16 sps:$4 sm:$0xff]  }
 0x397   : > { %7835 = vmatprep.subr.bf16.mxu0 %v13002_v59  ;;  %8007 = vmatprep.subr.bf16.mxu1 %v13005_v47  ;;  %v6436_v59 = vsel %vm6409_vm2, %v6430_v52, %v6435_v46  ;;  %v13041_v47 = vld [vmem:[#allocation2 + $0x1c2c] ss:$16 sps:$4 sm:$0xff]   ;;  %v13072_v44 = vld [vmem:[#allocation2 + $0x1ce0] ss:$16 sps:$4 sm:$0xff]  }
 0x398   : > { %v13083_v52 = vld [vmem:[#allocation2 + $0x1d0c] ss:$16 sps:$4 sm:$0xff]   ;;  %v13078_v46 = vld [vmem:[#allocation2 + $0x1d00] ss:$16 sps:$4 sm:$0xff]  }
 0x39a   : > { %7836 = vmatpush1.bf16.msra.mxu0 %v13000_v49  ;;  %8008 = vmatpush1.bf16.msra.mxu1 %v13003_v5  ;;  %v6463_v49 = vsel %vm6409_vm2, %v6457_v58, %v6462_v45  ;;  %v13036_v5 = vld [vmem:[#allocation2 + $0x1c20] ss:$16 sps:$4 sm:$0xff]   ;;  %v13089_v58 = vld [vmem:[#allocation2 + $0x1d2c] ss:$16 sps:$4 sm:$0xff]  }
 0x39b   : > { %7837 = vmatprep.subr.bf16.mxu0 %v13008_v6  ;;  %8009 = vmatprep.subr.bf16.mxu1 %v13011_v9  ;;  %v13039_v6 = vld [vmem:[#allocation2 + $0x1c28] ss:$16 sps:$4 sm:$0xff]   ;;  %v13044_v9 = vld [vmem:[#allocation2 + $0x1c44] ss:$16 sps:$4 sm:$0xff]   ;;  %v13084_v45 = vld [vmem:[#allocation2 + $0x1d20] ss:$16 sps:$4 sm:$0xff]  }
 0x39e   : > { %7838 = vmatpush1.bf16.msra.mxu0 %v13006_v11  ;;  %8010 = vmatpush1.bf16.msra.mxu1 %v13009_v19  ;;  %v13047_v11 = vld [vmem:[#allocation2 + $0x1c4c] ss:$16 sps:$4 sm:$0xff]   ;;  %v13042_v19 = vld [vmem:[#allocation2 + $0x1c40] ss:$16 sps:$4 sm:$0xff]  }
 0x39f   : > { %7839 = vmatprep.subr.bf16.mxu0 %v13014_v22  ;;  %8011 = vmatprep.subr.bf16.mxu1 %v13017_v23  ;;  %v13045_v22 = vld [vmem:[#allocation2 + $0x1c48] ss:$16 sps:$4 sm:$0xff]   ;;  %v13050_v23 = vld [vmem:[#allocation2 + $0x1c64] ss:$16 sps:$4 sm:$0xff]  }
 0x3a2   : > { %7840 = vmatpush1.bf16.msra.mxu0 %v13012_v27  ;;  %8012 = vmatpush1.bf16.msra.mxu1 %v13015_v28  ;;  %v13053_v27 = vld [vmem:[#allocation2 + $0x1c6c] ss:$16 sps:$4 sm:$0xff]   ;;  %v13048_v28 = vld [vmem:[#allocation2 + $0x1c60] ss:$16 sps:$4 sm:$0xff]  }
 0x3a3   : > { %7841 = vmatprep.subr.bf16.mxu0 %v13020_v13  ;;  %8013 = vmatprep.subr.bf16.mxu1 %v13023_v8  ;;  %v13056_v13 = vld [vmem:[#allocation2 + $0x1c84] ss:$16 sps:$4 sm:$0xff]   ;;  %v13059_v8 = vld [vmem:[#allocation2 + $0x1c8c] ss:$16 sps:$4 sm:$0xff]  }
 0x3a6   : > { %7842 = vmatpush1.bf16.msra.mxu0 %v13018_v30  ;;  %8014 = vmatpush1.bf16.msra.mxu1 %v13021_v15  ;;  %v13054_v30 = vld [vmem:[#allocation2 + $0x1c80] ss:$16 sps:$4 sm:$0xff]   ;;  %v13062_v15 = vld [vmem:[#allocation2 + $0x1ca4] ss:$16 sps:$4 sm:$0xff]  }
 0x3a7   : > { %7843 = vmatprep.subr.bf16.mxu0 %v13026_v1  ;;  %8015 = vmatprep.subr.bf16.mxu1 %v13029_v2  ;;  %v13071_v1 = vld [vmem:[#allocation2 + $0x1ccc] ss:$16 sps:$4 sm:$0xff]   ;;  %v13066_v2 = vld [vmem:[#allocation2 + $0x1cc0] ss:$16 sps:$4 sm:$0xff]  }
 0x3aa   : > { %7844 = vmatpush1.bf16.msra.mxu0 %v13024_v39  ;;  %8016 = vmatpush1.bf16.msra.mxu1 %v13027_v56  ;;  %v13075_v39 = vld [vmem:[#allocation2 + $0x1ce8] ss:$16 sps:$4 sm:$0xff]   ;;  %v13080_v56 = vld [vmem:[#allocation2 + $0x1d04] ss:$16 sps:$4 sm:$0xff]  }
 0x3ab   : > { %7856 = vmatprep.subr.bf16.mxu0 %v13032_v57  ;;  %8028 = vmatprep.subr.bf16.mxu1 %v13035_v41  ;;  %v13081_v57 = vld [vmem:[#allocation2 + $0x1d08] ss:$16 sps:$4 sm:$0xff]   ;;  %v13086_v41 = vld [vmem:[#allocation2 + $0x1d24] ss:$16 sps:$4 sm:$0xff]  }
 0x3ad   : > { %7846 = vmatmul.mubr.bf16.vlgmr.msra.gmra.mrb[0].mxu0 %v6436_v59  ;;  %8018 = vmatmul.mubr.bf16.vlgmr.msra.gmra.mrb[0].mxu1 %v6436_v59  ;;  %v13095_v59 = vld [vmem:[#allocation2 + $0x1d4c] ss:$16 sps:$4 sm:$0xff]  }
 0x3ae   : > { %7857 = vmatpush1.bf16.msra.mxu0 %v13030_v24  ;;  %8029 = vmatpush1.bf16.msra.mxu1 %v13033_v25  ;;  %v13087_v24 = vld [vmem:[#allocation2 + $0x1d28] ss:$16 sps:$4 sm:$0xff]   ;;  %v13092_v25 = vld [vmem:[#allocation2 + $0x1d44] ss:$16 sps:$4 sm:$0xff]  }
 0x3af   : > { %7858 = vmatprep.subr.bf16.mxu0 %v13038_v26  ;;  %8030 = vmatprep.subr.bf16.mxu1 %v13041_v47  ;;  %v13090_v26 = vld [vmem:[#allocation2 + $0x1d40] ss:$16 sps:$4 sm:$0xff]   ;;  %v13093_v47 = vld [vmem:[#allocation2 + $0x1d48] ss:$16 sps:$4 sm:$0xff]  }
 0x3b0   : > { %7888 = vmatprep.mubr.bf16.mxu0 %v6463_v49  ;;  %8060 = vmatprep.mubr.bf16.mxu1 %v6463_v49  ;;  %v13098_v49 = vld [vmem:[#allocation2 + $0x1d64] ss:$16 sps:$4 sm:$0xff]  }
 0x3b2   : > { %7859 = vmatpush1.bf16.msra.mxu0 %v13036_v5  ;;  %8031 = vmatpush1.bf16.msra.mxu1 %v13039_v6  ;;  %v13101_v5 = vld [vmem:[#allocation2 + $0x1d6c] ss:$16 sps:$4 sm:$0xff]   ;;  %v13096_v6 = vld [vmem:[#allocation2 + $0x1d60] ss:$16 sps:$4 sm:$0xff]  }
 0x3b3   : > { %7860 = vmatprep.subr.bf16.mxu0 %v13044_v9  ;;  %8032 = vmatprep.subr.bf16.mxu1 %v13047_v11  ;;  %v13099_v9 = vld [vmem:[#allocation2 + $0x1d68] ss:$16 sps:$4 sm:$0xff]   ;;  %v13104_v11 = vld [vmem:[#allocation2 + $0x1d84] ss:$16 sps:$4 sm:$0xff]  }
 0x3b6   : > { %7861 = vmatpush1.bf16.msra.mxu0 %v13042_v19  ;;  %8033 = vmatpush1.bf16.msra.mxu1 %v13045_v22  ;;  %v13107_v19 = vld [vmem:[#allocation2 + $0x1d8c] ss:$16 sps:$4 sm:$0xff]   ;;  %v13102_v22 = vld [vmem:[#allocation2 + $0x1d80] ss:$16 sps:$4 sm:$0xff]  }
 0x3b7   : > { %7862 = vmatprep.subr.bf16.mxu0 %v13050_v23  ;;  %8034 = vmatprep.subr.bf16.mxu1 %v13053_v27  ;;  %v13105_v23 = vld [vmem:[#allocation2 + $0x1d88] ss:$16 sps:$4 sm:$0xff]   ;;  %v13110_v27 = vld [vmem:[#allocation2 + $0x1da4] ss:$16 sps:$4 sm:$0xff]  }
 0x3ba   : > { %7863 = vmatpush1.bf16.msra.mxu0 %v13048_v28  ;;  %8035 = vmatpush1.bf16.msra.mxu1 %v13051_v29  ;;  %v13113_v28 = vld [vmem:[#allocation2 + $0x1dac] ss:$16 sps:$4 sm:$0xff]   ;;  %v13108_v29 = vld [vmem:[#allocation2 + $0x1da0] ss:$16 sps:$4 sm:$0xff]  }
 0x3bb   : > { %7864 = vmatprep.subr.bf16.mxu0 %v13056_v13  ;;  %8036 = vmatprep.subr.bf16.mxu1 %v13059_v8  ;;  %v13111_v13 = vld [vmem:[#allocation2 + $0x1da8] ss:$16 sps:$4 sm:$0xff]   ;;  %v6449_v8 = vshrl.u32 %v13884_v14, 16 }
 0x3be   : > { %7865 = vmatpush1.bf16.msra.mxu0 %v13054_v30  ;;  %8037 = vmatpush1.bf16.msra.mxu1 %v13057_v31  ;;  %v13116_v30 = vld [vmem:[#allocation2 + $0x1dc4] ss:$16 sps:$4 sm:$0xff]   ;;  %v13119_v31 = vld [vmem:[#allocation2 + $0x1dcc] ss:$16 sps:$4 sm:$0xff]  }
 0x3bf   : > { %7866 = vmatprep.subr.bf16.mxu0 %v13062_v15  ;;  %8038 = vmatprep.subr.bf16.mxu1 %v13065_v32  ;;  %v13114_v15 = vld [vmem:[#allocation2 + $0x1dc0] ss:$16 sps:$4 sm:$0xff]   ;;  %v6476_v32 = vshrl.u32 %v13892_v60, 16 }
 0x3c2   : > { %7867 = vmatpush1.bf16.msra.mxu0 %v13060_v35  ;;  %8039 = vmatpush1.bf16.msra.mxu1 %v13063_v37  ;;  %v13117_v35 = vld [vmem:[#allocation2 + $0x1dc8] ss:$16 sps:$4 sm:$0xff]   ;;  %v6446_v37 = vrot.slane %v927_v17, 1  ;;  %v6479_v17 = vrot.slane %v970_v12, 2  ;;  %v13134_v12 = vld [vmem:[#allocation2 + $0x1e24] ss:$16 sps:$4 sm:$0xff]  }
 0x3c3   : > { %7868 = vmatprep.subr.bf16.mxu0 %v13068_v40  ;;  %8040 = vmatprep.subr.bf16.mxu1 %v13071_v1  ;;  %v6447_v40 = vrot.slane %v929_v16, 2  ;;  %v6451_v1 = vrot.slane %v6449_v8, 1  ;;  %v13120_v16 = vld [vmem:[#allocation2 + $0x1de0] ss:$16 sps:$4 sm:$0xff]   ;;  %v13161_v8 = vld [vmem:[#allocation2 + $0x1eac] ss:$16 sps:$4 sm:$0xff]  }
 0x3c6   : > { %7869 = vmatpush1.bf16.msra.mxu0 %v13066_v2  ;;  %8041 = vmatpush1.bf16.msra.mxu1 %v13069_v42  ;;  %v6452_v2 = vrot.slane %v934_v4, 2  ;;  %v13122_v42 = vld [vmem:[#allocation2 + $0x1de4] ss:$16 sps:$4 sm:$0xff]  }
 0x3c7   : > { %7870 = vmatprep.subr.bf16.mxu0 %v13074_v3  ;;  %8042 = vmatprep.subr.bf16.mxu1 %v13077_v51  ;;  %v13125_v3 = vld [vmem:[#allocation2 + $0x1dec] ss:$16 sps:$4 sm:$0xff]   ;;  %v6473_v51 = vrot.slane %v963_v10, 1  ;;  %v13126_v10 = vld [vmem:[#allocation2 + $0x1e00] ss:$16 sps:$4 sm:$0xff]  }
 0x3c8   : > { %v6453_v4 = vor.u32 %v6452_v2, %v6451_v1  ;;  %v13173_v1 = vld [vmem:[#allocation2 + $0x1eec] ss:$16 sps:$4 sm:$0xff]   ;;  %v13168_v2 = vld [vmem:[#allocation2 + $0x1ee0] ss:$16 sps:$4 sm:$0xff]  }
 0x3ca   : > { %7871 = vmatpush1.bf16.msra.mxu0 %v13072_v44  ;;  %8043 = vmatpush1.bf16.msra.mxu1 %v13075_v39  ;;  %v6474_v44 = vrot.slane %v965_v63, 2  ;;  %v6478_v39 = vrot.slane %v6476_v32, 1  ;;  %v13129_v63 = vld [vmem:[#allocation2 + $0x1e08] ss:$16 sps:$4 sm:$0xff]   ;;  %v13167_v32 = vld [vmem:[#allocation2 + $0x1ecc] ss:$16 sps:$4 sm:$0xff]  }
 0x3cb   : > { %7872 = vmatprep.subr.bf16.mxu0 %v13080_v56  ;;  %8044 = vmatprep.subr.bf16.mxu1 %v13083_v52  ;;  %v13123_v56 = vld [vmem:[#allocation2 + $0x1de8] ss:$16 sps:$4 sm:$0xff]   ;;  %v6448_v52 = vor.u32 %v6447_v40, %v6446_v37  ;;  %v13170_v40 = vld [vmem:[#allocation2 + $0x1ee4] ss:$16 sps:$4 sm:$0xff]  }
 0x3cc   : > { %v13165_v37 = vld [vmem:[#allocation2 + $0x1ec8] ss:$16 sps:$4 sm:$0xff]  }
 0x3ce   : > { %7873 = vmatpush1.bf16.msra.mxu0 %v13078_v46  ;;  %8045 = vmatpush1.bf16.msra.mxu1 %v13081_v57  ;;  %v13128_v46 = vld [vmem:[#allocation2 + $0x1e04] ss:$16 sps:$4 sm:$0xff]   ;;  %v13131_v57 = vld [vmem:[#allocation2 + $0x1e0c] ss:$16 sps:$4 sm:$0xff]  }
 0x3cf   : > { %7874 = vmatprep.subr.bf16.mxu0 %v13086_v41  ;;  %8046 = vmatprep.subr.bf16.mxu1 %v13089_v58  ;;  %v6475_v41 = vor.u32 %v6474_v44, %v6473_v51  ;;  %v6480_v58 = vor.u32 %v6479_v17, %v6478_v39  ;;  %v13179_v51 = vld [vmem:[#allocation2 + $0x1f0c] ss:$16 sps:$4 sm:$0xff]   ;;  %v13174_v44 = vld [vmem:[#allocation2 + $0x1f00] ss:$16 sps:$4 sm:$0xff]   ;;  %v13177_v39 = vld [vmem:[#allocation2 + $0x1f08] ss:$16 sps:$4 sm:$0xff]  }
 0x3d0   : > { %v13182_v17 = vld [vmem:[#allocation2 + $0x1f24] ss:$16 sps:$4 sm:$0xff]  }
 0x3d2   : > { %7875 = vmatpush1.bf16.msra.mxu0 %v13084_v45  ;;  %8047 = vmatpush1.bf16.msra.mxu1 %v13087_v24  ;;  %v6454_v45 = vsel %vm6409_vm2, %v6448_v52, %v6453_v4  ;;  %v13137_v24 = vld [vmem:[#allocation2 + $0x1e2c] ss:$16 sps:$4 sm:$0xff]   ;;  %v13183_v52 = vld [vmem:[#allocation2 + $0x1f28] ss:$16 sps:$4 sm:$0xff]   ;;  %v13188_v4 = vld [vmem:[#allocation2 + $0x1f44] ss:$16 sps:$4 sm:$0xff]  }
 0x3d3   : > { %7876 = vmatprep.subr.bf16.mxu0 %v13092_v25  ;;  %8048 = vmatprep.subr.bf16.mxu1 %v13095_v59  ;;  %v6481_v25 = vsel %vm6409_vm2, %v6475_v41, %v6480_v58  ;;  %v13132_v59 = vld [vmem:[#allocation2 + $0x1e20] ss:$16 sps:$4 sm:$0xff]   ;;  %v13189_v41 = vld [vmem:[#allocation2 + $0x1f48] ss:$16 sps:$4 sm:$0xff]   ;;  %v13194_v58 = vld [vmem:[#allocation2 + $0x1f64] ss:$16 sps:$4 sm:$0xff]  }
 0x3d6   : > { %7877 = vmatpush1.bf16.msra.mxu0 %v13090_v26  ;;  %8049 = vmatpush1.bf16.msra.mxu1 %v13093_v47  ;;  %v13135_v26 = vld [vmem:[#allocation2 + $0x1e28] ss:$16 sps:$4 sm:$0xff]   ;;  %v13140_v47 = vld [vmem:[#allocation2 + $0x1e44] ss:$16 sps:$4 sm:$0xff]  }
 0x3d7   : > { %7878 = vmatprep.subr.bf16.mxu0 %v13098_v49  ;;  %8050 = vmatprep.subr.bf16.mxu1 %v13101_v5  ;;  %v13143_v49 = vld [vmem:[#allocation2 + $0x1e4c] ss:$16 sps:$4 sm:$0xff]   ;;  %v13138_v5 = vld [vmem:[#allocation2 + $0x1e40] ss:$16 sps:$4 sm:$0xff]  }
 0x3da   : > { %7879 = vmatpush1.bf16.msra.mxu0 %v13096_v6  ;;  %8051 = vmatpush1.bf16.msra.mxu1 %v13099_v9  ;;  %v13141_v6 = vld [vmem:[#allocation2 + $0x1e48] ss:$16 sps:$4 sm:$0xff]   ;;  %v13146_v9 = vld [vmem:[#allocation2 + $0x1e64] ss:$16 sps:$4 sm:$0xff]  }
 0x3db   : > { %7880 = vmatprep.subr.bf16.mxu0 %v13104_v11  ;;  %8052 = vmatprep.subr.bf16.mxu1 %v13107_v19  ;;  %v13149_v11 = vld [vmem:[#allocation2 + $0x1e6c] ss:$16 sps:$4 sm:$0xff]   ;;  %v13144_v19 = vld [vmem:[#allocation2 + $0x1e60] ss:$16 sps:$4 sm:$0xff]  }
 0x3de   : > { %7881 = vmatpush1.bf16.msra.mxu0 %v13102_v22  ;;  %8053 = vmatpush1.bf16.msra.mxu1 %v13105_v23  ;;  %v13147_v22 = vld [vmem:[#allocation2 + $0x1e68] ss:$16 sps:$4 sm:$0xff]   ;;  %v13152_v23 = vld [vmem:[#allocation2 + $0x1e84] ss:$16 sps:$4 sm:$0xff]  }
 0x3df   : > { %7882 = vmatprep.subr.bf16.mxu0 %v13110_v27  ;;  %8054 = vmatprep.subr.bf16.mxu1 %v13113_v28  ;;  %v13155_v27 = vld [vmem:[#allocation2 + $0x1e8c] ss:$16 sps:$4 sm:$0xff]   ;;  %v13150_v28 = vld [vmem:[#allocation2 + $0x1e80] ss:$16 sps:$4 sm:$0xff]  }
 0x3e2   : > { %7883 = vmatpush1.bf16.msra.mxu0 %v13108_v29  ;;  %8055 = vmatpush1.bf16.msra.mxu1 %v13111_v13  ;;  %v13153_v29 = vld [vmem:[#allocation2 + $0x1e88] ss:$16 sps:$4 sm:$0xff]   ;;  %v13158_v13 = vld [vmem:[#allocation2 + $0x1ea4] ss:$16 sps:$4 sm:$0xff]  }
 0x3e3   : > { %7884 = vmatprep.subr.bf16.mxu0 %v13116_v30  ;;  %8056 = vmatprep.subr.bf16.mxu1 %v13119_v31  ;;  %v13156_v30 = vld [vmem:[#allocation2 + $0x1ea0] ss:$16 sps:$4 sm:$0xff]   ;;  %v13159_v31 = vld [vmem:[#allocation2 + $0x1ea8] ss:$16 sps:$4 sm:$0xff]  }
 0x3e6   : > { %7885 = vmatpush1.bf16.msra.mxu0 %v13114_v15  ;;  %8057 = vmatpush1.bf16.msra.mxu1 %v13117_v35  ;;  %v13164_v15 = vld [vmem:[#allocation2 + $0x1ec4] ss:$16 sps:$4 sm:$0xff]   ;;  %v13162_v35 = vld [vmem:[#allocation2 + $0x1ec0] ss:$16 sps:$4 sm:$0xff]  }
 0x3e7   : > { %7886 = vmatprep.subr.bf16.mxu0 %v13122_v42  ;;  %8058 = vmatprep.subr.bf16.mxu1 %v13125_v3  ;;  %v13171_v42 = vld [vmem:[#allocation2 + $0x1ee8] ss:$16 sps:$4 sm:$0xff]   ;;  %v13176_v3 = vld [vmem:[#allocation2 + $0x1f04] ss:$16 sps:$4 sm:$0xff]  }
 0x3ea   : > { %7887 = vmatpush1.bf16.msra.mxu0 %v13120_v16  ;;  %8059 = vmatpush1.bf16.msra.mxu1 %v13123_v56  ;;  %v13185_v16 = vld [vmem:[#allocation2 + $0x1f2c] ss:$16 sps:$4 sm:$0xff]   ;;  %v13180_v56 = vld [vmem:[#allocation2 + $0x1f20] ss:$16 sps:$4 sm:$0xff]  }
 0x3eb   : > { %7899 = vmatprep.subr.bf16.mxu0 %v13128_v46  ;;  %8071 = vmatprep.subr.bf16.mxu1 %v13131_v57  ;;  %v13191_v46 = vld [vmem:[#allocation2 + $0x1f4c] ss:$16 sps:$4 sm:$0xff]   ;;  %v13186_v57 = vld [vmem:[#allocation2 + $0x1f40] ss:$16 sps:$4 sm:$0xff]  }
 0x3ed   : > { %7889 = vmatmul.mubr.bf16.vlgmr.msra.gmra.mrb[0].mxu0 %v6454_v45  ;;  %8061 = vmatmul.mubr.bf16.vlgmr.msra.gmra.mrb[0].mxu1 %v6454_v45  ;;  %v13195_v45 = vld [vmem:[#allocation2 + $0x1f68] ss:$16 sps:$4 sm:$0xff]  }
 0x3ee   : > { %7900 = vmatpush1.bf16.msra.mxu0 %v13126_v10  ;;  %8072 = vmatpush1.bf16.msra.mxu1 %v13129_v63  ;;  %v13197_v10 = vld [vmem:[#allocation2 + $0x1f6c] ss:$16 sps:$4 sm:$0xff]   ;;  %v13192_v63 = vld [vmem:[#allocation2 + $0x1f60] ss:$16 sps:$4 sm:$0xff]  }
 0x3ef   : > { %7901 = vmatprep.subr.bf16.mxu0 %v13134_v12  ;;  %8073 = vmatprep.subr.bf16.mxu1 %v13137_v24  ;;  %v13200_v12 = vld [vmem:[#allocation2 + $0x1f84] ss:$16 sps:$4 sm:$0xff]   ;;  %v13203_v24 = vld [vmem:[#allocation2 + $0x1f8c] ss:$16 sps:$4 sm:$0xff]  }
 0x3f0   : > { %7931 = vmatprep.mubr.bf16.mxu0 %v6481_v25  ;;  %8103 = vmatprep.mubr.bf16.mxu1 %v6481_v25  ;;  %v13198_v25 = vld [vmem:[#allocation2 + $0x1f80] ss:$16 sps:$4 sm:$0xff]  }
 0x3f2   : > { %7902 = vmatpush1.bf16.msra.mxu0 %v13132_v59  ;;  %8074 = vmatpush1.bf16.msra.mxu1 %v13135_v26  ;;  %v13201_v59 = vld [vmem:[#allocation2 + $0x1f88] ss:$16 sps:$4 sm:$0xff]   ;;  %v13206_v26 = vld [vmem:[#allocation2 + $0x1fa4] ss:$16 sps:$4 sm:$0xff]  }
 0x3f3   : > { %7903 = vmatprep.subr.bf16.mxu0 %v13140_v47  ;;  %8075 = vmatprep.subr.bf16.mxu1 %v13143_v49  ;;  %v13209_v47 = vld [vmem:[#allocation2 + $0x1fac] ss:$16 sps:$4 sm:$0xff]   ;;  %v13204_v49 = vld [vmem:[#allocation2 + $0x1fa0] ss:$16 sps:$4 sm:$0xff]  }
 0x3f6   : > { %7904 = vmatpush1.bf16.msra.mxu0 %v13138_v5  ;;  %8076 = vmatpush1.bf16.msra.mxu1 %v13141_v6  ;;  %v13207_v5 = vld [vmem:[#allocation2 + $0x1fa8] ss:$16 sps:$4 sm:$0xff]   ;;  %v6467_v6 = vshrl.u32 %v13919_v43, 16 }
 0x3f7   : > { %7905 = vmatprep.subr.bf16.mxu0 %v13146_v9  ;;  %8077 = vmatprep.subr.bf16.mxu1 %v13149_v11  ;;  %v13212_v9 = vld [vmem:[#allocation2 + $0x1fc4] ss:$16 sps:$4 sm:$0xff]   ;;  %v13215_v11 = vld [vmem:[#allocation2 + $0x1fcc] ss:$16 sps:$4 sm:$0xff]  }
 0x3fa   : > { %7906 = vmatpush1.bf16.msra.mxu0 %v13144_v19  ;;  %8078 = vmatpush1.bf16.msra.mxu1 %v13147_v22  ;;  %v13210_v19 = vld [vmem:[#allocation2 + $0x1fc0] ss:$16 sps:$4 sm:$0xff]   ;;  %v13213_v22 = vld [vmem:[#allocation2 + $0x1fc8] ss:$16 sps:$4 sm:$0xff]  }
 0x3fb   : > { %7907 = vmatprep.subr.bf16.mxu0 %v13152_v23  ;;  %8079 = vmatprep.subr.bf16.mxu1 %v13155_v27  ;;  %v6464_v23 = vrot.slane %v951_v55, 1  ;;  %v6465_v27 = vrot.slane %v953_v50, 2  ;;  %v13224_v55 = vld [vmem:[#allocation2 + $0x2004] ss:$16 sps:$4 sm:$0xff]   ;;  %v8383_v50 = vrot.slane %v13763_v53, 2 }
 0x3fc   : > { %v13228_v53 = vld [vmem:[#allocation2 + $0x2020] ss:$16 sps:$4 sm:$0xff]  }
 0x3fe   : > { %7908 = vmatpush1.bf16.msra.mxu0 %v13150_v28  ;;  %8080 = vmatpush1.bf16.msra.mxu1 %v13153_v29  ;;  %v6469_v28 = vrot.slane %v6467_v6, 1  ;;  %v6470_v29 = vrot.slane %v958_v18, 2  ;;  %v13222_v18 = vld [vmem:[#allocation2 + $0x2000] ss:$16 sps:$4 sm:$0xff]   ;;  %v13267_v6 = vld [vmem:[#allocation2 + $0x20e8] ss:$16 sps:$4 sm:$0xff]  }
 0x3ff   : > { %7909 = vmatprep.subr.bf16.mxu0 %v13158_v13  ;;  %8081 = vmatprep.subr.bf16.mxu1 %v13161_v8  ;;  %v13218_v13 = vld [vmem:[#allocation2 + $0x1fe4] ss:$16 sps:$4 sm:$0xff]   ;;  %v13221_v8 = vld [vmem:[#allocation2 + $0x1fec] ss:$16 sps:$4 sm:$0xff]  }
 0x402   : > { %7910 = vmatpush1.bf16.msra.mxu0 %v13156_v30  ;;  %8082 = vmatpush1.bf16.msra.mxu1 %v13159_v31  ;;  %v13216_v30 = vld [vmem:[#allocation2 + $0x1fe0] ss:$16 sps:$4 sm:$0xff]   ;;  %v13219_v31 = vld [vmem:[#allocation2 + $0x1fe8] ss:$16 sps:$4 sm:$0xff]  }
 0x403   : > { %7911 = vmatprep.subr.bf16.mxu0 %v13164_v15  ;;  %8083 = vmatprep.subr.bf16.mxu1 %v13167_v32  ;;  %v6466_v15 = vor.u32 %v6465_v27, %v6464_v23  ;;  %v6471_v32 = vor.u32 %v6470_v29, %v6469_v28  ;;  %v13278_v23 = vld [vmem:[#allocation2 + $0x2124] ss:$16 sps:$4 sm:$0xff]   ;;  %v13281_v27 = vld [vmem:[#allocation2 + $0x212c] ss:$16 sps:$4 sm:$0xff]   ;;  %v13276_v28 = vld [vmem:[#allocation2 + $0x2120] ss:$16 sps:$4 sm:$0xff]  }
 0x404   : > { %v13279_v29 = vld [vmem:[#allocation2 + $0x2128] ss:$16 sps:$4 sm:$0xff]  }
 0x406   : > { %7912 = vmatpush1.bf16.msra.mxu0 %v13162_v35  ;;  %8084 = vmatpush1.bf16.msra.mxu1 %v13165_v37  ;;  %v13227_v35 = vld [vmem:[#allocation2 + $0x200c] ss:$16 sps:$4 sm:$0xff]   ;;  %v8384_v37 = vrot.slane %v13765_v54, 2  ;;  %v13236_v54 = vld [vmem:[#allocation2 + $0x2044] ss:$16 sps:$4 sm:$0xff]  }
 0x407   : > { %7913 = vmatprep.subr.bf16.mxu0 %v13170_v40  ;;  %8085 = vmatprep.subr.bf16.mxu1 %v13173_v1  ;;  %v13225_v40 = vld [vmem:[#allocation2 + $0x2008] ss:$16 sps:$4 sm:$0xff]   ;;  %v6472_v1 = vsel %vm6409_vm2, %v6466_v15, %v6471_v32  ;;  %v13290_v15 = vld [vmem:[#allocation2 + $0x2164] ss:$16 sps:$4 sm:$0xff]   ;;  %v13293_v32 = vld [vmem:[#allocation2 + $0x216c] ss:$16 sps:$4 sm:$0xff]  }
 0x40a   : > { %7914 = vmatpush1.bf16.msra.mxu0 %v13168_v2  ;;  %8086 = vmatpush1.bf16.msra.mxu1 %v13171_v42  ;;  %v13230_v2 = vld [vmem:[#allocation2 + $0x2024] ss:$16 sps:$4 sm:$0xff]   ;;  %v13233_v42 = vld [vmem:[#allocation2 + $0x202c] ss:$16 sps:$4 sm:$0xff]  }
 0x40b   : > { %7915 = vmatprep.subr.bf16.mxu0 %v13176_v3  ;;  %8087 = vmatprep.subr.bf16.mxu1 %v13179_v51  ;;  %v8385_v3 = vsel %vm8379_vm3, %v8383_v50, %v8384_v37  ;;  %v13231_v51 = vld [vmem:[#allocation2 + $0x2028] ss:$16 sps:$4 sm:$0xff]   ;;  %v13296_v50 = vld [vmem:[#allocation2 + $0x2184] ss:$16 sps:$4 sm:$0xff]   ;;  %v13299_v37 = vld [vmem:[#allocation2 + $0x218c] ss:$16 sps:$4 sm:$0xff]  }
 0x40e   : > { %7916 = vmatpush1.bf16.msra.mxu0 %v13174_v44  ;;  %8088 = vmatpush1.bf16.msra.mxu1 %v13177_v39  ;;  %v13239_v44 = vld [vmem:[#allocation2 + $0x204c] ss:$16 sps:$4 sm:$0xff]   ;;  %v13234_v39 = vld [vmem:[#allocation2 + $0x2040] ss:$16 sps:$4 sm:$0xff]  }
 0x40f   : > { %7917 = vmatprep.subr.bf16.mxu0 %v13182_v17  ;;  %8089 = vmatprep.subr.bf16.mxu1 %v13185_v16  ;;  %v13237_v17 = vld [vmem:[#allocation2 + $0x2048] ss:$16 sps:$4 sm:$0xff]   ;;  %v13242_v16 = vld [vmem:[#allocation2 + $0x2064] ss:$16 sps:$4 sm:$0xff]  }
 0x412   : > { %7918 = vmatpush1.bf16.msra.mxu0 %v13180_v56  ;;  %8090 = vmatpush1.bf16.msra.mxu1 %v13183_v52  ;;  %v13245_v56 = vld [vmem:[#allocation2 + $0x206c] ss:$16 sps:$4 sm:$0xff]   ;;  %v13240_v52 = vld [vmem:[#allocation2 + $0x2060] ss:$16 sps:$4 sm:$0xff]  }
 0x413   : > { %7919 = vmatprep.subr.bf16.mxu0 %v13188_v4  ;;  %8091 = vmatprep.subr.bf16.mxu1 %v13191_v46  ;;  %v13243_v4 = vld [vmem:[#allocation2 + $0x2068] ss:$16 sps:$4 sm:$0xff]   ;;  %v13248_v46 = vld [vmem:[#allocation2 + $0x2084] ss:$16 sps:$4 sm:$0xff]  }
 0x416   : > { %7920 = vmatpush1.bf16.msra.mxu0 %v13186_v57  ;;  %8092 = vmatpush1.bf16.msra.mxu1 %v13189_v41  ;;  %v13251_v57 = vld [vmem:[#allocation2 + $0x208c] ss:$16 sps:$4 sm:$0xff]   ;;  %v13246_v41 = vld [vmem:[#allocation2 + $0x2080] ss:$16 sps:$4 sm:$0xff]  }
 0x417   : > { %7921 = vmatprep.subr.bf16.mxu0 %v13194_v58  ;;  %8093 = vmatprep.subr.bf16.mxu1 %v13197_v10  ;;  %v13249_v58 = vld [vmem:[#allocation2 + $0x2088] ss:$16 sps:$4 sm:$0xff]   ;;  %v13254_v10 = vld [vmem:[#allocation2 + $0x20a4] ss:$16 sps:$4 sm:$0xff]  }
 0x41a   : > { %7922 = vmatpush1.bf16.msra.mxu0 %v13192_v63  ;;  %8094 = vmatpush1.bf16.msra.mxu1 %v13195_v45  ;;  %v13257_v63 = vld [vmem:[#allocation2 + $0x20ac] ss:$16 sps:$4 sm:$0xff]   ;;  %v13252_v45 = vld [vmem:[#allocation2 + $0x20a0] ss:$16 sps:$4 sm:$0xff]  }
 0x41b   : > { %7923 = vmatprep.subr.bf16.mxu0 %v13200_v12  ;;  %8095 = vmatprep.subr.bf16.mxu1 %v13203_v24  ;;  %v13255_v12 = vld [vmem:[#allocation2 + $0x20a8] ss:$16 sps:$4 sm:$0xff]   ;;  %v13260_v24 = vld [vmem:[#allocation2 + $0x20c4] ss:$16 sps:$4 sm:$0xff]  }
 0x41e   : > { %7924 = vmatpush1.bf16.msra.mxu0 %v13198_v25  ;;  %8096 = vmatpush1.bf16.msra.mxu1 %v13201_v59  ;;  %v13263_v25 = vld [vmem:[#allocation2 + $0x20cc] ss:$16 sps:$4 sm:$0xff]   ;;  %v13258_v59 = vld [vmem:[#allocation2 + $0x20c0] ss:$16 sps:$4 sm:$0xff]  }
 0x41f   : > { %7925 = vmatprep.subr.bf16.mxu0 %v13206_v26  ;;  %8097 = vmatprep.subr.bf16.mxu1 %v13209_v47  ;;  %v13261_v26 = vld [vmem:[#allocation2 + $0x20c8] ss:$16 sps:$4 sm:$0xff]   ;;  %v13266_v47 = vld [vmem:[#allocation2 + $0x20e4] ss:$16 sps:$4 sm:$0xff]  }
 0x422   : > { %7926 = vmatpush1.bf16.msra.mxu0 %v13204_v49  ;;  %8098 = vmatpush1.bf16.msra.mxu1 %v13207_v5  ;;  %v13269_v49 = vld [vmem:[#allocation2 + $0x20ec] ss:$16 sps:$4 sm:$0xff]   ;;  %v13264_v5 = vld [vmem:[#allocation2 + $0x20e0] ss:$16 sps:$4 sm:$0xff]  }
 0x423   : > { %7927 = vmatprep.subr.bf16.mxu0 %v13212_v9  ;;  %8099 = vmatprep.subr.bf16.mxu1 %v13215_v11  ;;  %v13272_v9 = vld [vmem:[#allocation2 + $0x2104] ss:$16 sps:$4 sm:$0xff]   ;;  %v13275_v11 = vld [vmem:[#allocation2 + $0x210c] ss:$16 sps:$4 sm:$0xff]  }
 0x426   : > { %7928 = vmatpush1.bf16.msra.mxu0 %v13210_v19  ;;  %8100 = vmatpush1.bf16.msra.mxu1 %v13213_v22  ;;  %v13270_v19 = vld [vmem:[#allocation2 + $0x2100] ss:$16 sps:$4 sm:$0xff]   ;;  %v13273_v22 = vld [vmem:[#allocation2 + $0x2108] ss:$16 sps:$4 sm:$0xff]  }
 0x427   : > { %7929 = vmatprep.subr.bf16.mxu0 %v13218_v13  ;;  %8101 = vmatprep.subr.bf16.mxu1 %v13221_v8  ;;  %v13284_v13 = vld [vmem:[#allocation2 + $0x2144] ss:$16 sps:$4 sm:$0xff]   ;;  %v13287_v8 = vld [vmem:[#allocation2 + $0x214c] ss:$16 sps:$4 sm:$0xff]  }
 0x42a   : > { %7930 = vmatpush1.bf16.msra.mxu0 %v13216_v30  ;;  %8102 = vmatpush1.bf16.msra.mxu1 %v13219_v31  ;;  %v13282_v30 = vld [vmem:[#allocation2 + $0x2140] ss:$16 sps:$4 sm:$0xff]   ;;  %v13285_v31 = vld [vmem:[#allocation2 + $0x2148] ss:$16 sps:$4 sm:$0xff]  }
 0x42b   : > { %9692 = vmatprep.subr.bf16.mxu0 %v13224_v55  ;;  %9864 = vmatprep.subr.bf16.mxu1 %v13227_v35  ;;  %v13288_v55 = vld [vmem:[#allocation2 + $0x2160] ss:$16 sps:$4 sm:$0xff]   ;;  %v13291_v35 = vld [vmem:[#allocation2 + $0x2168] ss:$16 sps:$4 sm:$0xff]  }
 0x42d   : > { %7932 = vmatmul.mubr.bf16.vlgmr.msra.gmra.mrb[0].mxu0 %v6472_v1  ;;  %8104 = vmatmul.mubr.bf16.vlgmr.msra.gmra.mrb[0].mxu1 %v6472_v1  ;;  %v13302_v1 = vld [vmem:[#allocation2 + $0x21a4] ss:$16 sps:$4 sm:$0xff]  }
 0x42e   : > { %9693 = vmatpush1.bf16.msra.mxu0 %v13222_v18  ;;  %9865 = vmatpush1.bf16.msra.mxu1 %v13225_v40  ;;  %v13294_v18 = vld [vmem:[#allocation2 + $0x2180] ss:$16 sps:$4 sm:$0xff]   ;;  %v13297_v40 = vld [vmem:[#allocation2 + $0x2188] ss:$16 sps:$4 sm:$0xff]  }
 0x42f   : > { %9694 = vmatprep.subr.bf16.mxu0 %v13230_v2  ;;  %9866 = vmatprep.subr.bf16.mxu1 %v13233_v42  ;;  %v13305_v2 = vld [vmem:[#allocation2 + $0x21ac] ss:$16 sps:$4 sm:$0xff]   ;;  %v13300_v42 = vld [vmem:[#allocation2 + $0x21a0] ss:$16 sps:$4 sm:$0xff]  }
 0x430   : > { %9724 = vmatprep.mubr.bf16.mxu0 %v8385_v3  ;;  %9896 = vmatprep.mubr.bf16.mxu1 %v8385_v3  ;;  %v13303_v3 = vld [vmem:[#allocation2 + $0x21a8] ss:$16 sps:$4 sm:$0xff]  }
 0x432   : > { %9695 = vmatpush1.bf16.msra.mxu0 %v13228_v53  ;;  %9867 = vmatpush1.bf16.msra.mxu1 %v13231_v51  ;;  %v13308_v53 = vld [vmem:[#allocation2 + $0x21c4] ss:$16 sps:$4 sm:$0xff]   ;;  %v13311_v51 = vld [vmem:[#allocation2 + $0x21cc] ss:$16 sps:$4 sm:$0xff]  }
 0x433   : > { %9696 = vmatprep.subr.bf16.mxu0 %v13236_v54  ;;  %9868 = vmatprep.subr.bf16.mxu1 %v13239_v44  ;;  %v13306_v54 = vld [vmem:[#allocation2 + $0x21c0] ss:$16 sps:$4 sm:$0xff]   ;;  %v13309_v44 = vld [vmem:[#allocation2 + $0x21c8] ss:$16 sps:$4 sm:$0xff]  }
 0x436   : > { %9697 = vmatpush1.bf16.msra.mxu0 %v13234_v39  ;;  %9869 = vmatpush1.bf16.msra.mxu1 %v13237_v17  ;;  %v13314_v39 = vld [vmem:[#allocation2 + $0x21e4] ss:$16 sps:$4 sm:$0xff]   ;;  %v13317_v17 = vld [vmem:[#allocation2 + $0x21ec] ss:$16 sps:$4 sm:$0xff]  }
 0x437   : > { %9698 = vmatprep.subr.bf16.mxu0 %v13242_v16  ;;  %9870 = vmatprep.subr.bf16.mxu1 %v13245_v56  ;;  %v13312_v16 = vld [vmem:[#allocation2 + $0x21e0] ss:$16 sps:$4 sm:$0xff]   ;;  %v13315_v56 = vld [vmem:[#allocation2 + $0x21e8] ss:$16 sps:$4 sm:$0xff]  }
 0x43a   : > { %9699 = vmatpush1.bf16.msra.mxu0 %v13240_v52  ;;  %9871 = vmatpush1.bf16.msra.mxu1 %v13243_v4  ;;  %v8380_v52 = vrot.slane %v13774_v0, 2  ;;  %v8381_v4 = vrot.slane %v13779_v7, 2  ;;  %v13329_v0 = vld [vmem:[#allocation2 + $0x222c] ss:$16 sps:$4 sm:$0xff]  }
 0x43b   : > { %9700 = vmatprep.subr.bf16.mxu0 %v13248_v46  ;;  %9872 = vmatprep.subr.bf16.mxu1 %v13251_v57  ;;  %v13320_v46 = vld [vmem:[#allocation2 + $0x2204] ss:$16 sps:$4 sm:$0xff]   ;;  %v13323_v57 = vld [vmem:[#allocation2 + $0x220c] ss:$16 sps:$4 sm:$0xff]  }
 0x43e   : > { %9701 = vmatpush1.bf16.msra.mxu0 %v13246_v41  ;;  %9873 = vmatpush1.bf16.msra.mxu1 %v13249_v58  ;;  %v8389_v41 = vrot.slane %v13802_v61, 2  ;;  %v8390_v58 = vrot.slane %v13806_v62, 2  ;;  %v13327_v61 = vld [vmem:[#allocation2 + $0x2228] ss:$16 sps:$4 sm:$0xff]   ;;  %v13332_v62 = vld [vmem:[#allocation2 + $0x2244] ss:$16 sps:$4 sm:$0xff]  }
 0x43f   : > { %9702 = vmatprep.subr.bf16.mxu0 %v13254_v10  ;;  %9874 = vmatprep.subr.bf16.mxu1 %v13257_v63  ;;  %v13318_v10 = vld [vmem:[#allocation2 + $0x2200] ss:$16 sps:$4 sm:$0xff]   ;;  %v13321_v63 = vld [vmem:[#allocation2 + $0x2208] ss:$16 sps:$4 sm:$0xff]  }
 0x440   : > { %v8391_v7 = vsel %vm8379_vm3, %v8389_v41, %v8390_v58  ;;  %v13398_v41 = vld [vmem:[#allocation2 + $0x23a4] ss:$16 sps:$4 sm:$0xff]   ;;  %v13401_v58 = vld [vmem:[#allocation2 + $0x23ac] ss:$16 sps:$4 sm:$0xff]  }
 0x442   : > { %9703 = vmatpush1.bf16.msra.mxu0 %v13252_v45  ;;  %9875 = vmatpush1.bf16.msra.mxu1 %v13255_v12  ;;  %v8382_v45 = vsel %vm8379_vm3, %v8380_v52, %v8381_v4  ;;  %v13326_v12 = vld [vmem:[#allocation2 + $0x2224] ss:$16 sps:$4 sm:$0xff]   ;;  %v13395_v4 = vld [vmem:[#allocation2 + $0x238c] ss:$16 sps:$4 sm:$0xff]  }
 0x443   : > { %9704 = vmatprep.subr.bf16.mxu0 %v13260_v24  ;;  %9876 = vmatprep.subr.bf16.mxu1 %v13263_v25  ;;  %v13324_v24 = vld [vmem:[#allocation2 + $0x2220] ss:$16 sps:$4 sm:$0xff]   ;;  %v13335_v25 = vld [vmem:[#allocation2 + $0x224c] ss:$16 sps:$4 sm:$0xff]   ;;  %v13392_v52 = vld [vmem:[#allocation2 + $0x2384] ss:$16 sps:$4 sm:$0xff]  }
 0x446   : > { %9705 = vmatpush1.bf16.msra.mxu0 %v13258_v59  ;;  %9877 = vmatpush1.bf16.msra.mxu1 %v13261_v26  ;;  %v13330_v59 = vld [vmem:[#allocation2 + $0x2240] ss:$16 sps:$4 sm:$0xff]   ;;  %v13333_v26 = vld [vmem:[#allocation2 + $0x2248] ss:$16 sps:$4 sm:$0xff]  }
 0x447   : > { %9706 = vmatprep.subr.bf16.mxu0 %v13266_v47  ;;  %9878 = vmatprep.subr.bf16.mxu1 %v13269_v49  ;;  %v13338_v47 = vld [vmem:[#allocation2 + $0x2264] ss:$16 sps:$4 sm:$0xff]   ;;  %v13341_v49 = vld [vmem:[#allocation2 + $0x226c] ss:$16 sps:$4 sm:$0xff]  }
 0x44a   : > { %9707 = vmatpush1.bf16.msra.mxu0 %v13264_v5  ;;  %9879 = vmatpush1.bf16.msra.mxu1 %v13267_v6  ;;  %v13336_v5 = vld [vmem:[#allocation2 + $0x2260] ss:$16 sps:$4 sm:$0xff]   ;;  %v13339_v6 = vld [vmem:[#allocation2 + $0x2268] ss:$16 sps:$4 sm:$0xff]  }
 0x44b   : > { %9708 = vmatprep.subr.bf16.mxu0 %v13272_v9  ;;  %9880 = vmatprep.subr.bf16.mxu1 %v13275_v11  ;;  %v13344_v9 = vld [vmem:[#allocation2 + $0x2284] ss:$16 sps:$4 sm:$0xff]   ;;  %v13347_v11 = vld [vmem:[#allocation2 + $0x228c] ss:$16 sps:$4 sm:$0xff]  }
 0x44e   : > { %9709 = vmatpush1.bf16.msra.mxu0 %v13270_v19  ;;  %9881 = vmatpush1.bf16.msra.mxu1 %v13273_v22  ;;  %v13342_v19 = vld [vmem:[#allocation2 + $0x2280] ss:$16 sps:$4 sm:$0xff]   ;;  %v13345_v22 = vld [vmem:[#allocation2 + $0x2288] ss:$16 sps:$4 sm:$0xff]  }
 0x44f   : > { %9710 = vmatprep.subr.bf16.mxu0 %v13278_v23  ;;  %9882 = vmatprep.subr.bf16.mxu1 %v13281_v27  ;;  %v13350_v23 = vld [vmem:[#allocation2 + $0x22a4] ss:$16 sps:$4 sm:$0xff]   ;;  %v13353_v27 = vld [vmem:[#allocation2 + $0x22ac] ss:$16 sps:$4 sm:$0xff]  }
 0x452   : > { %9711 = vmatpush1.bf16.msra.mxu0 %v13276_v28  ;;  %9883 = vmatpush1.bf16.msra.mxu1 %v13279_v29  ;;  %v13348_v28 = vld [vmem:[#allocation2 + $0x22a0] ss:$16 sps:$4 sm:$0xff]   ;;  %v13351_v29 = vld [vmem:[#allocation2 + $0x22a8] ss:$16 sps:$4 sm:$0xff]  }
 0x453   : > { %9712 = vmatprep.subr.bf16.mxu0 %v13284_v13  ;;  %9884 = vmatprep.subr.bf16.mxu1 %v13287_v8  ;;  %v13356_v13 = vld [vmem:[#allocation2 + $0x22c4] ss:$16 sps:$4 sm:$0xff]   ;;  %v13359_v8 = vld [vmem:[#allocation2 + $0x22cc] ss:$16 sps:$4 sm:$0xff]  }
 0x456   : > { %9713 = vmatpush1.bf16.msra.mxu0 %v13282_v30  ;;  %9885 = vmatpush1.bf16.msra.mxu1 %v13285_v31  ;;  %v13354_v30 = vld [vmem:[#allocation2 + $0x22c0] ss:$16 sps:$4 sm:$0xff]   ;;  %v13357_v31 = vld [vmem:[#allocation2 + $0x22c8] ss:$16 sps:$4 sm:$0xff]  }
 0x457   : > { %9714 = vmatprep.subr.bf16.mxu0 %v13290_v15  ;;  %9886 = vmatprep.subr.bf16.mxu1 %v13293_v32  ;;  %v13362_v15 = vld [vmem:[#allocation2 + $0x22e4] ss:$16 sps:$4 sm:$0xff]   ;;  %v13365_v32 = vld [vmem:[#allocation2 + $0x22ec] ss:$16 sps:$4 sm:$0xff]  }
 0x45a   : > { %9715 = vmatpush1.bf16.msra.mxu0 %v13288_v55  ;;  %9887 = vmatpush1.bf16.msra.mxu1 %v13291_v35  ;;  %v13360_v55 = vld [vmem:[#allocation2 + $0x22e0] ss:$16 sps:$4 sm:$0xff]   ;;  %v13363_v35 = vld [vmem:[#allocation2 + $0x22e8] ss:$16 sps:$4 sm:$0xff]  }
 0x45b   : > { %9716 = vmatprep.subr.bf16.mxu0 %v13296_v50  ;;  %9888 = vmatprep.subr.bf16.mxu1 %v13299_v37  ;;  %v13368_v50 = vld [vmem:[#allocation2 + $0x2304] ss:$16 sps:$4 sm:$0xff]   ;;  %v13371_v37 = vld [vmem:[#allocation2 + $0x230c] ss:$16 sps:$4 sm:$0xff]  }
 0x45e   : > { %9717 = vmatpush1.bf16.msra.mxu0 %v13294_v18  ;;  %9889 = vmatpush1.bf16.msra.mxu1 %v13297_v40  ;;  %v13366_v18 = vld [vmem:[#allocation2 + $0x2300] ss:$16 sps:$4 sm:$0xff]   ;;  %v13369_v40 = vld [vmem:[#allocation2 + $0x2308] ss:$16 sps:$4 sm:$0xff]  }
 0x45f   : > { %9718 = vmatprep.subr.bf16.mxu0 %v13302_v1  ;;  %9890 = vmatprep.subr.bf16.mxu1 %v13305_v2  ;;  %v13374_v1 = vld [vmem:[#allocation2 + $0x2324] ss:$16 sps:$4 sm:$0xff]   ;;  %v13377_v2 = vld [vmem:[#allocation2 + $0x232c] ss:$16 sps:$4 sm:$0xff]  }
 0x462   : > { %9719 = vmatpush1.bf16.msra.mxu0 %v13300_v42  ;;  %9891 = vmatpush1.bf16.msra.mxu1 %v13303_v3  ;;  %v13372_v42 = vld [vmem:[#allocation2 + $0x2320] ss:$16 sps:$4 sm:$0xff]   ;;  %v13375_v3 = vld [vmem:[#allocation2 + $0x2328] ss:$16 sps:$4 sm:$0xff]  }
 0x463   : > { %9720 = vmatprep.subr.bf16.mxu0 %v13308_v53  ;;  %9892 = vmatprep.subr.bf16.mxu1 %v13311_v51  ;;  %v13380_v53 = vld [vmem:[#allocation2 + $0x2344] ss:$16 sps:$4 sm:$0xff]   ;;  %v13383_v51 = vld [vmem:[#allocation2 + $0x234c] ss:$16 sps:$4 sm:$0xff]  }
 0x466   : > { %9721 = vmatpush1.bf16.msra.mxu0 %v13306_v54  ;;  %9893 = vmatpush1.bf16.msra.mxu1 %v13309_v44  ;;  %v13378_v54 = vld [vmem:[#allocation2 + $0x2340] ss:$16 sps:$4 sm:$0xff]   ;;  %v13381_v44 = vld [vmem:[#allocation2 + $0x2348] ss:$16 sps:$4 sm:$0xff]  }
 0x467   : > { %9722 = vmatprep.subr.bf16.mxu0 %v13314_v39  ;;  %9894 = vmatprep.subr.bf16.mxu1 %v13317_v17  ;;  %v13386_v39 = vld [vmem:[#allocation2 + $0x2364] ss:$16 sps:$4 sm:$0xff]   ;;  %v13389_v17 = vld [vmem:[#allocation2 + $0x236c] ss:$16 sps:$4 sm:$0xff]  }
 0x46a   : > { %9723 = vmatpush1.bf16.msra.mxu0 %v13312_v16  ;;  %9895 = vmatpush1.bf16.msra.mxu1 %v13315_v56  ;;  %v13384_v16 = vld [vmem:[#allocation2 + $0x2360] ss:$16 sps:$4 sm:$0xff]   ;;  %v13387_v56 = vld [vmem:[#allocation2 + $0x2368] ss:$16 sps:$4 sm:$0xff]  }
 0x46b   : > { %9735 = vmatprep.subr.bf16.mxu0 %v13320_v46  ;;  %9907 = vmatprep.subr.bf16.mxu1 %v13323_v57  ;;  %v13390_v46 = vld [vmem:[#allocation2 + $0x2380] ss:$16 sps:$4 sm:$0xff]   ;;  %v13393_v57 = vld [vmem:[#allocation2 + $0x2388] ss:$16 sps:$4 sm:$0xff]  }
 0x46d   : > { %9725 = vmatmul.mubr.bf16.vlgmr.msra.gmra.mrb[0].mxu0 %v8382_v45  ;;  %9897 = vmatmul.mubr.bf16.vlgmr.msra.gmra.mrb[0].mxu1 %v8382_v45  ;;  %v13404_v45 = vld [vmem:[#allocation2 + $0x23c4] ss:$16 sps:$4 sm:$0xff]  }
 0x46e   : > { %9736 = vmatpush1.bf16.msra.mxu0 %v13318_v10  ;;  %9908 = vmatpush1.bf16.msra.mxu1 %v13321_v63  ;;  %v13396_v10 = vld [vmem:[#allocation2 + $0x23a0] ss:$16 sps:$4 sm:$0xff]   ;;  %v13399_v63 = vld [vmem:[#allocation2 + $0x23a8] ss:$16 sps:$4 sm:$0xff]  }
 0x46f   : > { %9737 = vmatprep.subr.bf16.mxu0 %v13326_v12  ;;  %9909 = vmatprep.subr.bf16.mxu1 %v13329_v0  ;;  %v13407_v12 = vld [vmem:[#allocation2 + $0x23cc] ss:$16 sps:$4 sm:$0xff]   ;;  %v13402_v0 = vld [vmem:[#allocation2 + $0x23c0] ss:$16 sps:$4 sm:$0xff]  }
 0x470   : > { %9767 = vmatprep.mubr.bf16.mxu0 %v8391_v7  ;;  %9939 = vmatprep.mubr.bf16.mxu1 %v8391_v7  ;;  %v13405_v7 = vld [vmem:[#allocation2 + $0x23c8] ss:$16 sps:$4 sm:$0xff]  }
 0x472   : > { %9738 = vmatpush1.bf16.msra.mxu0 %v13324_v24  ;;  %9910 = vmatpush1.bf16.msra.mxu1 %v13327_v61  ;;  %v13410_v24 = vld [vmem:[#allocation2 + $0x23e4] ss:$16 sps:$4 sm:$0xff]   ;;  %v13413_v61 = vld [vmem:[#allocation2 + $0x23ec] ss:$16 sps:$4 sm:$0xff]  }
 0x473   : > { %9739 = vmatprep.subr.bf16.mxu0 %v13332_v62  ;;  %9911 = vmatprep.subr.bf16.mxu1 %v13335_v25  ;;  %v13408_v62 = vld [vmem:[#allocation2 + $0x23e0] ss:$16 sps:$4 sm:$0xff]   ;;  %v13411_v25 = vld [vmem:[#allocation2 + $0x23e8] ss:$16 sps:$4 sm:$0xff]  }
 0x476   : > { %9740 = vmatpush1.bf16.msra.mxu0 %v13330_v59  ;;  %9912 = vmatpush1.bf16.msra.mxu1 %v13333_v26  ;;  %v8386_v59 = vrot.slane %v13819_v33, 2  ;;  %v8387_v26 = vrot.slane %v13823_v38, 2  ;;  %v13425_v33 = vld [vmem:[#allocation2 + $0x242c] ss:$16 sps:$4 sm:$0xff]  }
 0x477   : > { %9741 = vmatprep.subr.bf16.mxu0 %v13338_v47  ;;  %9913 = vmatprep.subr.bf16.mxu1 %v13341_v49  ;;  %v13416_v47 = vld [vmem:[#allocation2 + $0x2404] ss:$16 sps:$4 sm:$0xff]   ;;  %v13419_v49 = vld [vmem:[#allocation2 + $0x240c] ss:$16 sps:$4 sm:$0xff]  }
 0x47a   : > { %9742 = vmatpush1.bf16.msra.mxu0 %v13336_v5  ;;  %9914 = vmatpush1.bf16.msra.mxu1 %v13339_v6  ;;  %v8395_v5 = vrot.slane %v13849_v20, 2  ;;  %v8396_v6 = vrot.slane %v13853_v21, 2  ;;  %v13423_v20 = vld [vmem:[#allocation2 + $0x2428] ss:$16 sps:$4 sm:$0xff]   ;;  %v13428_v21 = vld [vmem:[#allocation2 + $0x2444] ss:$16 sps:$4 sm:$0xff]  }
 0x47b   : > { %9743 = vmatprep.subr.bf16.mxu0 %v13344_v9  ;;  %9915 = vmatprep.subr.bf16.mxu1 %v13347_v11  ;;  %v13414_v9 = vld [vmem:[#allocation2 + $0x2400] ss:$16 sps:$4 sm:$0xff]   ;;  %v13417_v11 = vld [vmem:[#allocation2 + $0x2408] ss:$16 sps:$4 sm:$0xff]  }
 0x47c   : > { %v8397_v38 = vsel %vm8379_vm3, %v8395_v5, %v8396_v6  ;;  %v13500_v5 = vld [vmem:[#allocation2 + $0x25c4] ss:$16 sps:$4 sm:$0xff]   ;;  %v13503_v6 = vld [vmem:[#allocation2 + $0x25cc] ss:$16 sps:$4 sm:$0xff]  }
 0x47e   : > { %9744 = vmatpush1.bf16.msra.mxu0 %v13342_v19  ;;  %9916 = vmatpush1.bf16.msra.mxu1 %v13345_v22  ;;  %v8388_v19 = vsel %vm8379_vm3, %v8386_v59, %v8387_v26  ;;  %v13422_v22 = vld [vmem:[#allocation2 + $0x2424] ss:$16 sps:$4 sm:$0xff]   ;;  %v13497_v26 = vld [vmem:[#allocation2 + $0x25ac] ss:$16 sps:$4 sm:$0xff]  }
 0x47f   : > { %9745 = vmatprep.subr.bf16.mxu0 %v13350_v23  ;;  %9917 = vmatprep.subr.bf16.mxu1 %v13353_v27  ;;  %v13420_v23 = vld [vmem:[#allocation2 + $0x2420] ss:$16 sps:$4 sm:$0xff]   ;;  %v13431_v27 = vld [vmem:[#allocation2 + $0x244c] ss:$16 sps:$4 sm:$0xff]   ;;  %v13494_v59 = vld [vmem:[#allocation2 + $0x25a4] ss:$16 sps:$4 sm:$0xff]  }
 0x482   : > { %9746 = vmatpush1.bf16.msra.mxu0 %v13348_v28  ;;  %9918 = vmatpush1.bf16.msra.mxu1 %v13351_v29  ;;  %v13426_v28 = vld [vmem:[#allocation2 + $0x2440] ss:$16 sps:$4 sm:$0xff]   ;;  %v13429_v29 = vld [vmem:[#allocation2 + $0x2448] ss:$16 sps:$4 sm:$0xff]  }
 0x483   : > { %9747 = vmatprep.subr.bf16.mxu0 %v13356_v13  ;;  %9919 = vmatprep.subr.bf16.mxu1 %v13359_v8  ;;  %v13434_v13 = vld [vmem:[#allocation2 + $0x2464] ss:$16 sps:$4 sm:$0xff]   ;;  %v13437_v8 = vld [vmem:[#allocation2 + $0x246c] ss:$16 sps:$4 sm:$0xff]  }
 0x486   : > { %9748 = vmatpush1.bf16.msra.mxu0 %v13354_v30  ;;  %9920 = vmatpush1.bf16.msra.mxu1 %v13357_v31  ;;  %v13432_v30 = vld [vmem:[#allocation2 + $0x2460] ss:$16 sps:$4 sm:$0xff]   ;;  %v13435_v31 = vld [vmem:[#allocation2 + $0x2468] ss:$16 sps:$4 sm:$0xff]  }
 0x487   : > { %9749 = vmatprep.subr.bf16.mxu0 %v13362_v15  ;;  %9921 = vmatprep.subr.bf16.mxu1 %v13365_v32  ;;  %v13440_v15 = vld [vmem:[#allocation2 + $0x2484] ss:$16 sps:$4 sm:$0xff]   ;;  %v13443_v32 = vld [vmem:[#allocation2 + $0x248c] ss:$16 sps:$4 sm:$0xff]  }
 0x48a   : > { %9750 = vmatpush1.bf16.msra.mxu0 %v13360_v55  ;;  %9922 = vmatpush1.bf16.msra.mxu1 %v13363_v35  ;;  %v13438_v55 = vld [vmem:[#allocation2 + $0x2480] ss:$16 sps:$4 sm:$0xff]   ;;  %v13441_v35 = vld [vmem:[#allocation2 + $0x2488] ss:$16 sps:$4 sm:$0xff]  }
 0x48b   : > { %9751 = vmatprep.subr.bf16.mxu0 %v13368_v50  ;;  %9923 = vmatprep.subr.bf16.mxu1 %v13371_v37  ;;  %v13446_v50 = vld [vmem:[#allocation2 + $0x24a4] ss:$16 sps:$4 sm:$0xff]   ;;  %v13449_v37 = vld [vmem:[#allocation2 + $0x24ac] ss:$16 sps:$4 sm:$0xff]  }
 0x48e   : > { %9752 = vmatpush1.bf16.msra.mxu0 %v13366_v18  ;;  %9924 = vmatpush1.bf16.msra.mxu1 %v13369_v40  ;;  %v13444_v18 = vld [vmem:[#allocation2 + $0x24a0] ss:$16 sps:$4 sm:$0xff]   ;;  %v13447_v40 = vld [vmem:[#allocation2 + $0x24a8] ss:$16 sps:$4 sm:$0xff]  }
 0x48f   : > { %9753 = vmatprep.subr.bf16.mxu0 %v13374_v1  ;;  %9925 = vmatprep.subr.bf16.mxu1 %v13377_v2  ;;  %v13452_v1 = vld [vmem:[#allocation2 + $0x24c4] ss:$16 sps:$4 sm:$0xff]   ;;  %v13455_v2 = vld [vmem:[#allocation2 + $0x24cc] ss:$16 sps:$4 sm:$0xff]  }
 0x492   : > { %9754 = vmatpush1.bf16.msra.mxu0 %v13372_v42  ;;  %9926 = vmatpush1.bf16.msra.mxu1 %v13375_v3  ;;  %v13450_v42 = vld [vmem:[#allocation2 + $0x24c0] ss:$16 sps:$4 sm:$0xff]   ;;  %v13453_v3 = vld [vmem:[#allocation2 + $0x24c8] ss:$16 sps:$4 sm:$0xff]  }
 0x493   : > { %9755 = vmatprep.subr.bf16.mxu0 %v13380_v53  ;;  %9927 = vmatprep.subr.bf16.mxu1 %v13383_v51  ;;  %v13458_v53 = vld [vmem:[#allocation2 + $0x24e4] ss:$16 sps:$4 sm:$0xff]   ;;  %v13461_v51 = vld [vmem:[#allocation2 + $0x24ec] ss:$16 sps:$4 sm:$0xff]  }
 0x496   : > { %9756 = vmatpush1.bf16.msra.mxu0 %v13378_v54  ;;  %9928 = vmatpush1.bf16.msra.mxu1 %v13381_v44  ;;  %v13456_v54 = vld [vmem:[#allocation2 + $0x24e0] ss:$16 sps:$4 sm:$0xff]   ;;  %v13459_v44 = vld [vmem:[#allocation2 + $0x24e8] ss:$16 sps:$4 sm:$0xff]  }
 0x497   : > { %9757 = vmatprep.subr.bf16.mxu0 %v13386_v39  ;;  %9929 = vmatprep.subr.bf16.mxu1 %v13389_v17  ;;  %v13464_v39 = vld [vmem:[#allocation2 + $0x2504] ss:$16 sps:$4 sm:$0xff]   ;;  %v13467_v17 = vld [vmem:[#allocation2 + $0x250c] ss:$16 sps:$4 sm:$0xff]  }
 0x49a   : > { %9758 = vmatpush1.bf16.msra.mxu0 %v13384_v16  ;;  %9930 = vmatpush1.bf16.msra.mxu1 %v13387_v56  ;;  %v13462_v16 = vld [vmem:[#allocation2 + $0x2500] ss:$16 sps:$4 sm:$0xff]   ;;  %v13465_v56 = vld [vmem:[#allocation2 + $0x2508] ss:$16 sps:$4 sm:$0xff]  }
 0x49b   : > { %9759 = vmatprep.subr.bf16.mxu0 %v13392_v52  ;;  %9931 = vmatprep.subr.bf16.mxu1 %v13395_v4  ;;  %v13470_v52 = vld [vmem:[#allocation2 + $0x2524] ss:$16 sps:$4 sm:$0xff]   ;;  %v13473_v4 = vld [vmem:[#allocation2 + $0x252c] ss:$16 sps:$4 sm:$0xff]  }
 0x49e   : > { %9760 = vmatpush1.bf16.msra.mxu0 %v13390_v46  ;;  %9932 = vmatpush1.bf16.msra.mxu1 %v13393_v57  ;;  %v13468_v46 = vld [vmem:[#allocation2 + $0x2520] ss:$16 sps:$4 sm:$0xff]   ;;  %v13471_v57 = vld [vmem:[#allocation2 + $0x2528] ss:$16 sps:$4 sm:$0xff]  }
 0x49f   : > { %9761 = vmatprep.subr.bf16.mxu0 %v13398_v41  ;;  %9933 = vmatprep.subr.bf16.mxu1 %v13401_v58  ;;  %v13476_v41 = vld [vmem:[#allocation2 + $0x2544] ss:$16 sps:$4 sm:$0xff]   ;;  %v13479_v58 = vld [vmem:[#allocation2 + $0x254c] ss:$16 sps:$4 sm:$0xff]  }
 0x4a2   : > { %9762 = vmatpush1.bf16.msra.mxu0 %v13396_v10  ;;  %9934 = vmatpush1.bf16.msra.mxu1 %v13399_v63  ;;  %v13474_v10 = vld [vmem:[#allocation2 + $0x2540] ss:$16 sps:$4 sm:$0xff]   ;;  %v13477_v63 = vld [vmem:[#allocation2 + $0x2548] ss:$16 sps:$4 sm:$0xff]  }
 0x4a3   : > { %9763 = vmatprep.subr.bf16.mxu0 %v13404_v45  ;;  %9935 = vmatprep.subr.bf16.mxu1 %v13407_v12  ;;  %v13482_v45 = vld [vmem:[#allocation2 + $0x2564] ss:$16 sps:$4 sm:$0xff]   ;;  %v13485_v12 = vld [vmem:[#allocation2 + $0x256c] ss:$16 sps:$4 sm:$0xff]  }
 0x4a6   : > { %9764 = vmatpush1.bf16.msra.mxu0 %v13402_v0  ;;  %9936 = vmatpush1.bf16.msra.mxu1 %v13405_v7  ;;  %v13480_v0 = vld [vmem:[#allocation2 + $0x2560] ss:$16 sps:$4 sm:$0xff]   ;;  %v13483_v7 = vld [vmem:[#allocation2 + $0x2568] ss:$16 sps:$4 sm:$0xff]  }
 0x4a7   : > { %9765 = vmatprep.subr.bf16.mxu0 %v13410_v24  ;;  %9937 = vmatprep.subr.bf16.mxu1 %v13413_v61  ;;  %v13488_v24 = vld [vmem:[#allocation2 + $0x2584] ss:$16 sps:$4 sm:$0xff]   ;;  %v13491_v61 = vld [vmem:[#allocation2 + $0x258c] ss:$16 sps:$4 sm:$0xff]  }
 0x4aa   : > { %9766 = vmatpush1.bf16.msra.mxu0 %v13408_v62  ;;  %9938 = vmatpush1.bf16.msra.mxu1 %v13411_v25  ;;  %v13486_v62 = vld [vmem:[#allocation2 + $0x2580] ss:$16 sps:$4 sm:$0xff]   ;;  %v13489_v25 = vld [vmem:[#allocation2 + $0x2588] ss:$16 sps:$4 sm:$0xff]  }
 0x4ab   : > { %9778 = vmatprep.subr.bf16.mxu0 %v13416_v47  ;;  %9950 = vmatprep.subr.bf16.mxu1 %v13419_v49  ;;  %v13492_v47 = vld [vmem:[#allocation2 + $0x25a0] ss:$16 sps:$4 sm:$0xff]   ;;  %v13495_v49 = vld [vmem:[#allocation2 + $0x25a8] ss:$16 sps:$4 sm:$0xff]  }
 0x4ad   : > { %9768 = vmatmul.mubr.bf16.vlgmr.msra.gmra.mrb[0].mxu0 %v8388_v19  ;;  %9940 = vmatmul.mubr.bf16.vlgmr.msra.gmra.mrb[0].mxu1 %v8388_v19  ;;  %v13506_v19 = vld [vmem:[#allocation2 + $0x25e4] ss:$16 sps:$4 sm:$0xff]  }
 0x4ae   : > { %9779 = vmatpush1.bf16.msra.mxu0 %v13414_v9  ;;  %9951 = vmatpush1.bf16.msra.mxu1 %v13417_v11  ;;  %v13498_v9 = vld [vmem:[#allocation2 + $0x25c0] ss:$16 sps:$4 sm:$0xff]   ;;  %v13501_v11 = vld [vmem:[#allocation2 + $0x25c8] ss:$16 sps:$4 sm:$0xff]  }
 0x4af   : > { %9780 = vmatprep.subr.bf16.mxu0 %v13422_v22  ;;  %9952 = vmatprep.subr.bf16.mxu1 %v13425_v33  ;;  %v13509_v22 = vld [vmem:[#allocation2 + $0x25ec] ss:$16 sps:$4 sm:$0xff]   ;;  %v13504_v33 = vld [vmem:[#allocation2 + $0x25e0] ss:$16 sps:$4 sm:$0xff]  }
 0x4b0   : > { %9810 = vmatprep.mubr.bf16.mxu0 %v8397_v38  ;;  %9982 = vmatprep.mubr.bf16.mxu1 %v8397_v38  ;;  %v13507_v38 = vld [vmem:[#allocation2 + $0x25e8] ss:$16 sps:$4 sm:$0xff]  }
 0x4b2   : > { %9781 = vmatpush1.bf16.msra.mxu0 %v13420_v23  ;;  %9953 = vmatpush1.bf16.msra.mxu1 %v13423_v20  ;;  %v8392_v23 = vrot.slane %v13867_v36, 2  ;;  %v8393_v20 = vrot.slane %v13884_v14, 2  ;;  %v13521_v36 = vld [vmem:[#allocation2 + $0x262c] ss:$16 sps:$4 sm:$0xff]  }
 0x4b3   : > { %9782 = vmatprep.subr.bf16.mxu0 %v13428_v21  ;;  %9954 = vmatprep.subr.bf16.mxu1 %v13431_v27  ;;  %v13512_v21 = vld [vmem:[#allocation2 + $0x2604] ss:$16 sps:$4 sm:$0xff]   ;;  %v13515_v27 = vld [vmem:[#allocation2 + $0x260c] ss:$16 sps:$4 sm:$0xff]  }
 0x4b6   : > { %9783 = vmatpush1.bf16.msra.mxu0 %v13426_v28  ;;  %9955 = vmatpush1.bf16.msra.mxu1 %v13429_v29  ;;  %v8401_v28 = vrot.slane %v13880_v48, 2  ;;  %v8402_v29 = vrot.slane %v13892_v60, 2  ;;  %v13519_v48 = vld [vmem:[#allocation2 + $0x2628] ss:$16 sps:$4 sm:$0xff]   ;;  %v13524_v60 = vld [vmem:[#allocation2 + $0x2644] ss:$16 sps:$4 sm:$0xff]  }
 0x4b7   : > { %9784 = vmatprep.subr.bf16.mxu0 %v13434_v13  ;;  %9956 = vmatprep.subr.bf16.mxu1 %v13437_v8  ;;  %v13510_v13 = vld [vmem:[#allocation2 + $0x2600] ss:$16 sps:$4 sm:$0xff]   ;;  %v13513_v8 = vld [vmem:[#allocation2 + $0x2608] ss:$16 sps:$4 sm:$0xff]  }
 0x4b8   : > { %v8403_v14 = vsel %vm8379_vm3, %v8401_v28, %v8402_v29  ;;  %v13602_v28 = vld [vmem:[#allocation2 + $0x27e4] ss:$16 sps:$4 sm:$0xff]   ;;  %v13605_v29 = vld [vmem:[#allocation2 + $0x27ec] ss:$16 sps:$4 sm:$0xff]  }
 0x4ba   : > { %9785 = vmatpush1.bf16.msra.mxu0 %v13432_v30  ;;  %9957 = vmatpush1.bf16.msra.mxu1 %v13435_v31  ;;  %v8394_v30 = vsel %vm8379_vm3, %v8392_v23, %v8393_v20  ;;  %v13518_v31 = vld [vmem:[#allocation2 + $0x2624] ss:$16 sps:$4 sm:$0xff]   ;;  %v13599_v20 = vld [vmem:[#allocation2 + $0x27cc] ss:$16 sps:$4 sm:$0xff]  }
 0x4bb   : > { %9786 = vmatprep.subr.bf16.mxu0 %v13440_v15  ;;  %9958 = vmatprep.subr.bf16.mxu1 %v13443_v32  ;;  %v13516_v15 = vld [vmem:[#allocation2 + $0x2620] ss:$16 sps:$4 sm:$0xff]   ;;  %v13527_v32 = vld [vmem:[#allocation2 + $0x264c] ss:$16 sps:$4 sm:$0xff]   ;;  %v13596_v23 = vld [vmem:[#allocation2 + $0x27c4] ss:$16 sps:$4 sm:$0xff]  }
 0x4be   : > { %9787 = vmatpush1.bf16.msra.mxu0 %v13438_v55  ;;  %9959 = vmatpush1.bf16.msra.mxu1 %v13441_v35  ;;  %v13522_v55 = vld [vmem:[#allocation2 + $0x2640] ss:$16 sps:$4 sm:$0xff]   ;;  %v13525_v35 = vld [vmem:[#allocation2 + $0x2648] ss:$16 sps:$4 sm:$0xff]  }
 0x4bf   : > { %9788 = vmatprep.subr.bf16.mxu0 %v13446_v50  ;;  %9960 = vmatprep.subr.bf16.mxu1 %v13449_v37  ;;  %v13530_v50 = vld [vmem:[#allocation2 + $0x2664] ss:$16 sps:$4 sm:$0xff]   ;;  %v13533_v37 = vld [vmem:[#allocation2 + $0x266c] ss:$16 sps:$4 sm:$0xff]  }
 0x4c2   : > { %9789 = vmatpush1.bf16.msra.mxu0 %v13444_v18  ;;  %9961 = vmatpush1.bf16.msra.mxu1 %v13447_v40  ;;  %v13528_v18 = vld [vmem:[#allocation2 + $0x2660] ss:$16 sps:$4 sm:$0xff]   ;;  %v13531_v40 = vld [vmem:[#allocation2 + $0x2668] ss:$16 sps:$4 sm:$0xff]  }
 0x4c3   : > { %9790 = vmatprep.subr.bf16.mxu0 %v13452_v1  ;;  %9962 = vmatprep.subr.bf16.mxu1 %v13455_v2  ;;  %v13536_v1 = vld [vmem:[#allocation2 + $0x2684] ss:$16 sps:$4 sm:$0xff]   ;;  %v13539_v2 = vld [vmem:[#allocation2 + $0x268c] ss:$16 sps:$4 sm:$0xff]  }
 0x4c6   : > { %9791 = vmatpush1.bf16.msra.mxu0 %v13450_v42  ;;  %9963 = vmatpush1.bf16.msra.mxu1 %v13453_v3  ;;  %v13534_v42 = vld [vmem:[#allocation2 + $0x2680] ss:$16 sps:$4 sm:$0xff]   ;;  %v13537_v3 = vld [vmem:[#allocation2 + $0x2688] ss:$16 sps:$4 sm:$0xff]  }
 0x4c7   : > { %9792 = vmatprep.subr.bf16.mxu0 %v13458_v53  ;;  %9964 = vmatprep.subr.bf16.mxu1 %v13461_v51  ;;  %v13542_v53 = vld [vmem:[#allocation2 + $0x26a4] ss:$16 sps:$4 sm:$0xff]   ;;  %v13545_v51 = vld [vmem:[#allocation2 + $0x26ac] ss:$16 sps:$4 sm:$0xff]  }
 0x4ca   : > { %9793 = vmatpush1.bf16.msra.mxu0 %v13456_v54  ;;  %9965 = vmatpush1.bf16.msra.mxu1 %v13459_v44  ;;  %v13540_v54 = vld [vmem:[#allocation2 + $0x26a0] ss:$16 sps:$4 sm:$0xff]   ;;  %v13543_v44 = vld [vmem:[#allocation2 + $0x26a8] ss:$16 sps:$4 sm:$0xff]  }
 0x4cb   : > { %9794 = vmatprep.subr.bf16.mxu0 %v13464_v39  ;;  %9966 = vmatprep.subr.bf16.mxu1 %v13467_v17  ;;  %v13548_v39 = vld [vmem:[#allocation2 + $0x26c4] ss:$16 sps:$4 sm:$0xff]   ;;  %v13551_v17 = vld [vmem:[#allocation2 + $0x26cc] ss:$16 sps:$4 sm:$0xff]  }
 0x4ce   : > { %9795 = vmatpush1.bf16.msra.mxu0 %v13462_v16  ;;  %9967 = vmatpush1.bf16.msra.mxu1 %v13465_v56  ;;  %v13546_v16 = vld [vmem:[#allocation2 + $0x26c0] ss:$16 sps:$4 sm:$0xff]   ;;  %v13549_v56 = vld [vmem:[#allocation2 + $0x26c8] ss:$16 sps:$4 sm:$0xff]  }
 0x4cf   : > { %9796 = vmatprep.subr.bf16.mxu0 %v13470_v52  ;;  %9968 = vmatprep.subr.bf16.mxu1 %v13473_v4  ;;  %v13554_v52 = vld [vmem:[#allocation2 + $0x26e4] ss:$16 sps:$4 sm:$0xff]   ;;  %v13557_v4 = vld [vmem:[#allocation2 + $0x26ec] ss:$16 sps:$4 sm:$0xff]  }
 0x4d2   : > { %9797 = vmatpush1.bf16.msra.mxu0 %v13468_v46  ;;  %9969 = vmatpush1.bf16.msra.mxu1 %v13471_v57  ;;  %v13552_v46 = vld [vmem:[#allocation2 + $0x26e0] ss:$16 sps:$4 sm:$0xff]   ;;  %v13555_v57 = vld [vmem:[#allocation2 + $0x26e8] ss:$16 sps:$4 sm:$0xff]  }
 0x4d3   : > { %9798 = vmatprep.subr.bf16.mxu0 %v13476_v41  ;;  %9970 = vmatprep.subr.bf16.mxu1 %v13479_v58  ;;  %v13560_v41 = vld [vmem:[#allocation2 + $0x2704] ss:$16 sps:$4 sm:$0xff]   ;;  %v13563_v58 = vld [vmem:[#allocation2 + $0x270c] ss:$16 sps:$4 sm:$0xff]  }
 0x4d6   : > { %9799 = vmatpush1.bf16.msra.mxu0 %v13474_v10  ;;  %9971 = vmatpush1.bf16.msra.mxu1 %v13477_v63  ;;  %v13558_v10 = vld [vmem:[#allocation2 + $0x2700] ss:$16 sps:$4 sm:$0xff]   ;;  %v13561_v63 = vld [vmem:[#allocation2 + $0x2708] ss:$16 sps:$4 sm:$0xff]  }
 0x4d7   : > { %9800 = vmatprep.subr.bf16.mxu0 %v13482_v45  ;;  %9972 = vmatprep.subr.bf16.mxu1 %v13485_v12  ;;  %v13566_v45 = vld [vmem:[#allocation2 + $0x2724] ss:$16 sps:$4 sm:$0xff]   ;;  %v13569_v12 = vld [vmem:[#allocation2 + $0x272c] ss:$16 sps:$4 sm:$0xff]  }
 0x4da   : > { %9801 = vmatpush1.bf16.msra.mxu0 %v13480_v0  ;;  %9973 = vmatpush1.bf16.msra.mxu1 %v13483_v7  ;;  %v13564_v0 = vld [vmem:[#allocation2 + $0x2720] ss:$16 sps:$4 sm:$0xff]   ;;  %v13567_v7 = vld [vmem:[#allocation2 + $0x2728] ss:$16 sps:$4 sm:$0xff]  }
 0x4db   : > { %9802 = vmatprep.subr.bf16.mxu0 %v13488_v24  ;;  %9974 = vmatprep.subr.bf16.mxu1 %v13491_v61  ;;  %v13572_v24 = vld [vmem:[#allocation2 + $0x2744] ss:$16 sps:$4 sm:$0xff]   ;;  %v13575_v61 = vld [vmem:[#allocation2 + $0x274c] ss:$16 sps:$4 sm:$0xff]  }
 0x4de   : > { %9803 = vmatpush1.bf16.msra.mxu0 %v13486_v62  ;;  %9975 = vmatpush1.bf16.msra.mxu1 %v13489_v25  ;;  %v13570_v62 = vld [vmem:[#allocation2 + $0x2740] ss:$16 sps:$4 sm:$0xff]   ;;  %v13573_v25 = vld [vmem:[#allocation2 + $0x2748] ss:$16 sps:$4 sm:$0xff]  }
 0x4df   : > { %9804 = vmatprep.subr.bf16.mxu0 %v13494_v59  ;;  %9976 = vmatprep.subr.bf16.mxu1 %v13497_v26  ;;  %v13578_v59 = vld [vmem:[#allocation2 + $0x2764] ss:$16 sps:$4 sm:$0xff]   ;;  %v13581_v26 = vld [vmem:[#allocation2 + $0x276c] ss:$16 sps:$4 sm:$0xff]  }
 0x4e2   : > { %9805 = vmatpush1.bf16.msra.mxu0 %v13492_v47  ;;  %9977 = vmatpush1.bf16.msra.mxu1 %v13495_v49  ;;  %v13576_v47 = vld [vmem:[#allocation2 + $0x2760] ss:$16 sps:$4 sm:$0xff]   ;;  %v13579_v49 = vld [vmem:[#allocation2 + $0x2768] ss:$16 sps:$4 sm:$0xff]  }
 0x4e3   : > { %9806 = vmatprep.subr.bf16.mxu0 %v13500_v5  ;;  %9978 = vmatprep.subr.bf16.mxu1 %v13503_v6  ;;  %v13584_v5 = vld [vmem:[#allocation2 + $0x2784] ss:$16 sps:$4 sm:$0xff]   ;;  %v13587_v6 = vld [vmem:[#allocation2 + $0x278c] ss:$16 sps:$4 sm:$0xff]  }
 0x4e6   : > { %9807 = vmatpush1.bf16.msra.mxu0 %v13498_v9  ;;  %9979 = vmatpush1.bf16.msra.mxu1 %v13501_v11  ;;  %v13582_v9 = vld [vmem:[#allocation2 + $0x2780] ss:$16 sps:$4 sm:$0xff]   ;;  %v13585_v11 = vld [vmem:[#allocation2 + $0x2788] ss:$16 sps:$4 sm:$0xff]  }
 0x4e7   : > { %9808 = vmatprep.subr.bf16.mxu0 %v13506_v19  ;;  %9980 = vmatprep.subr.bf16.mxu1 %v13509_v22  ;;  %v13590_v19 = vld [vmem:[#allocation2 + $0x27a4] ss:$16 sps:$4 sm:$0xff]   ;;  %v13593_v22 = vld [vmem:[#allocation2 + $0x27ac] ss:$16 sps:$4 sm:$0xff]  }
 0x4ea   : > { %9809 = vmatpush1.bf16.msra.mxu0 %v13504_v33  ;;  %9981 = vmatpush1.bf16.msra.mxu1 %v13507_v38  ;;  %v13588_v33 = vld [vmem:[#allocation2 + $0x27a0] ss:$16 sps:$4 sm:$0xff]   ;;  %v13591_v38 = vld [vmem:[#allocation2 + $0x27a8] ss:$16 sps:$4 sm:$0xff]  }
 0x4eb   : > { %9821 = vmatprep.subr.bf16.mxu0 %v13512_v21  ;;  %9993 = vmatprep.subr.bf16.mxu1 %v13515_v27  ;;  %v13594_v21 = vld [vmem:[#allocation2 + $0x27c0] ss:$16 sps:$4 sm:$0xff]   ;;  %v13597_v27 = vld [vmem:[#allocation2 + $0x27c8] ss:$16 sps:$4 sm:$0xff]  }
 0x4ed   : > { %9811 = vmatmul.mubr.bf16.vlgmr.msra.gmra.mrb[0].mxu0 %v8394_v30  ;;  %9983 = vmatmul.mubr.bf16.vlgmr.msra.gmra.mrb[0].mxu1 %v8394_v30  ;;  %v8398_v30 = vrot.slane %v13915_v34, 2 }
 0x4ee   : > { %9822 = vmatpush1.bf16.msra.mxu0 %v13510_v13  ;;  %9994 = vmatpush1.bf16.msra.mxu1 %v13513_v8  ;;  %v13600_v13 = vld [vmem:[#allocation2 + $0x27e0] ss:$16 sps:$4 sm:$0xff]   ;;  %v13603_v8 = vld [vmem:[#allocation2 + $0x27e8] ss:$16 sps:$4 sm:$0xff]  }
 0x4ef   : > { %9823 = vmatprep.subr.bf16.mxu0 %v13518_v31  ;;  %9995 = vmatprep.subr.bf16.mxu1 %v13521_v36  ;;  %v8399_v31 = vrot.slane %v13919_v43, 2 }
 0x4f0   : > { %9853 = vmatprep.mubr.bf16.mxu0 %v8403_v14  ;;  %10025 = vmatprep.mubr.bf16.mxu1 %v8403_v14 }
 0x4f1   : > { %v8400_v36 = vsel %vm8379_vm3, %v8398_v30, %v8399_v31 }
 0x4f2   : > { %9824 = vmatpush1.bf16.msra.mxu0 %v13516_v15  ;;  %9996 = vmatpush1.bf16.msra.mxu1 %v13519_v48 }
 0x4f3   : > { %9825 = vmatprep.subr.bf16.mxu0 %v13524_v60  ;;  %9997 = vmatprep.subr.bf16.mxu1 %v13527_v32 }
 0x4f6   : > { %9826 = vmatpush1.bf16.msra.mxu0 %v13522_v55  ;;  %9998 = vmatpush1.bf16.msra.mxu1 %v13525_v35 }
 0x4f7   : > { %9827 = vmatprep.subr.bf16.mxu0 %v13530_v50  ;;  %9999 = vmatprep.subr.bf16.mxu1 %v13533_v37 }
 0x4fa   : > { %9828 = vmatpush1.bf16.msra.mxu0 %v13528_v18  ;;  %10000 = vmatpush1.bf16.msra.mxu1 %v13531_v40 }
 0x4fb   : > { %9829 = vmatprep.subr.bf16.mxu0 %v13536_v1  ;;  %10001 = vmatprep.subr.bf16.mxu1 %v13539_v2 }
 0x4fe   : > { %9830 = vmatpush1.bf16.msra.mxu0 %v13534_v42  ;;  %10002 = vmatpush1.bf16.msra.mxu1 %v13537_v3 }
 0x4ff   : > { %9831 = vmatprep.subr.bf16.mxu0 %v13542_v53  ;;  %10003 = vmatprep.subr.bf16.mxu1 %v13545_v51 }
 0x502   : > { %9832 = vmatpush1.bf16.msra.mxu0 %v13540_v54  ;;  %10004 = vmatpush1.bf16.msra.mxu1 %v13543_v44 }
 0x503   : > { %9833 = vmatprep.subr.bf16.mxu0 %v13548_v39  ;;  %10005 = vmatprep.subr.bf16.mxu1 %v13551_v17 }
 0x506   : > { %9834 = vmatpush1.bf16.msra.mxu0 %v13546_v16  ;;  %10006 = vmatpush1.bf16.msra.mxu1 %v13549_v56 }
 0x507   : > { %9835 = vmatprep.subr.bf16.mxu0 %v13554_v52  ;;  %10007 = vmatprep.subr.bf16.mxu1 %v13557_v4 }
 0x50a   : > { %9836 = vmatpush1.bf16.msra.mxu0 %v13552_v46  ;;  %10008 = vmatpush1.bf16.msra.mxu1 %v13555_v57 }
 0x50b   : > { %9837 = vmatprep.subr.bf16.mxu0 %v13560_v41  ;;  %10009 = vmatprep.subr.bf16.mxu1 %v13563_v58 }
 0x50e   : > { %9838 = vmatpush1.bf16.msra.mxu0 %v13558_v10  ;;  %10010 = vmatpush1.bf16.msra.mxu1 %v13561_v63 }
 0x50f   : > { %9839 = vmatprep.subr.bf16.mxu0 %v13566_v45  ;;  %10011 = vmatprep.subr.bf16.mxu1 %v13569_v12 }
 0x512   : > { %9840 = vmatpush1.bf16.msra.mxu0 %v13564_v0  ;;  %10012 = vmatpush1.bf16.msra.mxu1 %v13567_v7 }
 0x513   : > { %9841 = vmatprep.subr.bf16.mxu0 %v13572_v24  ;;  %10013 = vmatprep.subr.bf16.mxu1 %v13575_v61 }
 0x516   : > { %9842 = vmatpush1.bf16.msra.mxu0 %v13570_v62  ;;  %10014 = vmatpush1.bf16.msra.mxu1 %v13573_v25 }
 0x517   : > { %9843 = vmatprep.subr.bf16.mxu0 %v13578_v59  ;;  %10015 = vmatprep.subr.bf16.mxu1 %v13581_v26 }
 0x51a   : > { %9844 = vmatpush1.bf16.msra.mxu0 %v13576_v47  ;;  %10016 = vmatpush1.bf16.msra.mxu1 %v13579_v49 }
 0x51b   : > { %9845 = vmatprep.subr.bf16.mxu0 %v13584_v5  ;;  %10017 = vmatprep.subr.bf16.mxu1 %v13587_v6 }
 0x51e   : > { %9846 = vmatpush1.bf16.msra.mxu0 %v13582_v9  ;;  %10018 = vmatpush1.bf16.msra.mxu1 %v13585_v11 }
 0x51f   : > { %9847 = vmatprep.subr.bf16.mxu0 %v13590_v19  ;;  %10019 = vmatprep.subr.bf16.mxu1 %v13593_v22 }
 0x522   : > { %9848 = vmatpush1.bf16.msra.mxu0 %v13588_v33  ;;  %10020 = vmatpush1.bf16.msra.mxu1 %v13591_v38 }
 0x523   : > { %9849 = vmatprep.subr.bf16.mxu0 %v13596_v23  ;;  %10021 = vmatprep.subr.bf16.mxu1 %v13599_v20 }
 0x526   : > { %9850 = vmatpush1.bf16.msra.mxu0 %v13594_v21  ;;  %10022 = vmatpush1.bf16.msra.mxu1 %v13597_v27 }
 0x527   : > { %9851 = vmatprep.subr.bf16.mxu0 %v13602_v28  ;;  %10023 = vmatprep.subr.bf16.mxu1 %v13605_v29 }
 0x52a   : > { %9852 = vmatpush1.bf16.msra.mxu0 %v13600_v13  ;;  %10024 = vmatpush1.bf16.msra.mxu1 %v13603_v8 }
 0x52d   : > { %9854 = vmatmul.mubr.bf16.vlgmr.msra.gmra.mrb[0].mxu0 %v8400_v36  ;;  %10026 = vmatmul.mubr.bf16.vlgmr.msra.gmra.mrb[0].mxu1 %v8400_v36 }
 0x600   : > { %v9855_v14 = vpop.f32.mrb[0].mxu0  ;;  %v10027_v15 = vpop.f32.mrb[0].mxu1 }
 0x601   : > { %10044 = vst [vmem:[%s274_s22] sm:$0xff] %v9855_v14  ;;  %10046 = vst [vmem:[%s274_s22 + $0x10] sm:$0xff] %v10027_v15  ;;  %v9857_v34 = vpop.f32.mrb[1].mxu0  ;;  %v10029_v48 = vpop.f32.mrb[1].mxu1 }
 0x602   : > { %10045 = vst [vmem:[%s274_s22 + $0x8] sm:$0xff] %v9857_v34  ;;  %10047 = vst [vmem:[%s274_s22 + $0x18] sm:$0xff] %v10029_v48  ;;  %v9859_v43 = vpop.f32.mrb[2].mxu0  ;;  %v10031_v60 = vpop.f32.mrb[2].mxu1 }
 0x603   : > { %10048 = vst [vmem:[%s274_s22 + $0x20] sm:$0xff] %v9859_v43  ;;  %10050 = vst [vmem:[%s274_s22 + $0x30] sm:$0xff] %v10031_v60  ;;  %v9861_v32 = vpop.f32.mrb[3].mxu0  ;;  %v10033_v55 = vpop.f32.mrb[3].mxu1 }
 0x604   : > { %10049 = vst [vmem:[%s274_s22 + $0x28] sm:$0xff] %v9861_v32  ;;  %10051 = vst [vmem:[%s274_s22 + $0x38] sm:$0xff] %v10033_v55 }
 0x605 PF: > { %s14_s14 = sadd.s32 1, %s13660_s14   ;;  %s14084_s12 = smov %s13656_s13 }
 0x606   : > { %p11_p4 = scmp.ge.s32.totalorder %s14_s14, 6   ;;  %s14085_s13 = smov %s14087_s16 }
 0x608   :  { %13 = sbr.rel (!%p11_p4) target bundleno = 2 (0x2), region = 74 }
 0x60f   :  { %10084 = vsyncpa [#allocation3], 1 }
 0x610   :  { %10086 = vsyncpa [#allocation3 + $0x1], 1 }

</bundles_post_ra>
